<compile_context>
chip_gen: v6e
topology: v6e:2x2x1
jax: 0.10.0
libtpu: 0.0.40
codegen_flags: <defaults>
</compile_context>

<pallas_src>
import jax
import jax.numpy as jnp
from jax.experimental import pallas as pl
from jax.experimental.pallas import tpu as pltpu


# ----------------------------------------------------------------------------
# helpers
# ----------------------------------------------------------------------------
def _ceil_to(x, m):
    return ((x + m - 1) // m) * m


def _pad2d(x, rows, cols):
    r, c = x.shape
    if r == rows and c == cols:
        return x
    return jnp.pad(x, ((0, rows - r), (0, cols - c)))


# ----------------------------------------------------------------------------
# Pallas kernel: y = relu?( A @ B + bias ), single full-array block
# ----------------------------------------------------------------------------
def _make_linear_kernel(apply_relu):
    def kernel(a_ref, b_ref, bias_ref, o_ref):
        acc = jnp.dot(a_ref[...], b_ref[...],
                      preferred_element_type=jnp.float32)
        y = acc + bias_ref[...]                      # (1, Np) broadcasts over rows
        if apply_relu:
            y = jnp.maximum(y, 0.0)
        o_ref[...] = y.astype(o_ref.dtype)
    return kernel


def pallas_linear(a, b, bias, relu=False):
    """out = relu?(a @ b + bias); bias broadcast per output column.

    Operands are padded to (8, 128)-aligned shapes and processed as a single
    full block (single grid step): K fits in one tile for every layer of this
    model, so there is no reduction loop and no accumulator scratch.
    """
    M, K = a.shape
    K2, N = b.shape
    assert K == K2
    Mp = _ceil_to(M, 8)
    Kp = _ceil_to(K, 128)
    Np = _ceil_to(N, 128)

    a_p = _pad2d(a.astype(jnp.float32), Mp, Kp)
    b_p = _pad2d(b.astype(jnp.float32), Kp, Np)
    bias_p = _pad2d(bias.astype(jnp.float32).reshape(1, N), 1, Np)

    out = pl.pallas_call(
        _make_linear_kernel(relu),
        out_shape=jax.ShapeDtypeStruct((Mp, Np), jnp.float32),
        grid=(1,),
        in_specs=[
            pl.BlockSpec((Mp, Kp), lambda i: (0, 0)),
            pl.BlockSpec((Kp, Np), lambda i: (0, 0)),
            pl.BlockSpec((1, Np), lambda i: (0, 0)),
        ],
        out_specs=pl.BlockSpec((Mp, Np), lambda i: (0, 0)),
        compiler_params=pltpu.CompilerParams(
            dimension_semantics=("arbitrary",)),
    )(a_p, b_p, bias_p)
    return out[:M, :N]


# ----------------------------------------------------------------------------
# glue ops (tiny; kept in plain jnp so XLA fuses them — no pallas launch cost)
# ----------------------------------------------------------------------------
def im2col(x, kh, kw, stride=1):
    # x: (N, H, W, C) -> (N*Ho*Wo, kh*kw*C), feature order (kh, kw, Cin)
    N, H, W, C = x.shape
    Ho = (H - kh) // stride + 1
    Wo = (W - kw) // stride + 1
    cols = []
    for i in range(kh):
        for j in range(kw):
            cols.append(x[:, i:i + Ho * stride:stride,
                          j:j + Wo * stride:stride, :])
    p = jnp.stack(cols, axis=3)                      # (N, Ho, Wo, kh*kw, C)
    return p.reshape(N * Ho * Wo, kh * kw * C), (N, Ho, Wo)


def maxpool2x2(x):
    # (N, H, W, C) -> (N, H//2, W//2, C), floor semantics like nn.MaxPool2d(2)
    N, H, W, C = x.shape
    Ho, Wo = H // 2, W // 2
    x = x[:, :Ho * 2, :Wo * 2, :]
    x = x.reshape(N, Ho, 2, Wo, 2, C)
    return jnp.max(x, axis=(2, 4))


# ----------------------------------------------------------------------------
# parameters (deterministic synthetic init; shapes from the module __init__)
# ----------------------------------------------------------------------------
def init_params(key):
    ks = jax.random.split(key, 6)
    return {
        # cnn1: Conv2d(3, 16, k=3)  -> (3*3*3, 16)
        "w1": 0.10 * jax.random.normal(ks[0], (27, 16), jnp.float32),
        "b1": 0.01 * jax.random.normal(ks[1], (16,), jnp.float32),
        # cnn2: Conv2d(16, 32, k=3) -> (3*3*16, 32)
        "w2": 0.05 * jax.random.normal(ks[2], (144, 32), jnp.float32),
        "b2": 0.01 * jax.random.normal(ks[3], (32,), jnp.float32),
        # fc1: Linear(32*5*5, 10)
        "wfc": 0.03 * jax.random.normal(ks[4], (800, 10), jnp.float32),
        "bfc": 0.01 * jax.random.normal(ks[5], (10,), jnp.float32),
    }


# ----------------------------------------------------------------------------
# forward pass (matches CNN.forward; `desc` is accepted but unused, as in spec)
# ----------------------------------------------------------------------------
def forward(params, state, desc=None):
    p = params
    # state arrives NCHW (PyTorch layout); convert to NHWC for im2col.
    x = jnp.transpose(state.astype(jnp.float32), (0, 2, 3, 1))   # (N, 28, 28, 3)

    # conv1 + relu (fused epilogue), then maxpool 2x2
    patches, (n, ho, wo) = im2col(x, 3, 3, 1)                    # (N*26*26, 27)
    x = pallas_linear(patches, p["w1"], p["b1"], relu=True)
    x = maxpool2x2(x.reshape(n, ho, wo, 16))                     # (N, 13, 13, 16)

    # conv2 + relu (fused epilogue), then maxpool 2x2
    patches, (n, ho, wo) = im2col(x, 3, 3, 1)                    # (N*11*11, 144)
    x = pallas_linear(patches, p["w2"], p["b2"], relu=True)
    x = maxpool2x2(x.reshape(n, ho, wo, 32))                     # (N, 5, 5, 32)

    # flatten + fc1 (no activation; module returns logits)
    x = x.reshape(n, -1)                                         # (N, 800)
    return pallas_linear(x, p["wfc"], p["bfc"], relu=False)      # (N, 10)


if __name__ == "__main__":
    key = jax.random.PRNGKey(0)
    kp, ks, kd = jax.random.split(key, 3)

    params = init_params(kp)
    state = jax.random.normal(ks, (2, 3, 28, 28), jnp.float32)   # batch=2
    desc = jax.random.normal(kd, (2, 8), jnp.float32)            # unused by forward

    fwd = jax.jit(forward)
    out = jax.block_until_ready(fwd(params, state, desc))

    assert out.shape == (2, 10)
    assert bool(jnp.all(jnp.isfinite(out)))
    print("KERNEL_OK")
</pallas_src>

<mosaic_0001>
module attributes {stable_mosaic.version = 11 : i64} {
  func.func @kernel(%arg0: i32, %arg1: memref<1352x128xf32, #tpu.memory_space<vmem>>, %arg2: memref<128x128xf32, #tpu.memory_space<vmem>>, %arg3: memref<1x128xf32, #tpu.memory_space<vmem>>, %arg4: memref<1352x128xf32, #tpu.memory_space<vmem>>) attributes {dimension_semantics = [#tpu.dimension_semantics<arbitrary>], iteration_bounds = array<i64: 1>, scalar_prefetch = 0 : i64, scratch_operands = 0 : i64, tpu.core_type = #tpu.core_type<tc>, window_params = [{pipeline_mode = #tpu.pipeline_mode<synchronous>, transform_indices = @transform_0, window_bounds = array<i64: 1352, 128>}, {pipeline_mode = #tpu.pipeline_mode<synchronous>, transform_indices = @transform_1, window_bounds = array<i64: 128, 128>}, {pipeline_mode = #tpu.pipeline_mode<synchronous>, transform_indices = @transform_2, window_bounds = array<i64: 1, 128>}, {pipeline_mode = #tpu.pipeline_mode<synchronous>, transform_indices = @transform_3, window_bounds = array<i64: 1352, 128>}]} {
    %c0 = arith.constant 0 : index
    %c0_0 = arith.constant 0 : index
    %0 = vector.load %arg1[%c0, %c0_0] : memref<1352x128xf32, #tpu.memory_space<vmem>>, vector<1352x128xf32>
    %c0_1 = arith.constant 0 : index
    %c0_2 = arith.constant 0 : index
    %1 = vector.load %arg2[%c0_1, %c0_2] : memref<128x128xf32, #tpu.memory_space<vmem>>, vector<128x128xf32>
    %cst = arith.constant dense<0.000000e+00> : vector<1352x128xf32>
    %2 = tpu.matmul %0, %1, %cst {dimension_numbers = #tpu.dot_dimension_numbers<[1], [0], [0], [1], [0, 0, 1, 1], [], []>} : vector<1352x128xf32>, vector<128x128xf32>, vector<1352x128xf32> -> vector<1352x128xf32>
    %c0_3 = arith.constant 0 : index
    %c0_4 = arith.constant 0 : index
    %3 = vector.load %arg3[%c0_3, %c0_4] : memref<1x128xf32, #tpu.memory_space<vmem>>, vector<1x128xf32>
    %4 = vector.broadcast %3 : vector<1x128xf32> to vector<1352x128xf32>
    %5 = arith.addf %2, %4 : vector<1352x128xf32>
    %cst_5 = arith.constant 0.000000e+00 : f32
    %6 = vector.broadcast %cst_5 : f32 to vector<1352x128xf32>
    %7 = arith.maximumf %5, %6 : vector<1352x128xf32>
    %c0_6 = arith.constant 0 : index
    %c0_7 = arith.constant 0 : index
    %8 = vector.load %arg4[%c0_6, %c0_7] : memref<1352x128xf32, #tpu.memory_space<vmem>>, vector<1352x128xf32>
    tpu.vector_store %arg4[%c0_6, %c0_7], %7 {strides = array<i32>} : memref<1352x128xf32, #tpu.memory_space<vmem>>, vector<1352x128xf32>,
    return
  }
  func.func @transform_0(%arg0: i32) -> (i32, i32) {
    %c0_i32 = arith.constant 0 : i32
    %c0_i32_0 = arith.constant 0 : i32
    %c0_i32_1 = arith.constant 0 : i32
    return %c0_i32, %c0_i32_0 : i32, i32
  }
  func.func @transform_1(%arg0: i32) -> (i32, i32) {
    %c0_i32 = arith.constant 0 : i32
    %c0_i32_0 = arith.constant 0 : i32
    %c0_i32_1 = arith.constant 0 : i32
    return %c0_i32, %c0_i32_0 : i32, i32
  }
  func.func @transform_2(%arg0: i32) -> (i32, i32) {
    %c0_i32 = arith.constant 0 : i32
    %c0_i32_0 = arith.constant 0 : i32
    %c0_i32_1 = arith.constant 0 : i32
    return %c0_i32, %c0_i32_0 : i32, i32
  }
  func.func @transform_3(%arg0: i32) -> (i32, i32) {
    %c0_i32 = arith.constant 0 : i32
    %c0_i32_0 = arith.constant 0 : i32
    %c0_i32_1 = arith.constant 0 : i32
    return %c0_i32, %c0_i32_0 : i32, i32
  }
}

module attributes {stable_mosaic.version = 11 : i64} {
  func.func @kernel(%arg0: i32, %arg1: memref<248x256xf32, #tpu.memory_space<vmem>>, %arg2: memref<256x128xf32, #tpu.memory_space<vmem>>, %arg3: memref<1x128xf32, #tpu.memory_space<vmem>>, %arg4: memref<248x128xf32, #tpu.memory_space<vmem>>) attributes {dimension_semantics = [#tpu.dimension_semantics<arbitrary>], iteration_bounds = array<i64: 1>, scalar_prefetch = 0 : i64, scratch_operands = 0 : i64, tpu.core_type = #tpu.core_type<tc>, window_params = [{pipeline_mode = #tpu.pipeline_mode<synchronous>, transform_indices = @transform_0, window_bounds = array<i64: 248, 256>}, {pipeline_mode = #tpu.pipeline_mode<synchronous>, transform_indices = @transform_1, window_bounds = array<i64: 256, 128>}, {pipeline_mode = #tpu.pipeline_mode<synchronous>, transform_indices = @transform_2, window_bounds = array<i64: 1, 128>}, {pipeline_mode = #tpu.pipeline_mode<synchronous>, transform_indices = @transform_3, window_bounds = array<i64: 248, 128>}]} {
    %c0 = arith.constant 0 : index
    %c0_0 = arith.constant 0 : index
    %0 = vector.load %arg1[%c0, %c0_0] : memref<248x256xf32, #tpu.memory_space<vmem>>, vector<248x256xf32>
    %c0_1 = arith.constant 0 : index
    %c0_2 = arith.constant 0 : index
    %1 = vector.load %arg2[%c0_1, %c0_2] : memref<256x128xf32, #tpu.memory_space<vmem>>, vector<256x128xf32>
    %cst = arith.constant dense<0.000000e+00> : vector<248x128xf32>
    %2 = tpu.matmul %0, %1, %cst {dimension_numbers = #tpu.dot_dimension_numbers<[1], [0], [0], [1], [0, 0, 1, 1], [], []>} : vector<248x256xf32>, vector<256x128xf32>, vector<248x128xf32> -> vector<248x128xf32>
    %c0_3 = arith.constant 0 : index
    %c0_4 = arith.constant 0 : index
    %3 = vector.load %arg3[%c0_3, %c0_4] : memref<1x128xf32, #tpu.memory_space<vmem>>, vector<1x128xf32>
    %4 = vector.broadcast %3 : vector<1x128xf32> to vector<248x128xf32>
    %5 = arith.addf %2, %4 : vector<248x128xf32>
    %cst_5 = arith.constant 0.000000e+00 : f32
    %6 = vector.broadcast %cst_5 : f32 to vector<248x128xf32>
    %7 = arith.maximumf %5, %6 : vector<248x128xf32>
    %c0_6 = arith.constant 0 : index
    %c0_7 = arith.constant 0 : index
    %8 = vector.load %arg4[%c0_6, %c0_7] : memref<248x128xf32, #tpu.memory_space<vmem>>, vector<248x128xf32>
    tpu.vector_store %arg4[%c0_6, %c0_7], %7 {strides = array<i32>} : memref<248x128xf32, #tpu.memory_space<vmem>>, vector<248x128xf32>,
    return
  }
  func.func @transform_0(%arg0: i32) -> (i32, i32) {
    %c0_i32 = arith.constant 0 : i32
    %c0_i32_0 = arith.constant 0 : i32
    %c0_i32_1 = arith.constant 0 : i32
    return %c0_i32, %c0_i32_0 : i32, i32
  }
  func.func @transform_1(%arg0: i32) -> (i32, i32) {
    %c0_i32 = arith.constant 0 : i32
    %c0_i32_0 = arith.constant 0 : i32
    %c0_i32_1 = arith.constant 0 : i32
    return %c0_i32, %c0_i32_0 : i32, i32
  }
  func.func @transform_2(%arg0: i32) -> (i32, i32) {
    %c0_i32 = arith.constant 0 : i32
    %c0_i32_0 = arith.constant 0 : i32
    %c0_i32_1 = arith.constant 0 : i32
    return %c0_i32, %c0_i32_0 : i32, i32
  }
  func.func @transform_3(%arg0: i32) -> (i32, i32) {
    %c0_i32 = arith.constant 0 : i32
    %c0_i32_0 = arith.constant 0 : i32
    %c0_i32_1 = arith.constant 0 : i32
    return %c0_i32, %c0_i32_0 : i32, i32
  }
}

module attributes {stable_mosaic.version = 11 : i64} {
  func.func @kernel(%arg0: i32, %arg1: memref<8x896xf32, #tpu.memory_space<vmem>>, %arg2: memref<896x128xf32, #tpu.memory_space<vmem>>, %arg3: memref<1x128xf32, #tpu.memory_space<vmem>>, %arg4: memref<8x128xf32, #tpu.memory_space<vmem>>) attributes {dimension_semantics = [#tpu.dimension_semantics<arbitrary>], iteration_bounds = array<i64: 1>, scalar_prefetch = 0 : i64, scratch_operands = 0 : i64, tpu.core_type = #tpu.core_type<tc>, window_params = [{pipeline_mode = #tpu.pipeline_mode<synchronous>, transform_indices = @transform_0, window_bounds = array<i64: 8, 896>}, {pipeline_mode = #tpu.pipeline_mode<synchronous>, transform_indices = @transform_1, window_bounds = array<i64: 896, 128>}, {pipeline_mode = #tpu.pipeline_mode<synchronous>, transform_indices = @transform_2, window_bounds = array<i64: 1, 128>}, {pipeline_mode = #tpu.pipeline_mode<synchronous>, transform_indices = @transform_3, window_bounds = array<i64: 8, 128>}]} {
    %c0 = arith.constant 0 : index
    %c0_0 = arith.constant 0 : index
    %0 = vector.load %arg1[%c0, %c0_0] : memref<8x896xf32, #tpu.memory_space<vmem>>, vector<8x896xf32>
    %c0_1 = arith.constant 0 : index
    %c0_2 = arith.constant 0 : index
    %1 = vector.load %arg2[%c0_1, %c0_2] : memref<896x128xf32, #tpu.memory_space<vmem>>, vector<896x128xf32>
    %cst = arith.constant dense<0.000000e+00> : vector<8x128xf32>
    %2 = tpu.matmul %0, %1, %cst {dimension_numbers = #tpu.dot_dimension_numbers<[1], [0], [0], [1], [0, 0, 1, 1], [], []>} : vector<8x896xf32>, vector<896x128xf32>, vector<8x128xf32> -> vector<8x128xf32>
    %c0_3 = arith.constant 0 : index
    %c0_4 = arith.constant 0 : index
    %3 = vector.load %arg3[%c0_3, %c0_4] : memref<1x128xf32, #tpu.memory_space<vmem>>, vector<1x128xf32>
    %4 = vector.broadcast %3 : vector<1x128xf32> to vector<8x128xf32>
    %5 = arith.addf %2, %4 : vector<8x128xf32>
    %c0_5 = arith.constant 0 : index
    %c0_6 = arith.constant 0 : index
    %6 = vector.load %arg4[%c0_5, %c0_6] : memref<8x128xf32, #tpu.memory_space<vmem>>, vector<8x128xf32>
    tpu.vector_store %arg4[%c0_5, %c0_6], %5 {strides = array<i32>} : memref<8x128xf32, #tpu.memory_space<vmem>>, vector<8x128xf32>,
    return
  }
  func.func @transform_0(%arg0: i32) -> (i32, i32) {
    %c0_i32 = arith.constant 0 : i32
    %c0_i32_0 = arith.constant 0 : i32
    %c0_i32_1 = arith.constant 0 : i32
    return %c0_i32, %c0_i32_0 : i32, i32
  }
  func.func @transform_1(%arg0: i32) -> (i32, i32) {
    %c0_i32 = arith.constant 0 : i32
    %c0_i32_0 = arith.constant 0 : i32
    %c0_i32_1 = arith.constant 0 : i32
    return %c0_i32, %c0_i32_0 : i32, i32
  }
  func.func @transform_2(%arg0: i32) -> (i32, i32) {
    %c0_i32 = arith.constant 0 : i32
    %c0_i32_0 = arith.constant 0 : i32
    %c0_i32_1 = arith.constant 0 : i32
    return %c0_i32, %c0_i32_0 : i32, i32
  }
  func.func @transform_3(%arg0: i32) -> (i32, i32) {
    %c0_i32 = arith.constant 0 : i32
    %c0_i32_0 = arith.constant 0 : i32
    %c0_i32_1 = arith.constant 0 : i32
    return %c0_i32, %c0_i32_0 : i32, i32
  }
}

</mosaic_0001>

<bundles_post_ra>
// kernel: forward.3
= control target key start
LH: loop header
LB: loop body
LE: loop exit
PB: predicated region body
PF: predicated region fallthrough
CT: control target
= control target key end

     0   :  { %v2219_v0 = vmov 0.0   ;;  %vm2220_vm0 = vmmov 0   ;;  %s3848_s1 = inlined_call_operand.vmem [shape: f32[128,128], index: 1, kind: input, shape index: {}]   ;;  %s3849_s0 = inlined_call_operand.vmem [shape: f32[1352,128], index: 0, kind: input, shape index: {}]   ;;  %s3850_s2 = inlined_call_operand.vmem [shape: f32[1,128], index: 2, kind: input, shape index: {}]   ;;  %s3851_s3 = inlined_call_operand.vmem [shape: f32[1352,128], index: 3, kind: output, shape index: {}]  }
   0x1   :  { %1644 = vmatprep.subr.mxu0 %v2219_v0  ;;  %v198_v1 = vld [vmem:[%s3848_s1 + $0x78] sm:$0xff]  ;;  %2183 = vmatprep.subr.mxu1 %v2219_v0  ;;  %v197_v2 = vld [vmem:[%s3848_s1 + $0x70] sm:$0xff]  ;;  %v196_v3 = vld [vmem:[%s3848_s1 + $0x68] sm:$0xff] }
   0x2   :  { %1645 = vmatpush3.msra.mxu0 %v198_v1  ;;  %2199 = vmatpush3.msra.mxu1 %v198_v1  ;;  %v195_v4 = vld [vmem:[%s3848_s1 + $0x60] sm:$0xff]  ;;  %v194_v5 = vld [vmem:[%s3848_s1 + $0x58] sm:$0xff]  ;;  %v193_v6 = vld [vmem:[%s3848_s1 + $0x50] sm:$0xff] }
   0x3   :  { %1646 = vmatprep.subr.mxu0 %v2219_v0  ;;  %2184 = vmatprep.subr.mxu1 %v2219_v0  ;;  %v192_v7 = vld [vmem:[%s3848_s1 + $0x48] sm:$0xff]  ;;  %v191_v8 = vld [vmem:[%s3848_s1 + $0x40] sm:$0xff]  ;;  %v190_v9 = vld [vmem:[%s3848_s1 + $0x38] sm:$0xff] }
   0x4   :  { %1647 = vmatpush3.msra.mxu0 %v197_v2  ;;  %2200 = vmatpush3.msra.mxu1 %v197_v2  ;;  %v189_v10 = vld [vmem:[%s3848_s1 + $0x30] sm:$0xff]  ;;  %v188_v11 = vld [vmem:[%s3848_s1 + $0x28] sm:$0xff]  ;;  %v187_v12 = vld [vmem:[%s3848_s1 + $0x20] sm:$0xff] }
   0x5   :  { %1648 = vmatprep.subr.mxu0 %v2219_v0  ;;  %2185 = vmatprep.subr.mxu1 %v2219_v0  ;;  %v186_v13 = vld [vmem:[%s3848_s1 + $0x18] sm:$0xff]  ;;  %v185_v14 = vld [vmem:[%s3848_s1 + $0x10] sm:$0xff]  ;;  %v184_v15 = vld [vmem:[%s3848_s1 + $0x8] sm:$0xff] }
   0x6   :  { %1649 = vmatpush3.msra.mxu0 %v196_v3  ;;  %2201 = vmatpush3.msra.mxu1 %v196_v3  ;;  %v183_v16 = vld [vmem:[%s3848_s1] sm:$0xff]  ;;  %v99_v18 = vld [vmem:[%s3849_s0 + $0x2a8] sm:$0xff]  ;;  %v100_v20 = vld [vmem:[%s3849_s0 + $0x2b0] sm:$0xff] }
   0x7   :  { %1650 = vmatprep.subr.mxu0 %v2219_v0  ;;  %2186 = vmatprep.subr.mxu1 %v2219_v0  ;;  %v14_v17 = vld [vmem:[%s3849_s0] sm:$0xff]  ;;  %v15_v19 = vld [vmem:[%s3849_s0 + $0x8] sm:$0xff]  ;;  %v16_v21 = vld [vmem:[%s3849_s0 + $0x10] sm:$0xff] }
   0x8   :  { %1651 = vmatpush3.msra.mxu0 %v195_v4  ;;  %2202 = vmatpush3.msra.mxu1 %v195_v4  ;;  %v101_v22 = vld [vmem:[%s3849_s0 + $0x2b8] sm:$0xff]  ;;  %v102_v24 = vld [vmem:[%s3849_s0 + $0x2c0] sm:$0xff]  ;;  %v103_v26 = vld [vmem:[%s3849_s0 + $0x2c8] sm:$0xff] }
   0x9   :  { %1652 = vmatprep.subr.mxu0 %v2219_v0  ;;  %2187 = vmatprep.subr.mxu1 %v2219_v0  ;;  %v17_v23 = vld [vmem:[%s3849_s0 + $0x18] sm:$0xff]  ;;  %v18_v25 = vld [vmem:[%s3849_s0 + $0x20] sm:$0xff]  ;;  %v19_v27 = vld [vmem:[%s3849_s0 + $0x28] sm:$0xff] }
   0xa   :  { %1653 = vmatpush3.msra.mxu0 %v194_v5  ;;  %2203 = vmatpush3.msra.mxu1 %v194_v5  ;;  %v104_v28 = vld [vmem:[%s3849_s0 + $0x2d0] sm:$0xff]  ;;  %v105_v30 = vld [vmem:[%s3849_s0 + $0x2d8] sm:$0xff]  ;;  %v106_v32 = vld [vmem:[%s3849_s0 + $0x2e0] sm:$0xff] }
   0xb   :  { %1654 = vmatprep.subr.mxu0 %v2219_v0  ;;  %2188 = vmatprep.subr.mxu1 %v2219_v0  ;;  %v20_v29 = vld [vmem:[%s3849_s0 + $0x30] sm:$0xff]  ;;  %v21_v31 = vld [vmem:[%s3849_s0 + $0x38] sm:$0xff]  ;;  %v22_v33 = vld [vmem:[%s3849_s0 + $0x40] sm:$0xff] }
   0xc   :  { %1655 = vmatpush3.msra.mxu0 %v193_v6  ;;  %2204 = vmatpush3.msra.mxu1 %v193_v6  ;;  %v107_v34 = vld [vmem:[%s3849_s0 + $0x2e8] sm:$0xff]  ;;  %v108_v36 = vld [vmem:[%s3849_s0 + $0x2f0] sm:$0xff]  ;;  %v109_v38 = vld [vmem:[%s3849_s0 + $0x2f8] sm:$0xff] }
   0xd   :  { %1656 = vmatprep.subr.mxu0 %v2219_v0  ;;  %2189 = vmatprep.subr.mxu1 %v2219_v0  ;;  %v23_v35 = vld [vmem:[%s3849_s0 + $0x48] sm:$0xff]  ;;  %v24_v37 = vld [vmem:[%s3849_s0 + $0x50] sm:$0xff]  ;;  %v25_v39 = vld [vmem:[%s3849_s0 + $0x58] sm:$0xff] }
   0xe   :  { %1657 = vmatpush3.msra.mxu0 %v192_v7  ;;  %2205 = vmatpush3.msra.mxu1 %v192_v7  ;;  %v110_v40 = vld [vmem:[%s3849_s0 + $0x300] sm:$0xff]  ;;  %v111_v42 = vld [vmem:[%s3849_s0 + $0x308] sm:$0xff]  ;;  %v112_v44 = vld [vmem:[%s3849_s0 + $0x310] sm:$0xff] }
   0xf   :  { %1658 = vmatprep.subr.mxu0 %v2219_v0  ;;  %2190 = vmatprep.subr.mxu1 %v2219_v0  ;;  %v26_v41 = vld [vmem:[%s3849_s0 + $0x60] sm:$0xff]  ;;  %v27_v43 = vld [vmem:[%s3849_s0 + $0x68] sm:$0xff]  ;;  %v28_v45 = vld [vmem:[%s3849_s0 + $0x70] sm:$0xff] }
  0x10   :  { %1659 = vmatpush3.msra.mxu0 %v191_v8  ;;  %2206 = vmatpush3.msra.mxu1 %v191_v8  ;;  %v113_v46 = vld [vmem:[%s3849_s0 + $0x318] sm:$0xff]  ;;  %v114_v48 = vld [vmem:[%s3849_s0 + $0x320] sm:$0xff]  ;;  %v115_v50 = vld [vmem:[%s3849_s0 + $0x328] sm:$0xff] }
  0x11   :  { %1660 = vmatprep.subr.mxu0 %v2219_v0  ;;  %2191 = vmatprep.subr.mxu1 %v2219_v0  ;;  %v29_v47 = vld [vmem:[%s3849_s0 + $0x78] sm:$0xff]  ;;  %v30_v49 = vld [vmem:[%s3849_s0 + $0x80] sm:$0xff]  ;;  %v31_v51 = vld [vmem:[%s3849_s0 + $0x88] sm:$0xff] }
  0x12   :  { %1661 = vmatpush3.msra.mxu0 %v190_v9  ;;  %2207 = vmatpush3.msra.mxu1 %v190_v9  ;;  %v116_v52 = vld [vmem:[%s3849_s0 + $0x330] sm:$0xff]  ;;  %v117_v54 = vld [vmem:[%s3849_s0 + $0x338] sm:$0xff]  ;;  %v118_v56 = vld [vmem:[%s3849_s0 + $0x340] sm:$0xff] }
  0x13   :  { %1662 = vmatprep.subr.mxu0 %v2219_v0  ;;  %2192 = vmatprep.subr.mxu1 %v2219_v0  ;;  %v32_v53 = vld [vmem:[%s3849_s0 + $0x90] sm:$0xff]  ;;  %v33_v55 = vld [vmem:[%s3849_s0 + $0x98] sm:$0xff]  ;;  %v34_v57 = vld [vmem:[%s3849_s0 + $0xa0] sm:$0xff] }
  0x14   :  { %1663 = vmatpush3.msra.mxu0 %v189_v10  ;;  %2208 = vmatpush3.msra.mxu1 %v189_v10  ;;  %v119_v58 = vld [vmem:[%s3849_s0 + $0x348] sm:$0xff]  ;;  %v120_v60 = vld [vmem:[%s3849_s0 + $0x350] sm:$0xff]  ;;  %v121_v62 = vld [vmem:[%s3849_s0 + $0x358] sm:$0xff] }
  0x15   :  { %1664 = vmatprep.subr.mxu0 %v2219_v0  ;;  %2193 = vmatprep.subr.mxu1 %v2219_v0  ;;  %v35_v59 = vld [vmem:[%s3849_s0 + $0xa8] sm:$0xff]  ;;  %v36_v61 = vld [vmem:[%s3849_s0 + $0xb0] sm:$0xff]  ;;  %v37_v63 = vld [vmem:[%s3849_s0 + $0xb8] sm:$0xff] }
  0x16   :  { %1665 = vmatpush3.msra.mxu0 %v188_v11  ;;  %2209 = vmatpush3.msra.mxu1 %v188_v11  ;;  %v122_v1 = vld [vmem:[%s3849_s0 + $0x360] sm:$0xff]  ;;  %v123_v3 = vld [vmem:[%s3849_s0 + $0x368] sm:$0xff]  ;;  %v124_v5 = vld [vmem:[%s3849_s0 + $0x370] sm:$0xff] }
  0x17   :  { %1666 = vmatprep.subr.mxu0 %v2219_v0  ;;  %2194 = vmatprep.subr.mxu1 %v2219_v0  ;;  %v38_v2 = vld [vmem:[%s3849_s0 + $0xc0] sm:$0xff]  ;;  %v39_v4 = vld [vmem:[%s3849_s0 + $0xc8] sm:$0xff]  ;;  %v40_v6 = vld [vmem:[%s3849_s0 + $0xd0] sm:$0xff] }
  0x18   :  { %1667 = vmatpush3.msra.mxu0 %v187_v12  ;;  %2210 = vmatpush3.msra.mxu1 %v187_v12  ;;  %v125_v7 = vld [vmem:[%s3849_s0 + $0x378] sm:$0xff]  ;;  %v126_v9 = vld [vmem:[%s3849_s0 + $0x380] sm:$0xff]  ;;  %v127_v11 = vld [vmem:[%s3849_s0 + $0x388] sm:$0xff] }
  0x19   :  { %1668 = vmatprep.subr.mxu0 %v2219_v0  ;;  %2195 = vmatprep.subr.mxu1 %v2219_v0  ;;  %v41_v8 = vld [vmem:[%s3849_s0 + $0xd8] sm:$0xff]  ;;  %v42_v10 = vld [vmem:[%s3849_s0 + $0xe0] sm:$0xff]  ;;  %v43_v12 = vld [vmem:[%s3849_s0 + $0xe8] sm:$0xff] }
  0x1a   :  { %1669 = vmatpush3.msra.mxu0 %v186_v13  ;;  %2211 = vmatpush3.msra.mxu1 %v186_v13  ;;  %v128_v13 = vld [vmem:[%s3849_s0 + $0x390] sm:$0xff] }
  0x1b   :  { %1670 = vmatprep.subr.mxu0 %v2219_v0  ;;  %2196 = vmatprep.subr.mxu1 %v2219_v0 }
  0x1c   :  { %1671 = vmatpush3.msra.mxu0 %v185_v14  ;;  %2212 = vmatpush3.msra.mxu1 %v185_v14  ;;  %v44_v14 = vld [vmem:[%s3849_s0 + $0xf0] sm:$0xff] }
  0x1d   :  { %1672 = vmatprep.subr.mxu0 %v2219_v0  ;;  %2197 = vmatprep.subr.mxu1 %v2219_v0 }
  0x1e   :  { %1673 = vmatpush3.msra.mxu0 %v184_v15  ;;  %2213 = vmatpush3.msra.mxu1 %v184_v15  ;;  %v129_v15 = vld [vmem:[%s3849_s0 + $0x398] sm:$0xff] }
  0x1f   :  { %1674 = vmatprep.subr.mxu0 %v2219_v0  ;;  %1676 = vmatprep.mubr.msk.f32.mxu0 %vm2220_vm0, %v2219_v0 }
  0x20   :  { %1675 = vmatpush3.msra.mxu0 %v183_v16  ;;  %2198 = vmatprep.subr.mxu1 %v2219_v0 }
  0x21   :  { %1677 = vmatmul.mubr.f32.vlgmr.msra.gmra.mxu0 %v14_v17  ;;  %2214 = vmatpush3.msra.mxu1 %v183_v16  ;;  %v45_v16 = vld [vmem:[%s3849_s0 + $0xf8] sm:$0xff]  ;;  %v130_v17 = vld [vmem:[%s3849_s0 + $0x3a0] sm:$0xff] }
  0x22   :  { %1931 = vmatprep.mubr.msk.f32.mxu1 %vm2220_vm0, %v2219_v0  ;;  %1679 = vmatprep.mubr.msk.f32.mxu0 %vm2220_vm0, %v2219_v0 }
  0x23   :  { %1932 = vmatmul.mubr.f32.vlgmr.msra.gmra.mxu1 %v99_v18  ;;  %v46_v18 = vld [vmem:[%s3849_s0 + $0x100] sm:$0xff] }
  0x24   :  { %1934 = vmatprep.mubr.msk.f32.mxu1 %vm2220_vm0, %v2219_v0 }
  0x25   :  { %1680 = vmatmul.mubr.f32.gmra.mxu0 %v15_v19  ;;  %v131_v19 = vld [vmem:[%s3849_s0 + $0x3a8] sm:$0xff] }
  0x26   :  { %1682 = vmatprep.mubr.msk.f32.mxu0 %vm2220_vm0, %v2219_v0 }
  0x27   :  { %1935 = vmatmul.mubr.f32.gmra.mxu1 %v100_v20  ;;  %v47_v20 = vld [vmem:[%s3849_s0 + $0x108] sm:$0xff] }
  0x28   :  { %1937 = vmatprep.mubr.msk.f32.mxu1 %vm2220_vm0, %v2219_v0 }
  0x29   :  { %1683 = vmatmul.mubr.f32.gmra.mxu0 %v16_v21  ;;  %v132_v21 = vld [vmem:[%s3849_s0 + $0x3b0] sm:$0xff] }
  0x2a   :  { %1685 = vmatprep.mubr.msk.f32.mxu0 %vm2220_vm0, %v2219_v0 }
  0x2b   :  { %1938 = vmatmul.mubr.f32.gmra.mxu1 %v101_v22  ;;  %v48_v22 = vld [vmem:[%s3849_s0 + $0x110] sm:$0xff] }
  0x2c   :  { %1940 = vmatprep.mubr.msk.f32.mxu1 %vm2220_vm0, %v2219_v0 }
  0x2d   :  { %1686 = vmatmul.mubr.f32.gmra.mxu0 %v17_v23  ;;  %v133_v23 = vld [vmem:[%s3849_s0 + $0x3b8] sm:$0xff] }
  0x2e   :  { %1688 = vmatprep.mubr.msk.f32.mxu0 %vm2220_vm0, %v2219_v0 }
  0x2f   :  { %1941 = vmatmul.mubr.f32.gmra.mxu1 %v102_v24  ;;  %v49_v24 = vld [vmem:[%s3849_s0 + $0x118] sm:$0xff] }
  0x30   :  { %1943 = vmatprep.mubr.msk.f32.mxu1 %vm2220_vm0, %v2219_v0 }
  0x31   :  { %1689 = vmatmul.mubr.f32.gmra.mxu0 %v18_v25  ;;  %v134_v25 = vld [vmem:[%s3849_s0 + $0x3c0] sm:$0xff] }
  0x32   :  { %1691 = vmatprep.mubr.msk.f32.mxu0 %vm2220_vm0, %v2219_v0 }
  0x33   :  { %1944 = vmatmul.mubr.f32.gmra.mxu1 %v103_v26  ;;  %v50_v26 = vld [vmem:[%s3849_s0 + $0x120] sm:$0xff] }
  0x34   :  { %1946 = vmatprep.mubr.msk.f32.mxu1 %vm2220_vm0, %v2219_v0 }
  0x35   :  { %1692 = vmatmul.mubr.f32.gmra.mxu0 %v19_v27  ;;  %v135_v27 = vld [vmem:[%s3849_s0 + $0x3c8] sm:$0xff] }
  0x36   :  { %1694 = vmatprep.mubr.msk.f32.mxu0 %vm2220_vm0, %v2219_v0 }
  0x37   :  { %1947 = vmatmul.mubr.f32.gmra.mxu1 %v104_v28  ;;  %v51_v28 = vld [vmem:[%s3849_s0 + $0x128] sm:$0xff] }
  0x38   :  { %1949 = vmatprep.mubr.msk.f32.mxu1 %vm2220_vm0, %v2219_v0 }
  0x39   :  { %1695 = vmatmul.mubr.f32.gmra.mxu0 %v20_v29  ;;  %v136_v29 = vld [vmem:[%s3849_s0 + $0x3d0] sm:$0xff] }
  0x3a   :  { %1697 = vmatprep.mubr.msk.f32.mxu0 %vm2220_vm0, %v2219_v0 }
  0x3b   :  { %1950 = vmatmul.mubr.f32.gmra.mxu1 %v105_v30  ;;  %v52_v30 = vld [vmem:[%s3849_s0 + $0x130] sm:$0xff] }
  0x3c   :  { %1952 = vmatprep.mubr.msk.f32.mxu1 %vm2220_vm0, %v2219_v0 }
  0x3d   :  { %1698 = vmatmul.mubr.f32.gmra.mxu0 %v21_v31  ;;  %v137_v31 = vld [vmem:[%s3849_s0 + $0x3d8] sm:$0xff] }
  0x3e   :  { %1700 = vmatprep.mubr.msk.f32.mxu0 %vm2220_vm0, %v2219_v0 }
  0x3f   :  { %1953 = vmatmul.mubr.f32.gmra.mxu1 %v106_v32  ;;  %v53_v32 = vld [vmem:[%s3849_s0 + $0x138] sm:$0xff] }
  0x40   :  { %1955 = vmatprep.mubr.msk.f32.mxu1 %vm2220_vm0, %v2219_v0 }
  0x41   :  { %1701 = vmatmul.mubr.f32.gmra.mxu0 %v22_v33  ;;  %v138_v33 = vld [vmem:[%s3849_s0 + $0x3e0] sm:$0xff] }
  0x42   :  { %1703 = vmatprep.mubr.msk.f32.mxu0 %vm2220_vm0, %v2219_v0 }
  0x43   :  { %1956 = vmatmul.mubr.f32.gmra.mxu1 %v107_v34  ;;  %v54_v34 = vld [vmem:[%s3849_s0 + $0x140] sm:$0xff] }
  0x44   :  { %1958 = vmatprep.mubr.msk.f32.mxu1 %vm2220_vm0, %v2219_v0 }
  0x45   :  { %1704 = vmatmul.mubr.f32.gmra.mxu0 %v23_v35  ;;  %v139_v35 = vld [vmem:[%s3849_s0 + $0x3e8] sm:$0xff] }
  0x46   :  { %1706 = vmatprep.mubr.msk.f32.mxu0 %vm2220_vm0, %v2219_v0 }
  0x47   :  { %1959 = vmatmul.mubr.f32.gmra.mxu1 %v108_v36  ;;  %v55_v36 = vld [vmem:[%s3849_s0 + $0x148] sm:$0xff] }
  0x48   :  { %1961 = vmatprep.mubr.msk.f32.mxu1 %vm2220_vm0, %v2219_v0 }
  0x49   :  { %1707 = vmatmul.mubr.f32.gmra.mxu0 %v24_v37  ;;  %v140_v37 = vld [vmem:[%s3849_s0 + $0x3f0] sm:$0xff] }
  0x4a   :  { %1709 = vmatprep.mubr.msk.f32.mxu0 %vm2220_vm0, %v2219_v0 }
  0x4b   :  { %1962 = vmatmul.mubr.f32.gmra.mxu1 %v109_v38  ;;  %v56_v38 = vld [vmem:[%s3849_s0 + $0x150] sm:$0xff] }
  0x4c   :  { %1964 = vmatprep.mubr.msk.f32.mxu1 %vm2220_vm0, %v2219_v0 }
  0x4d   :  { %1710 = vmatmul.mubr.f32.gmra.mxu0 %v25_v39  ;;  %v141_v39 = vld [vmem:[%s3849_s0 + $0x3f8] sm:$0xff] }
  0x4e   :  { %1712 = vmatprep.mubr.msk.f32.mxu0 %vm2220_vm0, %v2219_v0 }
  0x4f   :  { %1965 = vmatmul.mubr.f32.gmra.mxu1 %v110_v40  ;;  %v57_v40 = vld [vmem:[%s3849_s0 + $0x158] sm:$0xff] }
  0x50   :  { %1967 = vmatprep.mubr.msk.f32.mxu1 %vm2220_vm0, %v2219_v0 }
  0x51   :  { %1713 = vmatmul.mubr.f32.gmra.mxu0 %v26_v41  ;;  %v142_v41 = vld [vmem:[%s3849_s0 + $0x400] sm:$0xff] }
  0x52   :  { %1715 = vmatprep.mubr.msk.f32.mxu0 %vm2220_vm0, %v2219_v0 }
  0x53   :  { %1968 = vmatmul.mubr.f32.gmra.mxu1 %v111_v42  ;;  %v58_v42 = vld [vmem:[%s3849_s0 + $0x160] sm:$0xff] }
  0x54   :  { %1970 = vmatprep.mubr.msk.f32.mxu1 %vm2220_vm0, %v2219_v0 }
  0x55   :  { %1716 = vmatmul.mubr.f32.gmra.mxu0 %v27_v43  ;;  %v143_v43 = vld [vmem:[%s3849_s0 + $0x408] sm:$0xff] }
  0x56   :  { %1718 = vmatprep.mubr.msk.f32.mxu0 %vm2220_vm0, %v2219_v0 }
  0x57   :  { %1971 = vmatmul.mubr.f32.gmra.mxu1 %v112_v44  ;;  %v59_v44 = vld [vmem:[%s3849_s0 + $0x168] sm:$0xff] }
  0x58   :  { %1973 = vmatprep.mubr.msk.f32.mxu1 %vm2220_vm0, %v2219_v0 }
  0x59   :  { %1719 = vmatmul.mubr.f32.gmra.mxu0 %v28_v45  ;;  %v144_v45 = vld [vmem:[%s3849_s0 + $0x410] sm:$0xff] }
  0x5a   :  { %1721 = vmatprep.mubr.msk.f32.mxu0 %vm2220_vm0, %v2219_v0 }
  0x5b   :  { %1974 = vmatmul.mubr.f32.gmra.mxu1 %v113_v46  ;;  %v60_v46 = vld [vmem:[%s3849_s0 + $0x170] sm:$0xff] }
  0x5c   :  { %1976 = vmatprep.mubr.msk.f32.mxu1 %vm2220_vm0, %v2219_v0 }
  0x5d   :  { %1722 = vmatmul.mubr.f32.gmra.mxu0 %v29_v47  ;;  %v145_v47 = vld [vmem:[%s3849_s0 + $0x418] sm:$0xff] }
  0x5e   :  { %1724 = vmatprep.mubr.msk.f32.mxu0 %vm2220_vm0, %v2219_v0 }
  0x5f   :  { %1977 = vmatmul.mubr.f32.gmra.mxu1 %v114_v48  ;;  %v61_v48 = vld [vmem:[%s3849_s0 + $0x178] sm:$0xff] }
  0x60   :  { %1979 = vmatprep.mubr.msk.f32.mxu1 %vm2220_vm0, %v2219_v0 }
  0x61   :  { %1725 = vmatmul.mubr.f32.gmra.mxu0 %v30_v49  ;;  %v146_v49 = vld [vmem:[%s3849_s0 + $0x420] sm:$0xff] }
  0x62   :  { %1727 = vmatprep.mubr.msk.f32.mxu0 %vm2220_vm0, %v2219_v0 }
  0x63   :  { %1980 = vmatmul.mubr.f32.gmra.mxu1 %v115_v50  ;;  %v62_v50 = vld [vmem:[%s3849_s0 + $0x180] sm:$0xff] }
  0x64   :  { %1982 = vmatprep.mubr.msk.f32.mxu1 %vm2220_vm0, %v2219_v0 }
  0x65   :  { %1728 = vmatmul.mubr.f32.gmra.mxu0 %v31_v51  ;;  %v2809_v51 = vld [vmem:[%s3850_s2] ss:$0 sm:$0xff] }
  0x66   :  { %1730 = vmatprep.mubr.msk.f32.mxu0 %vm2220_vm0, %v2219_v0 }
  0x67   :  { %1983 = vmatmul.mubr.f32.gmra.mxu1 %v116_v52  ;;  %v147_v52 = vld [vmem:[%s3849_s0 + $0x428] sm:$0xff] }
  0x68   :  { %1985 = vmatprep.mubr.msk.f32.mxu1 %vm2220_vm0, %v2219_v0 }
  0x69   :  { %1731 = vmatmul.mubr.f32.gmra.mxu0 %v32_v53 }
  0x6a   :  { %1733 = vmatprep.mubr.msk.f32.mxu0 %vm2220_vm0, %v2219_v0 }
  0x6b   :  { %1986 = vmatmul.mubr.f32.gmra.mxu1 %v117_v54 }
  0x6c   :  { %1988 = vmatprep.mubr.msk.f32.mxu1 %vm2220_vm0, %v2219_v0 }
  0x6d   :  { %1734 = vmatmul.mubr.f32.gmra.mxu0 %v33_v55  ;;  %v63_v55 = vld [vmem:[%s3849_s0 + $0x188] sm:$0xff] }
  0x6e   :  { %1736 = vmatprep.mubr.msk.f32.mxu0 %vm2220_vm0, %v2219_v0 }
  0x6f   :  { %1989 = vmatmul.mubr.f32.gmra.mxu1 %v118_v56 }
  0x70   :  { %1991 = vmatprep.mubr.msk.f32.mxu1 %vm2220_vm0, %v2219_v0 }
  0x71   :  { %1737 = vmatmul.mubr.f32.gmra.mxu0 %v34_v57 }
  0x72   :  { %1739 = vmatprep.mubr.msk.f32.mxu0 %vm2220_vm0, %v2219_v0 }
  0x73   :  { %1992 = vmatmul.mubr.f32.gmra.mxu1 %v119_v58 }
  0x74   :  { %1994 = vmatprep.mubr.msk.f32.mxu1 %vm2220_vm0, %v2219_v0 }
  0x75   :  { %1740 = vmatmul.mubr.f32.gmra.mxu0 %v35_v59 }
  0x76   :  { %1742 = vmatprep.mubr.msk.f32.mxu0 %vm2220_vm0, %v2219_v0 }
  0x77   :  { %1995 = vmatmul.mubr.f32.gmra.mxu1 %v120_v60  ;;  %v148_v60 = vld [vmem:[%s3849_s0 + $0x430] sm:$0xff] }
  0x78   :  { %1997 = vmatprep.mubr.msk.f32.mxu1 %vm2220_vm0, %v2219_v0 }
  0x79   :  { %1743 = vmatmul.mubr.f32.gmra.mxu0 %v36_v61 }
  0x7a   :  { %1745 = vmatprep.mubr.msk.f32.mxu0 %vm2220_vm0, %v2219_v0 }
  0x7b   :  { %1998 = vmatmul.mubr.f32.gmra.mxu1 %v121_v62 }
  0x7c   :  { %2000 = vmatprep.mubr.msk.f32.mxu1 %vm2220_vm0, %v2219_v0 }
  0x7d   :  { %1746 = vmatmul.mubr.f32.gmra.mxu0 %v37_v63 }
  0x7e   :  { %1748 = vmatprep.mubr.msk.f32.mxu0 %vm2220_vm0, %v2219_v0 }
  0x7f   :  { %2001 = vmatmul.mubr.f32.gmra.mxu1 %v122_v1 }
  0x80   :  { %2003 = vmatprep.mubr.msk.f32.mxu1 %vm2220_vm0, %v2219_v0 }
  0x81   :  { %1749 = vmatmul.mubr.f32.gmra.mxu0 %v38_v2  ;;  %v64_v2 = vld [vmem:[%s3849_s0 + $0x190] sm:$0xff] }
  0x82   :  { %1751 = vmatprep.mubr.msk.f32.mxu0 %vm2220_vm0, %v2219_v0 }
  0x83   :  { %2004 = vmatmul.mubr.f32.gmra.mxu1 %v123_v3 }
  0x84   :  { %2006 = vmatprep.mubr.msk.f32.mxu1 %vm2220_vm0, %v2219_v0 }
  0x85   :  { %1752 = vmatmul.mubr.f32.gmra.mxu0 %v39_v4 }
  0x86   :  { %1754 = vmatprep.mubr.msk.f32.mxu0 %vm2220_vm0, %v2219_v0 }
  0x87   :  { %2007 = vmatmul.mubr.f32.gmra.mxu1 %v124_v5 }
  0x88   :  { %2009 = vmatprep.mubr.msk.f32.mxu1 %vm2220_vm0, %v2219_v0 }
  0x89   :  { %1755 = vmatmul.mubr.f32.gmra.mxu0 %v40_v6 }
  0x8a   :  { %1757 = vmatprep.mubr.msk.f32.mxu0 %vm2220_vm0, %v2219_v0 }
  0x8b   :  { %2010 = vmatmul.mubr.f32.gmra.mxu1 %v125_v7  ;;  %v149_v7 = vld [vmem:[%s3849_s0 + $0x438] sm:$0xff] }
  0x8c   :  { %2012 = vmatprep.mubr.msk.f32.mxu1 %vm2220_vm0, %v2219_v0 }
  0x8d   :  { %1758 = vmatmul.mubr.f32.gmra.mxu0 %v41_v8 }
  0x8e   :  { %1760 = vmatprep.mubr.msk.f32.mxu0 %vm2220_vm0, %v2219_v0 }
  0x8f   :  { %2013 = vmatmul.mubr.f32.gmra.mxu1 %v126_v9 }
  0x90   :  { %2015 = vmatprep.mubr.msk.f32.mxu1 %vm2220_vm0, %v2219_v0 }
  0x91   :  { %1761 = vmatmul.mubr.f32.gmra.mxu0 %v42_v10 }
  0x92   :  { %1763 = vmatprep.mubr.msk.f32.mxu0 %vm2220_vm0, %v2219_v0 }
  0x93   :  { %2016 = vmatmul.mubr.f32.gmra.mxu1 %v127_v11 }
  0x94   :  { %2018 = vmatprep.mubr.msk.f32.mxu1 %vm2220_vm0, %v2219_v0 }
  0x95   :  { %1764 = vmatmul.mubr.f32.gmra.mxu0 %v43_v12  ;;  %v65_v12 = vld [vmem:[%s3849_s0 + $0x198] sm:$0xff] }
  0x96   :  { %1766 = vmatprep.mubr.msk.f32.mxu0 %vm2220_vm0, %v2219_v0 }
  0x97   :  { %2019 = vmatmul.mubr.f32.gmra.mxu1 %v128_v13 }
  0x98   :  { %2021 = vmatprep.mubr.msk.f32.mxu1 %vm2220_vm0, %v2219_v0 }
  0x99   :  { %1767 = vmatmul.mubr.f32.gmra.mxu0 %v44_v14 }
  0x9a   :  { %1769 = vmatprep.mubr.msk.f32.mxu0 %vm2220_vm0, %v2219_v0 }
  0x9b   :  { %2022 = vmatmul.mubr.f32.gmra.mxu1 %v129_v15 }
  0x9c   :  { %2024 = vmatprep.mubr.msk.f32.mxu1 %vm2220_vm0, %v2219_v0 }
  0x9d   :  { %1770 = vmatmul.mubr.f32.gmra.mxu0 %v45_v16 }
  0x9e   :  { %1772 = vmatprep.mubr.msk.f32.mxu0 %vm2220_vm0, %v2219_v0 }
  0x9f   :  { %2025 = vmatmul.mubr.f32.gmra.mxu1 %v130_v17  ;;  %v150_v17 = vld [vmem:[%s3849_s0 + $0x440] sm:$0xff] }
  0xa0   :  { %2027 = vmatprep.mubr.msk.f32.mxu1 %vm2220_vm0, %v2219_v0 }
  0xa1   :  { %1773 = vmatmul.mubr.f32.gmra.mxu0 %v46_v18 }
  0xa2   :  { %1775 = vmatprep.mubr.msk.f32.mxu0 %vm2220_vm0, %v2219_v0 }
  0xa3   :  { %2028 = vmatmul.mubr.f32.gmra.mxu1 %v131_v19 }
  0xa4   :  { %2030 = vmatprep.mubr.msk.f32.mxu1 %vm2220_vm0, %v2219_v0 }
  0xa5   :  { %1776 = vmatmul.mubr.f32.gmra.mxu0 %v47_v20 }
  0xa6   :  { %1778 = vmatprep.mubr.msk.f32.mxu0 %vm2220_vm0, %v2219_v0 }
  0xa7   :  { %2031 = vmatmul.mubr.f32.gmra.mxu1 %v132_v21 }
  0xa8   :  { %2033 = vmatprep.mubr.msk.f32.mxu1 %vm2220_vm0, %v2219_v0 }
  0xa9   :  { %1779 = vmatmul.mubr.f32.gmra.mxu0 %v48_v22  ;;  %v66_v22 = vld [vmem:[%s3849_s0 + $0x1a0] sm:$0xff] }
  0xaa   :  { %1781 = vmatprep.mubr.msk.f32.mxu0 %vm2220_vm0, %v2219_v0 }
  0xab   :  { %2034 = vmatmul.mubr.f32.gmra.mxu1 %v133_v23 }
  0xac   :  { %2036 = vmatprep.mubr.msk.f32.mxu1 %vm2220_vm0, %v2219_v0 }
  0xad   :  { %1782 = vmatmul.mubr.f32.gmra.mxu0 %v49_v24 }
  0xae   :  { %1784 = vmatprep.mubr.msk.f32.mxu0 %vm2220_vm0, %v2219_v0 }
  0xaf   :  { %2037 = vmatmul.mubr.f32.gmra.mxu1 %v134_v25 }
  0xb0   :  { %2039 = vmatprep.mubr.msk.f32.mxu1 %vm2220_vm0, %v2219_v0 }
  0xb1   :  { %1785 = vmatmul.mubr.f32.gmra.mxu0 %v50_v26 }
  0xb2   :  { %1787 = vmatprep.mubr.msk.f32.mxu0 %vm2220_vm0, %v2219_v0 }
  0xb3   :  { %2040 = vmatmul.mubr.f32.gmra.mxu1 %v135_v27  ;;  %v151_v27 = vld [vmem:[%s3849_s0 + $0x448] sm:$0xff] }
  0xb4   :  { %2042 = vmatprep.mubr.msk.f32.mxu1 %vm2220_vm0, %v2219_v0 }
  0xb5   :  { %1788 = vmatmul.mubr.f32.gmra.mxu0 %v51_v28 }
  0xb6   :  { %1790 = vmatprep.mubr.msk.f32.mxu0 %vm2220_vm0, %v2219_v0 }
  0xb7   :  { %2043 = vmatmul.mubr.f32.gmra.mxu1 %v136_v29 }
  0xb8   :  { %2045 = vmatprep.mubr.msk.f32.mxu1 %vm2220_vm0, %v2219_v0 }
  0xb9   :  { %1791 = vmatmul.mubr.f32.gmra.mxu0 %v52_v30 }
  0xba   :  { %1793 = vmatprep.mubr.msk.f32.mxu0 %vm2220_vm0, %v2219_v0 }
  0xbb   :  { %2046 = vmatmul.mubr.f32.gmra.mxu1 %v137_v31 }
  0xbc   :  { %2048 = vmatprep.mubr.msk.f32.mxu1 %vm2220_vm0, %v2219_v0 }
  0xbd   :  { %1794 = vmatmul.mubr.f32.gmra.mxu0 %v53_v32  ;;  %v67_v32 = vld [vmem:[%s3849_s0 + $0x1a8] sm:$0xff] }
  0xbe   :  { %1796 = vmatprep.mubr.msk.f32.mxu0 %vm2220_vm0, %v2219_v0 }
  0xbf   :  { %2049 = vmatmul.mubr.f32.gmra.mxu1 %v138_v33 }
  0xc0   :  { %2051 = vmatprep.mubr.msk.f32.mxu1 %vm2220_vm0, %v2219_v0 }
  0xc1   :  { %1797 = vmatmul.mubr.f32.gmra.mxu0 %v54_v34 }
  0xc2   :  { %1799 = vmatprep.mubr.msk.f32.mxu0 %vm2220_vm0, %v2219_v0 }
  0xc3   :  { %2052 = vmatmul.mubr.f32.gmra.mxu1 %v139_v35 }
  0xc4   :  { %2054 = vmatprep.mubr.msk.f32.mxu1 %vm2220_vm0, %v2219_v0 }
  0xc5   :  { %1800 = vmatmul.mubr.f32.gmra.mxu0 %v55_v36 }
  0xc6   :  { %1802 = vmatprep.mubr.msk.f32.mxu0 %vm2220_vm0, %v2219_v0 }
  0xc7   :  { %2055 = vmatmul.mubr.f32.gmra.mxu1 %v140_v37  ;;  %v152_v37 = vld [vmem:[%s3849_s0 + $0x450] sm:$0xff] }
  0xc8   :  { %2057 = vmatprep.mubr.msk.f32.mxu1 %vm2220_vm0, %v2219_v0 }
  0xc9   :  { %1803 = vmatmul.mubr.f32.gmra.mxu0 %v56_v38 }
  0xca   :  { %1805 = vmatprep.mubr.msk.f32.mxu0 %vm2220_vm0, %v2219_v0 }
  0xcb   :  { %2058 = vmatmul.mubr.f32.gmra.mxu1 %v141_v39 }
  0xcc   :  { %2060 = vmatprep.mubr.msk.f32.mxu1 %vm2220_vm0, %v2219_v0 }
  0xcd   :  { %1806 = vmatmul.mubr.f32.gmra.mxu0 %v57_v40 }
  0xce   :  { %1808 = vmatprep.mubr.msk.f32.mxu0 %vm2220_vm0, %v2219_v0 }
  0xcf   :  { %2061 = vmatmul.mubr.f32.gmra.mxu1 %v142_v41 }
  0xd0   :  { %2063 = vmatprep.mubr.msk.f32.mxu1 %vm2220_vm0, %v2219_v0 }
  0xd1   :  { %1809 = vmatmul.mubr.f32.gmra.mxu0 %v58_v42  ;;  %v68_v42 = vld [vmem:[%s3849_s0 + $0x1b0] sm:$0xff] }
  0xd2   :  { %1811 = vmatprep.mubr.msk.f32.mxu0 %vm2220_vm0, %v2219_v0 }
  0xd3   :  { %2064 = vmatmul.mubr.f32.gmra.mxu1 %v143_v43 }
  0xd4   :  { %2066 = vmatprep.mubr.msk.f32.mxu1 %vm2220_vm0, %v2219_v0 }
  0xd5   :  { %1812 = vmatmul.mubr.f32.gmra.mxu0 %v59_v44 }
  0xd6   :  { %1814 = vmatprep.mubr.msk.f32.mxu0 %vm2220_vm0, %v2219_v0 }
  0xd7   :  { %2067 = vmatmul.mubr.f32.gmra.mxu1 %v144_v45 }
  0xd8   :  { %2069 = vmatprep.mubr.msk.f32.mxu1 %vm2220_vm0, %v2219_v0 }
  0xd9   :  { %1815 = vmatmul.mubr.f32.gmra.mxu0 %v60_v46 }
  0xda   :  { %1817 = vmatprep.mubr.msk.f32.mxu0 %vm2220_vm0, %v2219_v0 }
  0xdb   :  { %2070 = vmatmul.mubr.f32.gmra.mxu1 %v145_v47  ;;  %v153_v47 = vld [vmem:[%s3849_s0 + $0x458] sm:$0xff] }
  0xdc   :  { %2072 = vmatprep.mubr.msk.f32.mxu1 %vm2220_vm0, %v2219_v0 }
  0xdd   :  { %1818 = vmatmul.mubr.f32.gmra.mxu0 %v61_v48 }
  0xde   :  { %1820 = vmatprep.mubr.msk.f32.mxu0 %vm2220_vm0, %v2219_v0 }
  0xdf   :  { %2073 = vmatmul.mubr.f32.gmra.mxu1 %v146_v49 }
  0xe0   :  { %2075 = vmatprep.mubr.msk.f32.mxu1 %vm2220_vm0, %v2219_v0 }
  0xe1   :  { %v272_v53 = vpop.f32.mrf.mxu0  ;;  %1821 = vmatmul.mubr.f32.gmra.mxu0 %v62_v50 }
  0xe2   :  { %v273_v54 = vadd.f32 %v2809_v51, %v272_v53  ;;  %1823 = vmatprep.mubr.msk.f32.mxu0 %vm2220_vm0, %v2219_v0  ;;  %v69_v53 = vld [vmem:[%s3849_s0 + $0x1b8] sm:$0xff] }
  0xe3   :  { %v1678_v56 = vpop.f32.mrf.mxu0  ;;  %v697_v57 = vpop.f32.mrf.mxu1  ;;  %2076 = vmatmul.mubr.f32.gmra.mxu1 %v147_v52 }
  0xe4   :  { %v1116_v58 = vmax.f32 %v273_v54, 0.0  ;;  %v698_v59 = vadd.f32 %v2809_v51, %v697_v57  ;;  %2078 = vmatprep.mubr.msk.f32.mxu1 %vm2220_vm0, %v2219_v0 }
  0xe5   :  { %v277_v61 = vpop.f32.mrf.mxu0  ;;  %1824 = vmatmul.mubr.f32.gmra.mxu0 %v63_v55  ;;  %v1933_v62 = vpop.f32.mrf.mxu1 }
  0xe6   :  { %1285 = vst [vmem:[%s3851_s3] sm:$0xff] %v1116_v58  ;;  %v1201_v63 = vmax.f32 %v698_v59, 0.0  ;;  %v278_v1 = vadd.f32 %v2809_v51, %v277_v61  ;;  %1826 = vmatprep.mubr.msk.f32.mxu0 %vm2220_vm0, %v2219_v0  ;;  %v154_v58 = vld [vmem:[%s3849_s0 + $0x460] sm:$0xff] }
  0xe7   :  { %v1681_v3 = vpop.f32.mrf.mxu0  ;;  %v702_v4 = vpop.f32.mrf.mxu1  ;;  %2079 = vmatmul.mubr.f32.gmra.mxu1 %v148_v60 }
  0xe8   :  { %1370 = vst [vmem:[%s3851_s3 + $0x2a8] sm:$0xff] %v1201_v63  ;;  %v1117_v5 = vmax.f32 %v278_v1, 0.0  ;;  %v703_v6 = vadd.f32 %v2809_v51, %v702_v4  ;;  %2081 = vmatprep.mubr.msk.f32.mxu1 %vm2220_vm0, %v2219_v0  ;;  %v70_v63 = vld [vmem:[%s3849_s0 + $0x1c0] sm:$0xff] }
  0xe9   :  { %v282_v8 = vpop.f32.mrf.mxu0  ;;  %1827 = vmatmul.mubr.f32.gmra.mxu0 %v64_v2  ;;  %v1936_v9 = vpop.f32.mrf.mxu1 }
  0xea   :  { %1286 = vst [vmem:[%s3851_s3 + $0x8] sm:$0xff] %v1117_v5  ;;  %v1202_v10 = vmax.f32 %v703_v6, 0.0  ;;  %v283_v11 = vadd.f32 %v2809_v51, %v282_v8  ;;  %1829 = vmatprep.mubr.msk.f32.mxu0 %vm2220_vm0, %v2219_v0  ;;  %v155_v5 = vld [vmem:[%s3849_s0 + $0x468] sm:$0xff] }
  0xeb   :  { %v1684_v13 = vpop.f32.mrf.mxu0  ;;  %v707_v14 = vpop.f32.mrf.mxu1  ;;  %2082 = vmatmul.mubr.f32.gmra.mxu1 %v149_v7 }
  0xec   :  { %1371 = vst [vmem:[%s3851_s3 + $0x2b0] sm:$0xff] %v1202_v10  ;;  %v1118_v15 = vmax.f32 %v283_v11, 0.0  ;;  %v708_v16 = vadd.f32 %v2809_v51, %v707_v14  ;;  %2084 = vmatprep.mubr.msk.f32.mxu1 %vm2220_vm0, %v2219_v0  ;;  %v71_v10 = vld [vmem:[%s3849_s0 + $0x1c8] sm:$0xff] }
  0xed   :  { %v287_v18 = vpop.f32.mrf.mxu0  ;;  %1830 = vmatmul.mubr.f32.gmra.mxu0 %v65_v12  ;;  %v1939_v19 = vpop.f32.mrf.mxu1 }
  0xee   :  { %1287 = vst [vmem:[%s3851_s3 + $0x10] sm:$0xff] %v1118_v15  ;;  %v1203_v20 = vmax.f32 %v708_v16, 0.0  ;;  %v288_v21 = vadd.f32 %v2809_v51, %v287_v18  ;;  %1832 = vmatprep.mubr.msk.f32.mxu0 %vm2220_vm0, %v2219_v0  ;;  %v156_v15 = vld [vmem:[%s3849_s0 + $0x470] sm:$0xff] }
  0xef   :  { %v1687_v23 = vpop.f32.mrf.mxu0  ;;  %v712_v24 = vpop.f32.mrf.mxu1  ;;  %2085 = vmatmul.mubr.f32.gmra.mxu1 %v150_v17 }
  0xf0   :  { %1372 = vst [vmem:[%s3851_s3 + $0x2b8] sm:$0xff] %v1203_v20  ;;  %v1119_v25 = vmax.f32 %v288_v21, 0.0  ;;  %v713_v26 = vadd.f32 %v2809_v51, %v712_v24  ;;  %2087 = vmatprep.mubr.msk.f32.mxu1 %vm2220_vm0, %v2219_v0  ;;  %v72_v20 = vld [vmem:[%s3849_s0 + $0x1d0] sm:$0xff] }
  0xf1   :  { %v292_v28 = vpop.f32.mrf.mxu0  ;;  %1833 = vmatmul.mubr.f32.gmra.mxu0 %v66_v22  ;;  %v1942_v29 = vpop.f32.mrf.mxu1 }
  0xf2   :  { %1288 = vst [vmem:[%s3851_s3 + $0x18] sm:$0xff] %v1119_v25  ;;  %v1204_v30 = vmax.f32 %v713_v26, 0.0  ;;  %v293_v31 = vadd.f32 %v2809_v51, %v292_v28  ;;  %1835 = vmatprep.mubr.msk.f32.mxu0 %vm2220_vm0, %v2219_v0  ;;  %v157_v25 = vld [vmem:[%s3849_s0 + $0x478] sm:$0xff] }
  0xf3   :  { %v1690_v33 = vpop.f32.mrf.mxu0  ;;  %v717_v34 = vpop.f32.mrf.mxu1  ;;  %2088 = vmatmul.mubr.f32.gmra.mxu1 %v151_v27 }
  0xf4   :  { %1373 = vst [vmem:[%s3851_s3 + $0x2c0] sm:$0xff] %v1204_v30  ;;  %v1120_v35 = vmax.f32 %v293_v31, 0.0  ;;  %v718_v36 = vadd.f32 %v2809_v51, %v717_v34  ;;  %2090 = vmatprep.mubr.msk.f32.mxu1 %vm2220_vm0, %v2219_v0  ;;  %v73_v30 = vld [vmem:[%s3849_s0 + $0x1d8] sm:$0xff] }
  0xf5   :  { %v297_v38 = vpop.f32.mrf.mxu0  ;;  %1836 = vmatmul.mubr.f32.gmra.mxu0 %v67_v32  ;;  %v1945_v39 = vpop.f32.mrf.mxu1 }
  0xf6   :  { %1289 = vst [vmem:[%s3851_s3 + $0x20] sm:$0xff] %v1120_v35  ;;  %v1205_v40 = vmax.f32 %v718_v36, 0.0  ;;  %v298_v41 = vadd.f32 %v2809_v51, %v297_v38  ;;  %1838 = vmatprep.mubr.msk.f32.mxu0 %vm2220_vm0, %v2219_v0  ;;  %v158_v35 = vld [vmem:[%s3849_s0 + $0x480] sm:$0xff] }
  0xf7   :  { %v1693_v43 = vpop.f32.mrf.mxu0  ;;  %v722_v44 = vpop.f32.mrf.mxu1  ;;  %2091 = vmatmul.mubr.f32.gmra.mxu1 %v152_v37 }
  0xf8   :  { %1374 = vst [vmem:[%s3851_s3 + $0x2c8] sm:$0xff] %v1205_v40  ;;  %v1121_v45 = vmax.f32 %v298_v41, 0.0  ;;  %v723_v46 = vadd.f32 %v2809_v51, %v722_v44  ;;  %2093 = vmatprep.mubr.msk.f32.mxu1 %vm2220_vm0, %v2219_v0  ;;  %v74_v40 = vld [vmem:[%s3849_s0 + $0x1e0] sm:$0xff] }
  0xf9   :  { %v302_v48 = vpop.f32.mrf.mxu0  ;;  %1839 = vmatmul.mubr.f32.gmra.mxu0 %v68_v42  ;;  %v1948_v49 = vpop.f32.mrf.mxu1 }
  0xfa   :  { %1290 = vst [vmem:[%s3851_s3 + $0x28] sm:$0xff] %v1121_v45  ;;  %v1206_v50 = vmax.f32 %v723_v46, 0.0  ;;  %v303_v52 = vadd.f32 %v2809_v51, %v302_v48  ;;  %1841 = vmatprep.mubr.msk.f32.mxu0 %vm2220_vm0, %v2219_v0  ;;  %v159_v45 = vld [vmem:[%s3849_s0 + $0x488] sm:$0xff] }
  0xfb   :  { %v1696_v54 = vpop.f32.mrf.mxu0  ;;  %v727_v55 = vpop.f32.mrf.mxu1  ;;  %2094 = vmatmul.mubr.f32.gmra.mxu1 %v153_v47 }
  0xfc   :  { %1375 = vst [vmem:[%s3851_s3 + $0x2d0] sm:$0xff] %v1206_v50  ;;  %v1122_v56 = vmax.f32 %v303_v52, 0.0  ;;  %v728_v57 = vadd.f32 %v2809_v51, %v727_v55  ;;  %2096 = vmatprep.mubr.msk.f32.mxu1 %vm2220_vm0, %v2219_v0  ;;  %v75_v50 = vld [vmem:[%s3849_s0 + $0x1e8] sm:$0xff] }
  0xfd   :  { %v307_v59 = vpop.f32.mrf.mxu0  ;;  %1842 = vmatmul.mubr.f32.gmra.mxu0 %v69_v53  ;;  %v1951_v60 = vpop.f32.mrf.mxu1 }
  0xfe   :  { %1291 = vst [vmem:[%s3851_s3 + $0x30] sm:$0xff] %v1122_v56  ;;  %v1207_v61 = vmax.f32 %v728_v57, 0.0  ;;  %v308_v62 = vadd.f32 %v2809_v51, %v307_v59  ;;  %1844 = vmatprep.mubr.msk.f32.mxu0 %vm2220_vm0, %v2219_v0  ;;  %v160_v56 = vld [vmem:[%s3849_s0 + $0x490] sm:$0xff] }
  0xff   :  { %v1699_v1 = vpop.f32.mrf.mxu0  ;;  %v732_v2 = vpop.f32.mrf.mxu1  ;;  %2097 = vmatmul.mubr.f32.gmra.mxu1 %v154_v58 }
 0x100   :  { %1376 = vst [vmem:[%s3851_s3 + $0x2d8] sm:$0xff] %v1207_v61  ;;  %v1123_v3 = vmax.f32 %v308_v62, 0.0  ;;  %v733_v4 = vadd.f32 %v2809_v51, %v732_v2  ;;  %2099 = vmatprep.mubr.msk.f32.mxu1 %vm2220_vm0, %v2219_v0  ;;  %v76_v61 = vld [vmem:[%s3849_s0 + $0x1f0] sm:$0xff] }
 0x101   :  { %v312_v6 = vpop.f32.mrf.mxu0  ;;  %1845 = vmatmul.mubr.f32.gmra.mxu0 %v70_v63  ;;  %v1954_v7 = vpop.f32.mrf.mxu1 }
 0x102   :  { %1292 = vst [vmem:[%s3851_s3 + $0x38] sm:$0xff] %v1123_v3  ;;  %v1208_v8 = vmax.f32 %v733_v4, 0.0  ;;  %v313_v9 = vadd.f32 %v2809_v51, %v312_v6  ;;  %1847 = vmatprep.mubr.msk.f32.mxu0 %vm2220_vm0, %v2219_v0  ;;  %v161_v3 = vld [vmem:[%s3849_s0 + $0x498] sm:$0xff] }
 0x103   :  { %v1702_v11 = vpop.f32.mrf.mxu0  ;;  %v737_v12 = vpop.f32.mrf.mxu1  ;;  %2100 = vmatmul.mubr.f32.gmra.mxu1 %v155_v5 }
 0x104   :  { %1377 = vst [vmem:[%s3851_s3 + $0x2e0] sm:$0xff] %v1208_v8  ;;  %v1124_v13 = vmax.f32 %v313_v9, 0.0  ;;  %v738_v14 = vadd.f32 %v2809_v51, %v737_v12  ;;  %2102 = vmatprep.mubr.msk.f32.mxu1 %vm2220_vm0, %v2219_v0  ;;  %v77_v8 = vld [vmem:[%s3849_s0 + $0x1f8] sm:$0xff] }
 0x105   :  { %v317_v16 = vpop.f32.mrf.mxu0  ;;  %1848 = vmatmul.mubr.f32.gmra.mxu0 %v71_v10  ;;  %v1957_v17 = vpop.f32.mrf.mxu1 }
 0x106   :  { %1293 = vst [vmem:[%s3851_s3 + $0x40] sm:$0xff] %v1124_v13  ;;  %v1209_v18 = vmax.f32 %v738_v14, 0.0  ;;  %v318_v19 = vadd.f32 %v2809_v51, %v317_v16  ;;  %1850 = vmatprep.mubr.msk.f32.mxu0 %vm2220_vm0, %v2219_v0  ;;  %v162_v13 = vld [vmem:[%s3849_s0 + $0x4a0] sm:$0xff] }
 0x107   :  { %v1705_v21 = vpop.f32.mrf.mxu0  ;;  %v742_v22 = vpop.f32.mrf.mxu1  ;;  %2103 = vmatmul.mubr.f32.gmra.mxu1 %v156_v15 }
 0x108   :  { %1378 = vst [vmem:[%s3851_s3 + $0x2e8] sm:$0xff] %v1209_v18  ;;  %v1125_v23 = vmax.f32 %v318_v19, 0.0  ;;  %v743_v24 = vadd.f32 %v2809_v51, %v742_v22  ;;  %2105 = vmatprep.mubr.msk.f32.mxu1 %vm2220_vm0, %v2219_v0  ;;  %v78_v18 = vld [vmem:[%s3849_s0 + $0x200] sm:$0xff] }
 0x109   :  { %v322_v26 = vpop.f32.mrf.mxu0  ;;  %1851 = vmatmul.mubr.f32.gmra.mxu0 %v72_v20  ;;  %v1960_v27 = vpop.f32.mrf.mxu1 }
 0x10a   :  { %1294 = vst [vmem:[%s3851_s3 + $0x48] sm:$0xff] %v1125_v23  ;;  %v1210_v28 = vmax.f32 %v743_v24, 0.0  ;;  %v323_v29 = vadd.f32 %v2809_v51, %v322_v26  ;;  %1853 = vmatprep.mubr.msk.f32.mxu0 %vm2220_vm0, %v2219_v0  ;;  %v163_v23 = vld [vmem:[%s3849_s0 + $0x4a8] sm:$0xff] }
 0x10b   :  { %v1708_v31 = vpop.f32.mrf.mxu0  ;;  %v747_v32 = vpop.f32.mrf.mxu1  ;;  %2106 = vmatmul.mubr.f32.gmra.mxu1 %v157_v25 }
 0x10c   :  { %1379 = vst [vmem:[%s3851_s3 + $0x2f0] sm:$0xff] %v1210_v28  ;;  %v1126_v33 = vmax.f32 %v323_v29, 0.0  ;;  %v748_v34 = vadd.f32 %v2809_v51, %v747_v32  ;;  %2108 = vmatprep.mubr.msk.f32.mxu1 %vm2220_vm0, %v2219_v0  ;;  %v79_v28 = vld [vmem:[%s3849_s0 + $0x208] sm:$0xff] }
 0x10d   :  { %v327_v36 = vpop.f32.mrf.mxu0  ;;  %1854 = vmatmul.mubr.f32.gmra.mxu0 %v73_v30  ;;  %v1963_v37 = vpop.f32.mrf.mxu1 }
 0x10e   :  { %1295 = vst [vmem:[%s3851_s3 + $0x50] sm:$0xff] %v1126_v33  ;;  %v1211_v38 = vmax.f32 %v748_v34, 0.0  ;;  %v328_v39 = vadd.f32 %v2809_v51, %v327_v36  ;;  %1856 = vmatprep.mubr.msk.f32.mxu0 %vm2220_vm0, %v2219_v0  ;;  %v164_v33 = vld [vmem:[%s3849_s0 + $0x4b0] sm:$0xff] }
 0x10f   :  { %v1711_v41 = vpop.f32.mrf.mxu0  ;;  %v752_v42 = vpop.f32.mrf.mxu1  ;;  %2109 = vmatmul.mubr.f32.gmra.mxu1 %v158_v35 }
 0x110   :  { %1380 = vst [vmem:[%s3851_s3 + $0x2f8] sm:$0xff] %v1211_v38  ;;  %v1127_v43 = vmax.f32 %v328_v39, 0.0  ;;  %v753_v44 = vadd.f32 %v2809_v51, %v752_v42  ;;  %2111 = vmatprep.mubr.msk.f32.mxu1 %vm2220_vm0, %v2219_v0  ;;  %v80_v38 = vld [vmem:[%s3849_s0 + $0x210] sm:$0xff] }
 0x111   :  { %v332_v46 = vpop.f32.mrf.mxu0  ;;  %1857 = vmatmul.mubr.f32.gmra.mxu0 %v74_v40  ;;  %v1966_v47 = vpop.f32.mrf.mxu1 }
 0x112   :  { %1296 = vst [vmem:[%s3851_s3 + $0x58] sm:$0xff] %v1127_v43  ;;  %v1212_v48 = vmax.f32 %v753_v44, 0.0  ;;  %v333_v49 = vadd.f32 %v2809_v51, %v332_v46  ;;  %1859 = vmatprep.mubr.msk.f32.mxu0 %vm2220_vm0, %v2219_v0  ;;  %v165_v43 = vld [vmem:[%s3849_s0 + $0x4b8] sm:$0xff] }
 0x113   :  { %v1714_v52 = vpop.f32.mrf.mxu0  ;;  %v757_v53 = vpop.f32.mrf.mxu1  ;;  %2112 = vmatmul.mubr.f32.gmra.mxu1 %v159_v45 }
 0x114   :  { %1381 = vst [vmem:[%s3851_s3 + $0x300] sm:$0xff] %v1212_v48  ;;  %v1128_v54 = vmax.f32 %v333_v49, 0.0  ;;  %v758_v55 = vadd.f32 %v2809_v51, %v757_v53  ;;  %2114 = vmatprep.mubr.msk.f32.mxu1 %vm2220_vm0, %v2219_v0  ;;  %v81_v48 = vld [vmem:[%s3849_s0 + $0x218] sm:$0xff] }
 0x115   :  { %v337_v57 = vpop.f32.mrf.mxu0  ;;  %1860 = vmatmul.mubr.f32.gmra.mxu0 %v75_v50  ;;  %v1969_v58 = vpop.f32.mrf.mxu1 }
 0x116   :  { %1297 = vst [vmem:[%s3851_s3 + $0x60] sm:$0xff] %v1128_v54  ;;  %v1213_v59 = vmax.f32 %v758_v55, 0.0  ;;  %v338_v60 = vadd.f32 %v2809_v51, %v337_v57  ;;  %1862 = vmatprep.mubr.msk.f32.mxu0 %vm2220_vm0, %v2219_v0  ;;  %v166_v54 = vld [vmem:[%s3849_s0 + $0x4c0] sm:$0xff] }
 0x117   :  { %v1717_v62 = vpop.f32.mrf.mxu0  ;;  %v762_v63 = vpop.f32.mrf.mxu1  ;;  %2115 = vmatmul.mubr.f32.gmra.mxu1 %v160_v56 }
 0x118   :  { %1382 = vst [vmem:[%s3851_s3 + $0x308] sm:$0xff] %v1213_v59  ;;  %v1129_v1 = vmax.f32 %v338_v60, 0.0  ;;  %v763_v2 = vadd.f32 %v2809_v51, %v762_v63  ;;  %2117 = vmatprep.mubr.msk.f32.mxu1 %vm2220_vm0, %v2219_v0  ;;  %v82_v59 = vld [vmem:[%s3849_s0 + $0x220] sm:$0xff] }
 0x119   :  { %v342_v4 = vpop.f32.mrf.mxu0  ;;  %1863 = vmatmul.mubr.f32.gmra.mxu0 %v76_v61  ;;  %v1972_v5 = vpop.f32.mrf.mxu1 }
 0x11a   :  { %1298 = vst [vmem:[%s3851_s3 + $0x68] sm:$0xff] %v1129_v1  ;;  %v1214_v6 = vmax.f32 %v763_v2, 0.0  ;;  %v343_v7 = vadd.f32 %v2809_v51, %v342_v4  ;;  %1865 = vmatprep.mubr.msk.f32.mxu0 %vm2220_vm0, %v2219_v0  ;;  %v167_v1 = vld [vmem:[%s3849_s0 + $0x4c8] sm:$0xff] }
 0x11b   :  { %v1720_v9 = vpop.f32.mrf.mxu0  ;;  %v767_v10 = vpop.f32.mrf.mxu1  ;;  %2118 = vmatmul.mubr.f32.gmra.mxu1 %v161_v3 }
 0x11c   :  { %1383 = vst [vmem:[%s3851_s3 + $0x310] sm:$0xff] %v1214_v6  ;;  %v1130_v11 = vmax.f32 %v343_v7, 0.0  ;;  %v768_v12 = vadd.f32 %v2809_v51, %v767_v10  ;;  %2120 = vmatprep.mubr.msk.f32.mxu1 %vm2220_vm0, %v2219_v0  ;;  %v83_v6 = vld [vmem:[%s3849_s0 + $0x228] sm:$0xff] }
 0x11d   :  { %v347_v14 = vpop.f32.mrf.mxu0  ;;  %1866 = vmatmul.mubr.f32.gmra.mxu0 %v77_v8  ;;  %v1975_v15 = vpop.f32.mrf.mxu1 }
 0x11e   :  { %1299 = vst [vmem:[%s3851_s3 + $0x70] sm:$0xff] %v1130_v11  ;;  %v1215_v16 = vmax.f32 %v768_v12, 0.0  ;;  %v348_v17 = vadd.f32 %v2809_v51, %v347_v14  ;;  %1868 = vmatprep.mubr.msk.f32.mxu0 %vm2220_vm0, %v2219_v0  ;;  %v168_v11 = vld [vmem:[%s3849_s0 + $0x4d0] sm:$0xff] }
 0x11f   :  { %v1723_v19 = vpop.f32.mrf.mxu0  ;;  %v772_v20 = vpop.f32.mrf.mxu1  ;;  %2121 = vmatmul.mubr.f32.gmra.mxu1 %v162_v13 }
 0x120   :  { %1384 = vst [vmem:[%s3851_s3 + $0x318] sm:$0xff] %v1215_v16  ;;  %v1131_v21 = vmax.f32 %v348_v17, 0.0  ;;  %v773_v22 = vadd.f32 %v2809_v51, %v772_v20  ;;  %2123 = vmatprep.mubr.msk.f32.mxu1 %vm2220_vm0, %v2219_v0  ;;  %v84_v16 = vld [vmem:[%s3849_s0 + $0x230] sm:$0xff] }
 0x121   :  { %v352_v24 = vpop.f32.mrf.mxu0  ;;  %1869 = vmatmul.mubr.f32.gmra.mxu0 %v78_v18  ;;  %v1978_v25 = vpop.f32.mrf.mxu1 }
 0x122   :  { %1300 = vst [vmem:[%s3851_s3 + $0x78] sm:$0xff] %v1131_v21  ;;  %v1216_v26 = vmax.f32 %v773_v22, 0.0  ;;  %v353_v27 = vadd.f32 %v2809_v51, %v352_v24  ;;  %1871 = vmatprep.mubr.msk.f32.mxu0 %vm2220_vm0, %v2219_v0  ;;  %v169_v21 = vld [vmem:[%s3849_s0 + $0x4d8] sm:$0xff] }
 0x123   :  { %v1726_v29 = vpop.f32.mrf.mxu0  ;;  %v777_v30 = vpop.f32.mrf.mxu1  ;;  %2124 = vmatmul.mubr.f32.gmra.mxu1 %v163_v23 }
 0x124   :  { %1385 = vst [vmem:[%s3851_s3 + $0x320] sm:$0xff] %v1216_v26  ;;  %v1132_v31 = vmax.f32 %v353_v27, 0.0  ;;  %v778_v32 = vadd.f32 %v2809_v51, %v777_v30  ;;  %2126 = vmatprep.mubr.msk.f32.mxu1 %vm2220_vm0, %v2219_v0  ;;  %v85_v26 = vld [vmem:[%s3849_s0 + $0x238] sm:$0xff] }
 0x125   :  { %v357_v34 = vpop.f32.mrf.mxu0  ;;  %1872 = vmatmul.mubr.f32.gmra.mxu0 %v79_v28  ;;  %v1981_v35 = vpop.f32.mrf.mxu1 }
 0x126   :  { %1301 = vst [vmem:[%s3851_s3 + $0x80] sm:$0xff] %v1132_v31  ;;  %v1217_v36 = vmax.f32 %v778_v32, 0.0  ;;  %v358_v37 = vadd.f32 %v2809_v51, %v357_v34  ;;  %1874 = vmatprep.mubr.msk.f32.mxu0 %vm2220_vm0, %v2219_v0  ;;  %v170_v31 = vld [vmem:[%s3849_s0 + $0x4e0] sm:$0xff] }
 0x127   :  { %v1729_v39 = vpop.f32.mrf.mxu0  ;;  %v782_v40 = vpop.f32.mrf.mxu1  ;;  %2127 = vmatmul.mubr.f32.gmra.mxu1 %v164_v33 }
 0x128   :  { %1386 = vst [vmem:[%s3851_s3 + $0x328] sm:$0xff] %v1217_v36  ;;  %v1133_v41 = vmax.f32 %v358_v37, 0.0  ;;  %v783_v42 = vadd.f32 %v2809_v51, %v782_v40  ;;  %2129 = vmatprep.mubr.msk.f32.mxu1 %vm2220_vm0, %v2219_v0  ;;  %v86_v36 = vld [vmem:[%s3849_s0 + $0x240] sm:$0xff] }
 0x129   :  { %v362_v44 = vpop.f32.mrf.mxu0  ;;  %1875 = vmatmul.mubr.f32.gmra.mxu0 %v80_v38  ;;  %v1984_v45 = vpop.f32.mrf.mxu1 }
 0x12a   :  { %1302 = vst [vmem:[%s3851_s3 + $0x88] sm:$0xff] %v1133_v41  ;;  %v1218_v46 = vmax.f32 %v783_v42, 0.0  ;;  %v363_v47 = vadd.f32 %v2809_v51, %v362_v44  ;;  %1877 = vmatprep.mubr.msk.f32.mxu0 %vm2220_vm0, %v2219_v0  ;;  %v171_v41 = vld [vmem:[%s3849_s0 + $0x4e8] sm:$0xff] }
 0x12b   :  { %v1732_v49 = vpop.f32.mrf.mxu0  ;;  %v787_v50 = vpop.f32.mrf.mxu1  ;;  %2130 = vmatmul.mubr.f32.gmra.mxu1 %v165_v43 }
 0x12c   :  { %1387 = vst [vmem:[%s3851_s3 + $0x330] sm:$0xff] %v1218_v46  ;;  %v1134_v52 = vmax.f32 %v363_v47, 0.0  ;;  %v788_v53 = vadd.f32 %v2809_v51, %v787_v50  ;;  %2132 = vmatprep.mubr.msk.f32.mxu1 %vm2220_vm0, %v2219_v0  ;;  %v87_v46 = vld [vmem:[%s3849_s0 + $0x248] sm:$0xff] }
 0x12d   :  { %v367_v55 = vpop.f32.mrf.mxu0  ;;  %1878 = vmatmul.mubr.f32.gmra.mxu0 %v81_v48  ;;  %v1987_v56 = vpop.f32.mrf.mxu1 }
 0x12e   :  { %1303 = vst [vmem:[%s3851_s3 + $0x90] sm:$0xff] %v1134_v52  ;;  %v1219_v57 = vmax.f32 %v788_v53, 0.0  ;;  %v368_v58 = vadd.f32 %v2809_v51, %v367_v55  ;;  %1880 = vmatprep.mubr.msk.f32.mxu0 %vm2220_vm0, %v2219_v0  ;;  %v172_v52 = vld [vmem:[%s3849_s0 + $0x4f0] sm:$0xff] }
 0x12f   :  { %v1735_v60 = vpop.f32.mrf.mxu0  ;;  %v792_v61 = vpop.f32.mrf.mxu1  ;;  %2133 = vmatmul.mubr.f32.gmra.mxu1 %v166_v54 }
 0x130   :  { %1388 = vst [vmem:[%s3851_s3 + $0x338] sm:$0xff] %v1219_v57  ;;  %v1135_v62 = vmax.f32 %v368_v58, 0.0  ;;  %v793_v63 = vadd.f32 %v2809_v51, %v792_v61  ;;  %2135 = vmatprep.mubr.msk.f32.mxu1 %vm2220_vm0, %v2219_v0  ;;  %v88_v57 = vld [vmem:[%s3849_s0 + $0x250] sm:$0xff] }
 0x131   :  { %v372_v2 = vpop.f32.mrf.mxu0  ;;  %1881 = vmatmul.mubr.f32.gmra.mxu0 %v82_v59  ;;  %v1990_v3 = vpop.f32.mrf.mxu1 }
 0x132   :  { %1304 = vst [vmem:[%s3851_s3 + $0x98] sm:$0xff] %v1135_v62  ;;  %v1220_v4 = vmax.f32 %v793_v63, 0.0  ;;  %v373_v5 = vadd.f32 %v2809_v51, %v372_v2  ;;  %1883 = vmatprep.mubr.msk.f32.mxu0 %vm2220_vm0, %v2219_v0  ;;  %v173_v62 = vld [vmem:[%s3849_s0 + $0x4f8] sm:$0xff] }
 0x133   :  { %v1738_v7 = vpop.f32.mrf.mxu0  ;;  %v797_v8 = vpop.f32.mrf.mxu1  ;;  %2136 = vmatmul.mubr.f32.gmra.mxu1 %v167_v1 }
 0x134   :  { %1389 = vst [vmem:[%s3851_s3 + $0x340] sm:$0xff] %v1220_v4  ;;  %v1136_v9 = vmax.f32 %v373_v5, 0.0  ;;  %v798_v10 = vadd.f32 %v2809_v51, %v797_v8  ;;  %2138 = vmatprep.mubr.msk.f32.mxu1 %vm2220_vm0, %v2219_v0  ;;  %v89_v4 = vld [vmem:[%s3849_s0 + $0x258] sm:$0xff] }
 0x135   :  { %v377_v12 = vpop.f32.mrf.mxu0  ;;  %1884 = vmatmul.mubr.f32.gmra.mxu0 %v83_v6  ;;  %v1993_v13 = vpop.f32.mrf.mxu1 }
 0x136   :  { %1305 = vst [vmem:[%s3851_s3 + $0xa0] sm:$0xff] %v1136_v9  ;;  %v1221_v14 = vmax.f32 %v798_v10, 0.0  ;;  %v378_v15 = vadd.f32 %v2809_v51, %v377_v12  ;;  %1886 = vmatprep.mubr.msk.f32.mxu0 %vm2220_vm0, %v2219_v0  ;;  %v174_v9 = vld [vmem:[%s3849_s0 + $0x500] sm:$0xff] }
 0x137   :  { %v1741_v17 = vpop.f32.mrf.mxu0  ;;  %v802_v18 = vpop.f32.mrf.mxu1  ;;  %2139 = vmatmul.mubr.f32.gmra.mxu1 %v168_v11 }
 0x138   :  { %1390 = vst [vmem:[%s3851_s3 + $0x348] sm:$0xff] %v1221_v14  ;;  %v1137_v19 = vmax.f32 %v378_v15, 0.0  ;;  %v803_v20 = vadd.f32 %v2809_v51, %v802_v18  ;;  %2141 = vmatprep.mubr.msk.f32.mxu1 %vm2220_vm0, %v2219_v0  ;;  %v90_v14 = vld [vmem:[%s3849_s0 + $0x260] sm:$0xff] }
 0x139   :  { %v382_v22 = vpop.f32.mrf.mxu0  ;;  %1887 = vmatmul.mubr.f32.gmra.mxu0 %v84_v16  ;;  %v1996_v23 = vpop.f32.mrf.mxu1 }
 0x13a   :  { %1306 = vst [vmem:[%s3851_s3 + $0xa8] sm:$0xff] %v1137_v19  ;;  %v1222_v24 = vmax.f32 %v803_v20, 0.0  ;;  %v383_v25 = vadd.f32 %v2809_v51, %v382_v22  ;;  %1889 = vmatprep.mubr.msk.f32.mxu0 %vm2220_vm0, %v2219_v0  ;;  %v175_v19 = vld [vmem:[%s3849_s0 + $0x508] sm:$0xff] }
 0x13b   :  { %v1744_v27 = vpop.f32.mrf.mxu0  ;;  %v807_v28 = vpop.f32.mrf.mxu1  ;;  %2142 = vmatmul.mubr.f32.gmra.mxu1 %v169_v21 }
 0x13c   :  { %1391 = vst [vmem:[%s3851_s3 + $0x350] sm:$0xff] %v1222_v24  ;;  %v1138_v29 = vmax.f32 %v383_v25, 0.0  ;;  %v808_v30 = vadd.f32 %v2809_v51, %v807_v28  ;;  %2144 = vmatprep.mubr.msk.f32.mxu1 %vm2220_vm0, %v2219_v0  ;;  %v91_v24 = vld [vmem:[%s3849_s0 + $0x268] sm:$0xff] }
 0x13d   :  { %v387_v32 = vpop.f32.mrf.mxu0  ;;  %1890 = vmatmul.mubr.f32.gmra.mxu0 %v85_v26  ;;  %v1999_v33 = vpop.f32.mrf.mxu1 }
 0x13e   :  { %1307 = vst [vmem:[%s3851_s3 + $0xb0] sm:$0xff] %v1138_v29  ;;  %v1223_v34 = vmax.f32 %v808_v30, 0.0  ;;  %v388_v35 = vadd.f32 %v2809_v51, %v387_v32  ;;  %1892 = vmatprep.mubr.msk.f32.mxu0 %vm2220_vm0, %v2219_v0  ;;  %v176_v29 = vld [vmem:[%s3849_s0 + $0x510] sm:$0xff] }
 0x13f   :  { %v1747_v37 = vpop.f32.mrf.mxu0  ;;  %v812_v38 = vpop.f32.mrf.mxu1  ;;  %2145 = vmatmul.mubr.f32.gmra.mxu1 %v170_v31 }
 0x140   :  { %1392 = vst [vmem:[%s3851_s3 + $0x358] sm:$0xff] %v1223_v34  ;;  %v1139_v39 = vmax.f32 %v388_v35, 0.0  ;;  %v813_v40 = vadd.f32 %v2809_v51, %v812_v38  ;;  %2147 = vmatprep.mubr.msk.f32.mxu1 %vm2220_vm0, %v2219_v0  ;;  %v92_v34 = vld [vmem:[%s3849_s0 + $0x270] sm:$0xff] }
 0x141   :  { %v392_v42 = vpop.f32.mrf.mxu0  ;;  %1893 = vmatmul.mubr.f32.gmra.mxu0 %v86_v36  ;;  %v2002_v43 = vpop.f32.mrf.mxu1 }
 0x142   :  { %1308 = vst [vmem:[%s3851_s3 + $0xb8] sm:$0xff] %v1139_v39  ;;  %v1224_v44 = vmax.f32 %v813_v40, 0.0  ;;  %v393_v45 = vadd.f32 %v2809_v51, %v392_v42  ;;  %1895 = vmatprep.mubr.msk.f32.mxu0 %vm2220_vm0, %v2219_v0  ;;  %v177_v39 = vld [vmem:[%s3849_s0 + $0x518] sm:$0xff] }
 0x143   :  { %v1750_v47 = vpop.f32.mrf.mxu0  ;;  %v817_v48 = vpop.f32.mrf.mxu1  ;;  %2148 = vmatmul.mubr.f32.gmra.mxu1 %v171_v41 }
 0x144   :  { %1393 = vst [vmem:[%s3851_s3 + $0x360] sm:$0xff] %v1224_v44  ;;  %v1140_v49 = vmax.f32 %v393_v45, 0.0  ;;  %v818_v50 = vadd.f32 %v2809_v51, %v817_v48  ;;  %2150 = vmatprep.mubr.msk.f32.mxu1 %vm2220_vm0, %v2219_v0  ;;  %v93_v44 = vld [vmem:[%s3849_s0 + $0x278] sm:$0xff] }
 0x145   :  { %v397_v53 = vpop.f32.mrf.mxu0  ;;  %1896 = vmatmul.mubr.f32.gmra.mxu0 %v87_v46  ;;  %v2005_v54 = vpop.f32.mrf.mxu1 }
 0x146   :  { %1309 = vst [vmem:[%s3851_s3 + $0xc0] sm:$0xff] %v1140_v49  ;;  %v1225_v55 = vmax.f32 %v818_v50, 0.0  ;;  %v398_v56 = vadd.f32 %v2809_v51, %v397_v53  ;;  %1898 = vmatprep.mubr.msk.f32.mxu0 %vm2220_vm0, %v2219_v0  ;;  %v178_v49 = vld [vmem:[%s3849_s0 + $0x520] sm:$0xff] }
 0x147   :  { %v1753_v58 = vpop.f32.mrf.mxu0  ;;  %v822_v59 = vpop.f32.mrf.mxu1  ;;  %2151 = vmatmul.mubr.f32.gmra.mxu1 %v172_v52 }
 0x148   :  { %1394 = vst [vmem:[%s3851_s3 + $0x368] sm:$0xff] %v1225_v55  ;;  %v1141_v60 = vmax.f32 %v398_v56, 0.0  ;;  %v823_v61 = vadd.f32 %v2809_v51, %v822_v59  ;;  %2153 = vmatprep.mubr.msk.f32.mxu1 %vm2220_vm0, %v2219_v0  ;;  %v94_v55 = vld [vmem:[%s3849_s0 + $0x280] sm:$0xff] }
 0x149   :  { %v402_v63 = vpop.f32.mrf.mxu0  ;;  %1899 = vmatmul.mubr.f32.gmra.mxu0 %v88_v57  ;;  %v2008_v1 = vpop.f32.mrf.mxu1 }
 0x14a   :  { %1310 = vst [vmem:[%s3851_s3 + $0xc8] sm:$0xff] %v1141_v60  ;;  %v1226_v2 = vmax.f32 %v823_v61, 0.0  ;;  %v403_v3 = vadd.f32 %v2809_v51, %v402_v63  ;;  %1901 = vmatprep.mubr.msk.f32.mxu0 %vm2220_vm0, %v2219_v0  ;;  %v179_v60 = vld [vmem:[%s3849_s0 + $0x528] sm:$0xff]  ;;  %v3392_v1 = vld [vmem:[%s3850_s2] ss:$0 sm:$0xff] }
 0x14b   :  { %v1756_v5 = vpop.f32.mrf.mxu0  ;;  %v827_v6 = vpop.f32.mrf.mxu1  ;;  %2154 = vmatmul.mubr.f32.gmra.mxu1 %v173_v62 }
 0x14c   :  { %1395 = vst [vmem:[%s3851_s3 + $0x370] sm:$0xff] %v1226_v2  ;;  %v1142_v7 = vmax.f32 %v403_v3, 0.0  ;;  %v828_v8 = vadd.f32 %v2809_v51, %v827_v6  ;;  %2156 = vmatprep.mubr.msk.f32.mxu1 %vm2220_vm0, %v2219_v0  ;;  %v95_v2 = vld [vmem:[%s3849_s0 + $0x288] sm:$0xff] }
 0x14d   :  { %v407_v10 = vpop.f32.mrf.mxu0  ;;  %1902 = vmatmul.mubr.f32.gmra.mxu0 %v89_v4  ;;  %v2011_v11 = vpop.f32.mrf.mxu1 }
 0x14e   :  { %1311 = vst [vmem:[%s3851_s3 + $0xd0] sm:$0xff] %v1142_v7  ;;  %v1227_v12 = vmax.f32 %v828_v8, 0.0  ;;  %v408_v13 = vadd.f32 %v2809_v51, %v407_v10  ;;  %1904 = vmatprep.mubr.msk.f32.mxu0 %vm2220_vm0, %v2219_v0  ;;  %v180_v7 = vld [vmem:[%s3849_s0 + $0x530] sm:$0xff] }
 0x14f   :  { %v1759_v15 = vpop.f32.mrf.mxu0  ;;  %v832_v16 = vpop.f32.mrf.mxu1  ;;  %2157 = vmatmul.mubr.f32.gmra.mxu1 %v174_v9 }
 0x150   :  { %1396 = vst [vmem:[%s3851_s3 + $0x378] sm:$0xff] %v1227_v12  ;;  %v1143_v17 = vmax.f32 %v408_v13, 0.0  ;;  %v833_v18 = vadd.f32 %v2809_v51, %v832_v16  ;;  %2159 = vmatprep.mubr.msk.f32.mxu1 %vm2220_vm0, %v2219_v0  ;;  %v96_v12 = vld [vmem:[%s3849_s0 + $0x290] sm:$0xff] }
 0x151   :  { %v412_v20 = vpop.f32.mrf.mxu0  ;;  %1905 = vmatmul.mubr.f32.gmra.mxu0 %v90_v14  ;;  %v2014_v21 = vpop.f32.mrf.mxu1 }
 0x152   :  { %1312 = vst [vmem:[%s3851_s3 + $0xd8] sm:$0xff] %v1143_v17  ;;  %v1228_v22 = vmax.f32 %v833_v18, 0.0  ;;  %v413_v23 = vadd.f32 %v2809_v51, %v412_v20  ;;  %1907 = vmatprep.mubr.msk.f32.mxu0 %vm2220_vm0, %v2219_v0  ;;  %v181_v17 = vld [vmem:[%s3849_s0 + $0x538] sm:$0xff] }
 0x153   :  { %v1762_v25 = vpop.f32.mrf.mxu0  ;;  %v837_v26 = vpop.f32.mrf.mxu1  ;;  %2160 = vmatmul.mubr.f32.gmra.mxu1 %v175_v19 }
 0x154   :  { %1397 = vst [vmem:[%s3851_s3 + $0x380] sm:$0xff] %v1228_v22  ;;  %v1144_v27 = vmax.f32 %v413_v23, 0.0  ;;  %v838_v28 = vadd.f32 %v2809_v51, %v837_v26  ;;  %2162 = vmatprep.mubr.msk.f32.mxu1 %vm2220_vm0, %v2219_v0  ;;  %v97_v22 = vld [vmem:[%s3849_s0 + $0x298] sm:$0xff] }
 0x155   :  { %v417_v30 = vpop.f32.mrf.mxu0  ;;  %1908 = vmatmul.mubr.f32.gmra.mxu0 %v91_v24  ;;  %v2017_v31 = vpop.f32.mrf.mxu1 }
 0x156   :  { %1313 = vst [vmem:[%s3851_s3 + $0xe0] sm:$0xff] %v1144_v27  ;;  %v1229_v32 = vmax.f32 %v838_v28, 0.0  ;;  %v418_v33 = vadd.f32 %v2809_v51, %v417_v30  ;;  %1910 = vmatprep.mubr.msk.f32.mxu0 %vm2220_vm0, %v2219_v0  ;;  %v182_v27 = vld [vmem:[%s3849_s0 + $0x540] sm:$0xff] }
 0x157   :  { %v1765_v35 = vpop.f32.mrf.mxu0  ;;  %v842_v36 = vpop.f32.mrf.mxu1  ;;  %2163 = vmatmul.mubr.f32.gmra.mxu1 %v176_v29 }
 0x158   :  { %1398 = vst [vmem:[%s3851_s3 + $0x388] sm:$0xff] %v1229_v32  ;;  %v1145_v37 = vmax.f32 %v418_v33, 0.0  ;;  %v843_v38 = vadd.f32 %v2809_v51, %v842_v36  ;;  %2165 = vmatprep.mubr.msk.f32.mxu1 %vm2220_vm0, %v2219_v0  ;;  %v98_v32 = vld [vmem:[%s3849_s0 + $0x2a0] sm:$0xff] }
 0x159   :  { %v422_v40 = vpop.f32.mrf.mxu0  ;;  %1911 = vmatmul.mubr.f32.gmra.mxu0 %v92_v34  ;;  %v2020_v41 = vpop.f32.mrf.mxu1 }
 0x15a   :  { %1314 = vst [vmem:[%s3851_s3 + $0xe8] sm:$0xff] %v1145_v37  ;;  %v1230_v42 = vmax.f32 %v843_v38, 0.0  ;;  %v423_v43 = vadd.f32 %v2809_v51, %v422_v40  ;;  %1913 = vmatprep.mubr.msk.f32.mxu0 %vm2220_vm0, %v2219_v0 }
 0x15b   :  { %v1768_v45 = vpop.f32.mrf.mxu0  ;;  %v847_v46 = vpop.f32.mrf.mxu1  ;;  %2166 = vmatmul.mubr.f32.gmra.mxu1 %v177_v39 }
 0x15c   :  { %1399 = vst [vmem:[%s3851_s3 + $0x390] sm:$0xff] %v1230_v42  ;;  %v1146_v47 = vmax.f32 %v423_v43, 0.0  ;;  %v848_v48 = vadd.f32 %v2809_v51, %v847_v46  ;;  %2168 = vmatprep.mubr.msk.f32.mxu1 %vm2220_vm0, %v2219_v0 }
 0x15d   :  { %v427_v50 = vpop.f32.mrf.mxu0  ;;  %1914 = vmatmul.mubr.f32.gmra.mxu0 %v93_v44  ;;  %v2023_v52 = vpop.f32.mrf.mxu1 }
 0x15e   :  { %1315 = vst [vmem:[%s3851_s3 + $0xf0] sm:$0xff] %v1146_v47  ;;  %v1231_v53 = vmax.f32 %v848_v48, 0.0  ;;  %v428_v54 = vadd.f32 %v2809_v51, %v427_v50  ;;  %1916 = vmatprep.mubr.msk.f32.mxu0 %vm2220_vm0, %v2219_v0 }
 0x15f   :  { %v1771_v56 = vpop.f32.mrf.mxu0  ;;  %v852_v57 = vpop.f32.mrf.mxu1  ;;  %2169 = vmatmul.mubr.f32.gmra.mxu1 %v178_v49 }
 0x160   :  { %1400 = vst [vmem:[%s3851_s3 + $0x398] sm:$0xff] %v1231_v53  ;;  %v1147_v58 = vmax.f32 %v428_v54, 0.0  ;;  %v853_v59 = vadd.f32 %v2809_v51, %v852_v57  ;;  %2171 = vmatprep.mubr.msk.f32.mxu1 %vm2220_vm0, %v2219_v0 }
 0x161   :  { %v432_v61 = vpop.f32.mrf.mxu0  ;;  %1917 = vmatmul.mubr.f32.gmra.mxu0 %v94_v55  ;;  %v2026_v62 = vpop.f32.mrf.mxu1 }
 0x162   :  { %1316 = vst [vmem:[%s3851_s3 + $0xf8] sm:$0xff] %v1147_v58  ;;  %v1232_v63 = vmax.f32 %v853_v59, 0.0  ;;  %v433_v51 = vadd.f32 %v3392_v1, %v432_v61  ;;  %1919 = vmatprep.mubr.msk.f32.mxu0 %vm2220_vm0, %v2219_v0 }
 0x163   :  { %v1774_v3 = vpop.f32.mrf.mxu0  ;;  %v857_v4 = vpop.f32.mrf.mxu1  ;;  %2172 = vmatmul.mubr.f32.gmra.mxu1 %v179_v60 }
 0x164   :  { %1401 = vst [vmem:[%s3851_s3 + $0x3a0] sm:$0xff] %v1232_v63  ;;  %v1148_v5 = vmax.f32 %v433_v51, 0.0  ;;  %v858_v6 = vadd.f32 %v3392_v1, %v857_v4  ;;  %2174 = vmatprep.mubr.msk.f32.mxu1 %vm2220_vm0, %v2219_v0 }
 0x165   :  { %v437_v8 = vpop.f32.mrf.mxu0  ;;  %1920 = vmatmul.mubr.f32.gmra.mxu0 %v95_v2  ;;  %v2029_v9 = vpop.f32.mrf.mxu1 }
 0x166   :  { %1317 = vst [vmem:[%s3851_s3 + $0x100] sm:$0xff] %v1148_v5  ;;  %v1233_v10 = vmax.f32 %v858_v6, 0.0  ;;  %v438_v11 = vadd.f32 %v3392_v1, %v437_v8  ;;  %1922 = vmatprep.mubr.msk.f32.mxu0 %vm2220_vm0, %v2219_v0 }
 0x167   :  { %v1777_v13 = vpop.f32.mrf.mxu0  ;;  %v862_v14 = vpop.f32.mrf.mxu1  ;;  %2175 = vmatmul.mubr.f32.gmra.mxu1 %v180_v7 }
 0x168   :  { %1402 = vst [vmem:[%s3851_s3 + $0x3a8] sm:$0xff] %v1233_v10  ;;  %v1149_v15 = vmax.f32 %v438_v11, 0.0  ;;  %v863_v16 = vadd.f32 %v3392_v1, %v862_v14  ;;  %2177 = vmatprep.mubr.msk.f32.mxu1 %vm2220_vm0, %v2219_v0 }
 0x169   :  { %v442_v18 = vpop.f32.mrf.mxu0  ;;  %1923 = vmatmul.mubr.f32.gmra.mxu0 %v96_v12  ;;  %v2032_v19 = vpop.f32.mrf.mxu1 }
 0x16a   :  { %1318 = vst [vmem:[%s3851_s3 + $0x108] sm:$0xff] %v1149_v15  ;;  %v1234_v20 = vmax.f32 %v863_v16, 0.0  ;;  %v443_v21 = vadd.f32 %v3392_v1, %v442_v18  ;;  %1925 = vmatprep.mubr.msk.f32.mxu0 %vm2220_vm0, %v2219_v0 }
 0x16b   :  { %v1780_v23 = vpop.f32.mrf.mxu0  ;;  %v867_v24 = vpop.f32.mrf.mxu1  ;;  %2178 = vmatmul.mubr.f32.gmra.mxu1 %v181_v17 }
 0x16c   :  { %1403 = vst [vmem:[%s3851_s3 + $0x3b0] sm:$0xff] %v1234_v20  ;;  %v1150_v25 = vmax.f32 %v443_v21, 0.0  ;;  %v868_v26 = vadd.f32 %v3392_v1, %v867_v24  ;;  %2180 = vmatprep.mubr.msk.f32.mxu1 %vm2220_vm0, %v2219_v0 }
 0x16d   :  { %v447_v28 = vpop.f32.mrf.mxu0  ;;  %1926 = vmatmul.mubr.f32.gmra.mxu0 %v97_v22  ;;  %v2035_v29 = vpop.f32.mrf.mxu1 }
 0x16e   :  { %1319 = vst [vmem:[%s3851_s3 + $0x110] sm:$0xff] %v1150_v25  ;;  %v1235_v30 = vmax.f32 %v868_v26, 0.0  ;;  %v448_v31 = vadd.f32 %v3392_v1, %v447_v28  ;;  %1928 = vmatprep.mubr.msk.f32.mxu0 %vm2220_vm0, %v2219_v0 }
 0x16f   :  { %v1783_v33 = vpop.f32.mrf.mxu0  ;;  %v872_v34 = vpop.f32.mrf.mxu1  ;;  %2181 = vmatmul.mubr.f32.gmra.mxu1 %v182_v27 }
 0x170   :  { %1404 = vst [vmem:[%s3851_s3 + $0x3b8] sm:$0xff] %v1235_v30  ;;  %v1151_v35 = vmax.f32 %v448_v31, 0.0  ;;  %v873_v36 = vadd.f32 %v3392_v1, %v872_v34 }
 0x171   :  { %v452_v37 = vpop.f32.mrf.mxu0  ;;  %1929 = vmatmul.mubr.f32.gmra.mxu0 %v98_v32  ;;  %v2038_v38 = vpop.f32.mrf.mxu1 }
 0x172   :  { %1320 = vst [vmem:[%s3851_s3 + $0x118] sm:$0xff] %v1151_v35  ;;  %v1236_v0 = vmax.f32 %v873_v36, 0.0  ;;  %v453_v39 = vadd.f32 %v3392_v1, %v452_v37 }
 0x173   :  { %v1786_v40 = vpop.f32.mrf.mxu0  ;;  %v877_v41 = vpop.f32.mrf.mxu1 }
 0x174   :  { %1405 = vst [vmem:[%s3851_s3 + $0x3c0] sm:$0xff] %v1236_v0  ;;  %v1152_v42 = vmax.f32 %v453_v39, 0.0  ;;  %v878_v43 = vadd.f32 %v3392_v1, %v877_v41 }
 0x175   :  { %v457_v44 = vpop.f32.mrf.mxu0  ;;  %v2041_v45 = vpop.f32.mrf.mxu1 }
 0x176   :  { %1321 = vst [vmem:[%s3851_s3 + $0x120] sm:$0xff] %v1152_v42  ;;  %v1237_v46 = vmax.f32 %v878_v43, 0.0  ;;  %v458_v47 = vadd.f32 %v3392_v1, %v457_v44 }
 0x177   :  { %v1789_v48 = vpop.f32.mrf.mxu0  ;;  %v882_v49 = vpop.f32.mrf.mxu1 }
 0x178   :  { %1406 = vst [vmem:[%s3851_s3 + $0x3c8] sm:$0xff] %v1237_v46  ;;  %v1153_v50 = vmax.f32 %v458_v47, 0.0  ;;  %v883_v52 = vadd.f32 %v3392_v1, %v882_v49 }
 0x179   :  { %v462_v53 = vpop.f32.mrf.mxu0  ;;  %v2044_v54 = vpop.f32.mrf.mxu1 }
 0x17a   :  { %1322 = vst [vmem:[%s3851_s3 + $0x128] sm:$0xff] %v1153_v50  ;;  %v1238_v55 = vmax.f32 %v883_v52, 0.0  ;;  %v463_v56 = vadd.f32 %v3392_v1, %v462_v53 }
 0x17b   :  { %v1792_v57 = vpop.f32.mrf.mxu0  ;;  %v887_v58 = vpop.f32.mrf.mxu1 }
 0x17c   :  { %1407 = vst [vmem:[%s3851_s3 + $0x3d0] sm:$0xff] %v1238_v55  ;;  %v1154_v59 = vmax.f32 %v463_v56, 0.0  ;;  %v888_v60 = vadd.f32 %v3392_v1, %v887_v58 }
 0x17d   :  { %v467_v61 = vpop.f32.mrf.mxu0  ;;  %v2047_v62 = vpop.f32.mrf.mxu1 }
 0x17e   :  { %1323 = vst [vmem:[%s3851_s3 + $0x130] sm:$0xff] %v1154_v59  ;;  %v1239_v63 = vmax.f32 %v888_v60, 0.0  ;;  %v468_v51 = vadd.f32 %v3392_v1, %v467_v61 }
 0x17f   :  { %v1795_v2 = vpop.f32.mrf.mxu0  ;;  %v892_v3 = vpop.f32.mrf.mxu1 }
 0x180   :  { %1408 = vst [vmem:[%s3851_s3 + $0x3d8] sm:$0xff] %v1239_v63  ;;  %v1155_v4 = vmax.f32 %v468_v51, 0.0  ;;  %v893_v5 = vadd.f32 %v3392_v1, %v892_v3 }
 0x181   :  { %v472_v6 = vpop.f32.mrf.mxu0  ;;  %v2050_v7 = vpop.f32.mrf.mxu1 }
 0x182   :  { %1324 = vst [vmem:[%s3851_s3 + $0x138] sm:$0xff] %v1155_v4  ;;  %v1240_v8 = vmax.f32 %v893_v5, 0.0  ;;  %v473_v9 = vadd.f32 %v3392_v1, %v472_v6 }
 0x183   :  { %v1798_v10 = vpop.f32.mrf.mxu0  ;;  %v897_v11 = vpop.f32.mrf.mxu1 }
 0x184   :  { %1409 = vst [vmem:[%s3851_s3 + $0x3e0] sm:$0xff] %v1240_v8  ;;  %v1156_v12 = vmax.f32 %v473_v9, 0.0  ;;  %v898_v13 = vadd.f32 %v3392_v1, %v897_v11 }
 0x185   :  { %v477_v14 = vpop.f32.mrf.mxu0  ;;  %v2053_v15 = vpop.f32.mrf.mxu1 }
 0x186   :  { %1325 = vst [vmem:[%s3851_s3 + $0x140] sm:$0xff] %v1156_v12  ;;  %v1241_v16 = vmax.f32 %v898_v13, 0.0  ;;  %v478_v17 = vadd.f32 %v3392_v1, %v477_v14 }
 0x187   :  { %v1801_v18 = vpop.f32.mrf.mxu0  ;;  %v902_v19 = vpop.f32.mrf.mxu1 }
 0x188   :  { %1410 = vst [vmem:[%s3851_s3 + $0x3e8] sm:$0xff] %v1241_v16  ;;  %v1157_v20 = vmax.f32 %v478_v17, 0.0  ;;  %v903_v21 = vadd.f32 %v3392_v1, %v902_v19 }
 0x189   :  { %v482_v22 = vpop.f32.mrf.mxu0  ;;  %v2056_v23 = vpop.f32.mrf.mxu1 }
 0x18a   :  { %1326 = vst [vmem:[%s3851_s3 + $0x148] sm:$0xff] %v1157_v20  ;;  %v1242_v24 = vmax.f32 %v903_v21, 0.0  ;;  %v483_v25 = vadd.f32 %v3392_v1, %v482_v22 }
 0x18b   :  { %v1804_v26 = vpop.f32.mrf.mxu0  ;;  %v907_v27 = vpop.f32.mrf.mxu1 }
 0x18c   :  { %1411 = vst [vmem:[%s3851_s3 + $0x3f0] sm:$0xff] %v1242_v24  ;;  %v1158_v28 = vmax.f32 %v483_v25, 0.0  ;;  %v908_v29 = vadd.f32 %v3392_v1, %v907_v27 }
 0x18d   :  { %v487_v30 = vpop.f32.mrf.mxu0  ;;  %v2059_v31 = vpop.f32.mrf.mxu1 }
 0x18e   :  { %1327 = vst [vmem:[%s3851_s3 + $0x150] sm:$0xff] %v1158_v28  ;;  %v1243_v32 = vmax.f32 %v908_v29, 0.0  ;;  %v488_v33 = vadd.f32 %v3392_v1, %v487_v30 }
 0x18f   :  { %v1807_v34 = vpop.f32.mrf.mxu0  ;;  %v912_v35 = vpop.f32.mrf.mxu1 }
 0x190   :  { %1412 = vst [vmem:[%s3851_s3 + $0x3f8] sm:$0xff] %v1243_v32  ;;  %v1159_v36 = vmax.f32 %v488_v33, 0.0  ;;  %v913_v37 = vadd.f32 %v3392_v1, %v912_v35 }
 0x191   :  { %v492_v38 = vpop.f32.mrf.mxu0  ;;  %v2062_v0 = vpop.f32.mrf.mxu1 }
 0x192   :  { %1328 = vst [vmem:[%s3851_s3 + $0x158] sm:$0xff] %v1159_v36  ;;  %v1244_v39 = vmax.f32 %v913_v37, 0.0  ;;  %v493_v40 = vadd.f32 %v3392_v1, %v492_v38 }
 0x193   :  { %v1810_v41 = vpop.f32.mrf.mxu0  ;;  %v917_v42 = vpop.f32.mrf.mxu1 }
 0x194   :  { %1413 = vst [vmem:[%s3851_s3 + $0x400] sm:$0xff] %v1244_v39  ;;  %v1160_v43 = vmax.f32 %v493_v40, 0.0  ;;  %v918_v44 = vadd.f32 %v3392_v1, %v917_v42 }
 0x195   :  { %v497_v45 = vpop.f32.mrf.mxu0  ;;  %v2065_v46 = vpop.f32.mrf.mxu1 }
 0x196   :  { %1329 = vst [vmem:[%s3851_s3 + $0x160] sm:$0xff] %v1160_v43  ;;  %v1245_v47 = vmax.f32 %v918_v44, 0.0  ;;  %v498_v48 = vadd.f32 %v3392_v1, %v497_v45 }
 0x197   :  { %v1813_v49 = vpop.f32.mrf.mxu0  ;;  %v922_v50 = vpop.f32.mrf.mxu1 }
 0x198   :  { %1414 = vst [vmem:[%s3851_s3 + $0x408] sm:$0xff] %v1245_v47  ;;  %v1161_v52 = vmax.f32 %v498_v48, 0.0  ;;  %v923_v53 = vadd.f32 %v3392_v1, %v922_v50 }
 0x199   :  { %v502_v54 = vpop.f32.mrf.mxu0  ;;  %v2068_v55 = vpop.f32.mrf.mxu1 }
 0x19a   :  { %1330 = vst [vmem:[%s3851_s3 + $0x168] sm:$0xff] %v1161_v52  ;;  %v1246_v56 = vmax.f32 %v923_v53, 0.0  ;;  %v503_v57 = vadd.f32 %v3392_v1, %v502_v54 }
 0x19b   :  { %v1816_v58 = vpop.f32.mrf.mxu0  ;;  %v927_v59 = vpop.f32.mrf.mxu1 }
 0x19c   :  { %1415 = vst [vmem:[%s3851_s3 + $0x410] sm:$0xff] %v1246_v56  ;;  %v1162_v60 = vmax.f32 %v503_v57, 0.0  ;;  %v928_v61 = vadd.f32 %v3392_v1, %v927_v59 }
 0x19d   :  { %v507_v62 = vpop.f32.mrf.mxu0  ;;  %v2071_v63 = vpop.f32.mrf.mxu1 }
 0x19e   :  { %1331 = vst [vmem:[%s3851_s3 + $0x170] sm:$0xff] %v1162_v60  ;;  %v1247_v51 = vmax.f32 %v928_v61, 0.0  ;;  %v508_v2 = vadd.f32 %v3392_v1, %v507_v62 }
 0x19f   :  { %v1819_v3 = vpop.f32.mrf.mxu0  ;;  %v932_v4 = vpop.f32.mrf.mxu1 }
 0x1a0   :  { %1416 = vst [vmem:[%s3851_s3 + $0x418] sm:$0xff] %v1247_v51  ;;  %v1163_v5 = vmax.f32 %v508_v2, 0.0  ;;  %v933_v6 = vadd.f32 %v3392_v1, %v932_v4 }
 0x1a1   :  { %v512_v7 = vpop.f32.mrf.mxu0  ;;  %v2074_v8 = vpop.f32.mrf.mxu1 }
 0x1a2   :  { %1332 = vst [vmem:[%s3851_s3 + $0x178] sm:$0xff] %v1163_v5  ;;  %v1248_v9 = vmax.f32 %v933_v6, 0.0  ;;  %v513_v10 = vadd.f32 %v3392_v1, %v512_v7 }
 0x1a3   :  { %v1822_v11 = vpop.f32.mrf.mxu0  ;;  %v937_v12 = vpop.f32.mrf.mxu1 }
 0x1a4   :  { %1417 = vst [vmem:[%s3851_s3 + $0x420] sm:$0xff] %v1248_v9  ;;  %v1164_v13 = vmax.f32 %v513_v10, 0.0  ;;  %v938_v14 = vadd.f32 %v3392_v1, %v937_v12 }
 0x1a5   :  { %v517_v15 = vpop.f32.mrf.mxu0  ;;  %v2077_v16 = vpop.f32.mrf.mxu1 }
 0x1a6   :  { %1333 = vst [vmem:[%s3851_s3 + $0x180] sm:$0xff] %v1164_v13  ;;  %v1249_v17 = vmax.f32 %v938_v14, 0.0  ;;  %v518_v18 = vadd.f32 %v3392_v1, %v517_v15 }
 0x1a7   :  { %v1825_v19 = vpop.f32.mrf.mxu0  ;;  %v942_v20 = vpop.f32.mrf.mxu1 }
 0x1a8   :  { %1418 = vst [vmem:[%s3851_s3 + $0x428] sm:$0xff] %v1249_v17  ;;  %v1165_v21 = vmax.f32 %v518_v18, 0.0  ;;  %v943_v22 = vadd.f32 %v3392_v1, %v942_v20 }
 0x1a9   :  { %v522_v23 = vpop.f32.mrf.mxu0  ;;  %v2080_v24 = vpop.f32.mrf.mxu1 }
 0x1aa   :  { %1334 = vst [vmem:[%s3851_s3 + $0x188] sm:$0xff] %v1165_v21  ;;  %v1250_v25 = vmax.f32 %v943_v22, 0.0  ;;  %v523_v26 = vadd.f32 %v3392_v1, %v522_v23 }
 0x1ab   :  { %v1828_v27 = vpop.f32.mrf.mxu0  ;;  %v947_v28 = vpop.f32.mrf.mxu1 }
 0x1ac   :  { %1419 = vst [vmem:[%s3851_s3 + $0x430] sm:$0xff] %v1250_v25  ;;  %v1166_v29 = vmax.f32 %v523_v26, 0.0  ;;  %v948_v30 = vadd.f32 %v3392_v1, %v947_v28 }
 0x1ad   :  { %v527_v31 = vpop.f32.mrf.mxu0  ;;  %v2083_v32 = vpop.f32.mrf.mxu1 }
 0x1ae   :  { %1335 = vst [vmem:[%s3851_s3 + $0x190] sm:$0xff] %v1166_v29  ;;  %v1251_v33 = vmax.f32 %v948_v30, 0.0  ;;  %v528_v34 = vadd.f32 %v3392_v1, %v527_v31 }
 0x1af   :  { %v1831_v35 = vpop.f32.mrf.mxu0  ;;  %v952_v36 = vpop.f32.mrf.mxu1 }
 0x1b0   :  { %1420 = vst [vmem:[%s3851_s3 + $0x438] sm:$0xff] %v1251_v33  ;;  %v1167_v37 = vmax.f32 %v528_v34, 0.0  ;;  %v953_v38 = vadd.f32 %v3392_v1, %v952_v36 }
 0x1b1   :  { %v532_v0 = vpop.f32.mrf.mxu0  ;;  %v2086_v39 = vpop.f32.mrf.mxu1 }
 0x1b2   :  { %1336 = vst [vmem:[%s3851_s3 + $0x198] sm:$0xff] %v1167_v37  ;;  %v1252_v40 = vmax.f32 %v953_v38, 0.0  ;;  %v533_v41 = vadd.f32 %v3392_v1, %v532_v0 }
 0x1b3   :  { %v1834_v42 = vpop.f32.mrf.mxu0  ;;  %v957_v43 = vpop.f32.mrf.mxu1 }
 0x1b4   :  { %1421 = vst [vmem:[%s3851_s3 + $0x440] sm:$0xff] %v1252_v40  ;;  %v1168_v44 = vmax.f32 %v533_v41, 0.0  ;;  %v958_v45 = vadd.f32 %v3392_v1, %v957_v43 }
 0x1b5   :  { %v537_v46 = vpop.f32.mrf.mxu0  ;;  %v2089_v47 = vpop.f32.mrf.mxu1 }
 0x1b6   :  { %1337 = vst [vmem:[%s3851_s3 + $0x1a0] sm:$0xff] %v1168_v44  ;;  %v1253_v48 = vmax.f32 %v958_v45, 0.0  ;;  %v538_v49 = vadd.f32 %v3392_v1, %v537_v46 }
 0x1b7   :  { %v1837_v50 = vpop.f32.mrf.mxu0  ;;  %v962_v52 = vpop.f32.mrf.mxu1 }
 0x1b8   :  { %1422 = vst [vmem:[%s3851_s3 + $0x448] sm:$0xff] %v1253_v48  ;;  %v1169_v53 = vmax.f32 %v538_v49, 0.0  ;;  %v963_v54 = vadd.f32 %v3392_v1, %v962_v52 }
 0x1b9   :  { %v542_v55 = vpop.f32.mrf.mxu0  ;;  %v2092_v56 = vpop.f32.mrf.mxu1 }
 0x1ba   :  { %1338 = vst [vmem:[%s3851_s3 + $0x1a8] sm:$0xff] %v1169_v53  ;;  %v1254_v57 = vmax.f32 %v963_v54, 0.0  ;;  %v543_v58 = vadd.f32 %v3392_v1, %v542_v55 }
 0x1bb   :  { %v1840_v59 = vpop.f32.mrf.mxu0  ;;  %v967_v60 = vpop.f32.mrf.mxu1 }
 0x1bc   :  { %1423 = vst [vmem:[%s3851_s3 + $0x450] sm:$0xff] %v1254_v57  ;;  %v1170_v61 = vmax.f32 %v543_v58, 0.0  ;;  %v968_v62 = vadd.f32 %v3392_v1, %v967_v60 }
 0x1bd   :  { %v547_v63 = vpop.f32.mrf.mxu0  ;;  %v2095_v51 = vpop.f32.mrf.mxu1 }
 0x1be   :  { %1339 = vst [vmem:[%s3851_s3 + $0x1b0] sm:$0xff] %v1170_v61  ;;  %v1255_v2 = vmax.f32 %v968_v62, 0.0  ;;  %v548_v3 = vadd.f32 %v3392_v1, %v547_v63 }
 0x1bf   :  { %v1843_v4 = vpop.f32.mrf.mxu0  ;;  %v972_v5 = vpop.f32.mrf.mxu1 }
 0x1c0   :  { %1424 = vst [vmem:[%s3851_s3 + $0x458] sm:$0xff] %v1255_v2  ;;  %v1171_v6 = vmax.f32 %v548_v3, 0.0  ;;  %v973_v7 = vadd.f32 %v3392_v1, %v972_v5 }
 0x1c1   :  { %v552_v8 = vpop.f32.mrf.mxu0  ;;  %v2098_v9 = vpop.f32.mrf.mxu1 }
 0x1c2   :  { %1340 = vst [vmem:[%s3851_s3 + $0x1b8] sm:$0xff] %v1171_v6  ;;  %v1256_v10 = vmax.f32 %v973_v7, 0.0  ;;  %v553_v11 = vadd.f32 %v3392_v1, %v552_v8 }
 0x1c3   :  { %v1846_v12 = vpop.f32.mrf.mxu0  ;;  %v977_v13 = vpop.f32.mrf.mxu1 }
 0x1c4   :  { %1425 = vst [vmem:[%s3851_s3 + $0x460] sm:$0xff] %v1256_v10  ;;  %v1172_v14 = vmax.f32 %v553_v11, 0.0  ;;  %v978_v15 = vadd.f32 %v3392_v1, %v977_v13 }
 0x1c5   :  { %v557_v16 = vpop.f32.mrf.mxu0  ;;  %v2101_v17 = vpop.f32.mrf.mxu1 }
 0x1c6   :  { %1341 = vst [vmem:[%s3851_s3 + $0x1c0] sm:$0xff] %v1172_v14  ;;  %v1257_v18 = vmax.f32 %v978_v15, 0.0  ;;  %v558_v19 = vadd.f32 %v3392_v1, %v557_v16 }
 0x1c7   :  { %v1849_v20 = vpop.f32.mrf.mxu0  ;;  %v982_v21 = vpop.f32.mrf.mxu1 }
 0x1c8   :  { %1426 = vst [vmem:[%s3851_s3 + $0x468] sm:$0xff] %v1257_v18  ;;  %v1173_v22 = vmax.f32 %v558_v19, 0.0  ;;  %v983_v23 = vadd.f32 %v3392_v1, %v982_v21 }
 0x1c9   :  { %v562_v24 = vpop.f32.mrf.mxu0  ;;  %v2104_v25 = vpop.f32.mrf.mxu1 }
 0x1ca   :  { %1342 = vst [vmem:[%s3851_s3 + $0x1c8] sm:$0xff] %v1173_v22  ;;  %v1258_v26 = vmax.f32 %v983_v23, 0.0  ;;  %v563_v27 = vadd.f32 %v3392_v1, %v562_v24 }
 0x1cb   :  { %v1852_v28 = vpop.f32.mrf.mxu0  ;;  %v987_v29 = vpop.f32.mrf.mxu1 }
 0x1cc   :  { %1427 = vst [vmem:[%s3851_s3 + $0x470] sm:$0xff] %v1258_v26  ;;  %v1174_v30 = vmax.f32 %v563_v27, 0.0  ;;  %v988_v31 = vadd.f32 %v3392_v1, %v987_v29 }
 0x1cd   :  { %v567_v32 = vpop.f32.mrf.mxu0  ;;  %v2107_v33 = vpop.f32.mrf.mxu1 }
 0x1ce   :  { %1343 = vst [vmem:[%s3851_s3 + $0x1d0] sm:$0xff] %v1174_v30  ;;  %v1259_v34 = vmax.f32 %v988_v31, 0.0  ;;  %v568_v35 = vadd.f32 %v3392_v1, %v567_v32 }
 0x1cf   :  { %v1855_v36 = vpop.f32.mrf.mxu0  ;;  %v992_v37 = vpop.f32.mrf.mxu1 }
 0x1d0   :  { %1428 = vst [vmem:[%s3851_s3 + $0x478] sm:$0xff] %v1259_v34  ;;  %v1175_v38 = vmax.f32 %v568_v35, 0.0  ;;  %v993_v0 = vadd.f32 %v3392_v1, %v992_v37 }
 0x1d1   :  { %v572_v39 = vpop.f32.mrf.mxu0  ;;  %v2110_v40 = vpop.f32.mrf.mxu1 }
 0x1d2   :  { %1344 = vst [vmem:[%s3851_s3 + $0x1d8] sm:$0xff] %v1175_v38  ;;  %v1260_v41 = vmax.f32 %v993_v0, 0.0  ;;  %v573_v42 = vadd.f32 %v3392_v1, %v572_v39 }
 0x1d3   :  { %v1858_v43 = vpop.f32.mrf.mxu0  ;;  %v997_v44 = vpop.f32.mrf.mxu1 }
 0x1d4   :  { %1429 = vst [vmem:[%s3851_s3 + $0x480] sm:$0xff] %v1260_v41  ;;  %v1176_v45 = vmax.f32 %v573_v42, 0.0  ;;  %v998_v46 = vadd.f32 %v3392_v1, %v997_v44 }
 0x1d5   :  { %v577_v47 = vpop.f32.mrf.mxu0  ;;  %v2113_v48 = vpop.f32.mrf.mxu1 }
 0x1d6   :  { %1345 = vst [vmem:[%s3851_s3 + $0x1e0] sm:$0xff] %v1176_v45  ;;  %v1261_v49 = vmax.f32 %v998_v46, 0.0  ;;  %v578_v50 = vadd.f32 %v3392_v1, %v577_v47 }
 0x1d7   :  { %v1861_v52 = vpop.f32.mrf.mxu0  ;;  %v1002_v53 = vpop.f32.mrf.mxu1 }
 0x1d8   :  { %1430 = vst [vmem:[%s3851_s3 + $0x488] sm:$0xff] %v1261_v49  ;;  %v1177_v54 = vmax.f32 %v578_v50, 0.0  ;;  %v1003_v55 = vadd.f32 %v3392_v1, %v1002_v53 }
 0x1d9   :  { %v582_v56 = vpop.f32.mrf.mxu0  ;;  %v2116_v57 = vpop.f32.mrf.mxu1 }
 0x1da   :  { %1346 = vst [vmem:[%s3851_s3 + $0x1e8] sm:$0xff] %v1177_v54  ;;  %v1262_v58 = vmax.f32 %v1003_v55, 0.0  ;;  %v583_v59 = vadd.f32 %v3392_v1, %v582_v56 }
 0x1db   :  { %v1864_v60 = vpop.f32.mrf.mxu0  ;;  %v1007_v61 = vpop.f32.mrf.mxu1 }
 0x1dc   :  { %1431 = vst [vmem:[%s3851_s3 + $0x490] sm:$0xff] %v1262_v58  ;;  %v1178_v62 = vmax.f32 %v583_v59, 0.0  ;;  %v1008_v63 = vadd.f32 %v3392_v1, %v1007_v61 }
 0x1dd   :  { %v587_v51 = vpop.f32.mrf.mxu0  ;;  %v2119_v2 = vpop.f32.mrf.mxu1 }
 0x1de   :  { %1347 = vst [vmem:[%s3851_s3 + $0x1f0] sm:$0xff] %v1178_v62  ;;  %v1263_v3 = vmax.f32 %v1008_v63, 0.0  ;;  %v588_v4 = vadd.f32 %v3392_v1, %v587_v51 }
 0x1df   :  { %v1867_v5 = vpop.f32.mrf.mxu0  ;;  %v1012_v6 = vpop.f32.mrf.mxu1 }
 0x1e0   :  { %1432 = vst [vmem:[%s3851_s3 + $0x498] sm:$0xff] %v1263_v3  ;;  %v1179_v7 = vmax.f32 %v588_v4, 0.0  ;;  %v1013_v8 = vadd.f32 %v3392_v1, %v1012_v6 }
 0x1e1   :  { %v592_v9 = vpop.f32.mrf.mxu0  ;;  %v2122_v10 = vpop.f32.mrf.mxu1 }
 0x1e2   :  { %1348 = vst [vmem:[%s3851_s3 + $0x1f8] sm:$0xff] %v1179_v7  ;;  %v1264_v11 = vmax.f32 %v1013_v8, 0.0  ;;  %v593_v12 = vadd.f32 %v3392_v1, %v592_v9 }
 0x1e3   :  { %v1870_v13 = vpop.f32.mrf.mxu0  ;;  %v1017_v14 = vpop.f32.mrf.mxu1 }
 0x1e4   :  { %1433 = vst [vmem:[%s3851_s3 + $0x4a0] sm:$0xff] %v1264_v11  ;;  %v1180_v15 = vmax.f32 %v593_v12, 0.0  ;;  %v1018_v16 = vadd.f32 %v3392_v1, %v1017_v14 }
 0x1e5   :  { %v597_v17 = vpop.f32.mrf.mxu0  ;;  %v2125_v18 = vpop.f32.mrf.mxu1 }
 0x1e6   :  { %1349 = vst [vmem:[%s3851_s3 + $0x200] sm:$0xff] %v1180_v15  ;;  %v1265_v19 = vmax.f32 %v1018_v16, 0.0  ;;  %v598_v20 = vadd.f32 %v3392_v1, %v597_v17 }
 0x1e7   :  { %v1873_v21 = vpop.f32.mrf.mxu0  ;;  %v1022_v22 = vpop.f32.mrf.mxu1 }
 0x1e8   :  { %1434 = vst [vmem:[%s3851_s3 + $0x4a8] sm:$0xff] %v1265_v19  ;;  %v1181_v23 = vmax.f32 %v598_v20, 0.0  ;;  %v1023_v24 = vadd.f32 %v3392_v1, %v1022_v22 }
 0x1e9   :  { %v602_v25 = vpop.f32.mrf.mxu0  ;;  %v2128_v26 = vpop.f32.mrf.mxu1 }
 0x1ea   :  { %1350 = vst [vmem:[%s3851_s3 + $0x208] sm:$0xff] %v1181_v23  ;;  %v1266_v27 = vmax.f32 %v1023_v24, 0.0  ;;  %v603_v28 = vadd.f32 %v3392_v1, %v602_v25 }
 0x1eb   :  { %v1876_v29 = vpop.f32.mrf.mxu0  ;;  %v1027_v30 = vpop.f32.mrf.mxu1 }
 0x1ec   :  { %1435 = vst [vmem:[%s3851_s3 + $0x4b0] sm:$0xff] %v1266_v27  ;;  %v1182_v31 = vmax.f32 %v603_v28, 0.0  ;;  %v1028_v32 = vadd.f32 %v3392_v1, %v1027_v30 }
 0x1ed   :  { %v607_v33 = vpop.f32.mrf.mxu0  ;;  %v2131_v34 = vpop.f32.mrf.mxu1 }
 0x1ee   :  { %1351 = vst [vmem:[%s3851_s3 + $0x210] sm:$0xff] %v1182_v31  ;;  %v1267_v35 = vmax.f32 %v1028_v32, 0.0  ;;  %v608_v36 = vadd.f32 %v3392_v1, %v607_v33 }
 0x1ef   :  { %v1879_v37 = vpop.f32.mrf.mxu0  ;;  %v1032_v38 = vpop.f32.mrf.mxu1 }
 0x1f0   :  { %1436 = vst [vmem:[%s3851_s3 + $0x4b8] sm:$0xff] %v1267_v35  ;;  %v1183_v0 = vmax.f32 %v608_v36, 0.0  ;;  %v1033_v39 = vadd.f32 %v3392_v1, %v1032_v38 }
 0x1f1   :  { %v612_v40 = vpop.f32.mrf.mxu0  ;;  %v2134_v41 = vpop.f32.mrf.mxu1 }
 0x1f2   :  { %1352 = vst [vmem:[%s3851_s3 + $0x218] sm:$0xff] %v1183_v0  ;;  %v1268_v42 = vmax.f32 %v1033_v39, 0.0  ;;  %v613_v43 = vadd.f32 %v3392_v1, %v612_v40 }
 0x1f3   :  { %v1882_v44 = vpop.f32.mrf.mxu0  ;;  %v1037_v45 = vpop.f32.mrf.mxu1 }
 0x1f4   :  { %1437 = vst [vmem:[%s3851_s3 + $0x4c0] sm:$0xff] %v1268_v42  ;;  %v1184_v46 = vmax.f32 %v613_v43, 0.0  ;;  %v1038_v47 = vadd.f32 %v3392_v1, %v1037_v45 }
 0x1f5   :  { %v617_v48 = vpop.f32.mrf.mxu0  ;;  %v2137_v49 = vpop.f32.mrf.mxu1 }
 0x1f6   :  { %1353 = vst [vmem:[%s3851_s3 + $0x220] sm:$0xff] %v1184_v46  ;;  %v1269_v50 = vmax.f32 %v1038_v47, 0.0  ;;  %v618_v52 = vadd.f32 %v3392_v1, %v617_v48 }
 0x1f7   :  { %v1885_v53 = vpop.f32.mrf.mxu0  ;;  %v1042_v54 = vpop.f32.mrf.mxu1 }
 0x1f8   :  { %1438 = vst [vmem:[%s3851_s3 + $0x4c8] sm:$0xff] %v1269_v50  ;;  %v1185_v55 = vmax.f32 %v618_v52, 0.0  ;;  %v1043_v56 = vadd.f32 %v3392_v1, %v1042_v54 }
 0x1f9   :  { %v622_v57 = vpop.f32.mrf.mxu0  ;;  %v2140_v58 = vpop.f32.mrf.mxu1 }
 0x1fa   :  { %1354 = vst [vmem:[%s3851_s3 + $0x228] sm:$0xff] %v1185_v55  ;;  %v1270_v59 = vmax.f32 %v1043_v56, 0.0  ;;  %v623_v60 = vadd.f32 %v3392_v1, %v622_v57 }
 0x1fb   :  { %v1888_v61 = vpop.f32.mrf.mxu0  ;;  %v1047_v62 = vpop.f32.mrf.mxu1 }
 0x1fc   :  { %1439 = vst [vmem:[%s3851_s3 + $0x4d0] sm:$0xff] %v1270_v59  ;;  %v1186_v63 = vmax.f32 %v623_v60, 0.0  ;;  %v1048_v51 = vadd.f32 %v3392_v1, %v1047_v62 }
 0x1fd   :  { %v627_v2 = vpop.f32.mrf.mxu0  ;;  %v2143_v3 = vpop.f32.mrf.mxu1 }
 0x1fe   :  { %1355 = vst [vmem:[%s3851_s3 + $0x230] sm:$0xff] %v1186_v63  ;;  %v1271_v4 = vmax.f32 %v1048_v51, 0.0  ;;  %v628_v5 = vadd.f32 %v3392_v1, %v627_v2 }
 0x1ff   :  { %v1891_v6 = vpop.f32.mrf.mxu0  ;;  %v1052_v7 = vpop.f32.mrf.mxu1 }
 0x200   :  { %1440 = vst [vmem:[%s3851_s3 + $0x4d8] sm:$0xff] %v1271_v4  ;;  %v1187_v8 = vmax.f32 %v628_v5, 0.0  ;;  %v1053_v9 = vadd.f32 %v3392_v1, %v1052_v7 }
 0x201   :  { %v632_v10 = vpop.f32.mrf.mxu0  ;;  %v2146_v11 = vpop.f32.mrf.mxu1 }
 0x202   :  { %1356 = vst [vmem:[%s3851_s3 + $0x238] sm:$0xff] %v1187_v8  ;;  %v1272_v12 = vmax.f32 %v1053_v9, 0.0  ;;  %v633_v13 = vadd.f32 %v3392_v1, %v632_v10 }
 0x203   :  { %v1894_v14 = vpop.f32.mrf.mxu0  ;;  %v1057_v15 = vpop.f32.mrf.mxu1 }
 0x204   :  { %1441 = vst [vmem:[%s3851_s3 + $0x4e0] sm:$0xff] %v1272_v12  ;;  %v1188_v16 = vmax.f32 %v633_v13, 0.0  ;;  %v1058_v17 = vadd.f32 %v3392_v1, %v1057_v15 }
 0x205   :  { %v637_v18 = vpop.f32.mrf.mxu0  ;;  %v2149_v19 = vpop.f32.mrf.mxu1 }
 0x206   :  { %1357 = vst [vmem:[%s3851_s3 + $0x240] sm:$0xff] %v1188_v16  ;;  %v1273_v20 = vmax.f32 %v1058_v17, 0.0  ;;  %v638_v21 = vadd.f32 %v3392_v1, %v637_v18 }
 0x207   :  { %v1897_v22 = vpop.f32.mrf.mxu0  ;;  %v1062_v23 = vpop.f32.mrf.mxu1 }
 0x208   :  { %1442 = vst [vmem:[%s3851_s3 + $0x4e8] sm:$0xff] %v1273_v20  ;;  %v1189_v24 = vmax.f32 %v638_v21, 0.0  ;;  %v1063_v25 = vadd.f32 %v3392_v1, %v1062_v23  ;;  %v2218_v22 = vld [vmem:[%s3850_s2] ss:$0 sm:$0xff] }
 0x209   :  { %v642_v26 = vpop.f32.mrf.mxu0  ;;  %v2152_v27 = vpop.f32.mrf.mxu1 }
 0x20a   :  { %1358 = vst [vmem:[%s3851_s3 + $0x248] sm:$0xff] %v1189_v24  ;;  %v1274_v28 = vmax.f32 %v1063_v25, 0.0  ;;  %v643_v29 = vadd.f32 %v3392_v1, %v642_v26 }
 0x20b   :  { %v1900_v30 = vpop.f32.mrf.mxu0  ;;  %v1067_v31 = vpop.f32.mrf.mxu1 }
 0x20c   :  { %1443 = vst [vmem:[%s3851_s3 + $0x4f0] sm:$0xff] %v1274_v28  ;;  %v1190_v32 = vmax.f32 %v643_v29, 0.0  ;;  %v1068_v33 = vadd.f32 %v3392_v1, %v1067_v31 }
 0x20d   :  { %v647_v34 = vpop.f32.mrf.mxu0  ;;  %v2155_v35 = vpop.f32.mrf.mxu1 }
 0x20e   :  { %1359 = vst [vmem:[%s3851_s3 + $0x250] sm:$0xff] %v1190_v32  ;;  %v1275_v36 = vmax.f32 %v1068_v33, 0.0  ;;  %v648_v37 = vadd.f32 %v3392_v1, %v647_v34 }
 0x20f   :  { %v1903_v38 = vpop.f32.mrf.mxu0  ;;  %v1072_v0 = vpop.f32.mrf.mxu1 }
 0x210   :  { %1444 = vst [vmem:[%s3851_s3 + $0x4f8] sm:$0xff] %v1275_v36  ;;  %v1191_v39 = vmax.f32 %v648_v37, 0.0  ;;  %v1073_v40 = vadd.f32 %v3392_v1, %v1072_v0 }
 0x211   :  { %v652_v41 = vpop.f32.mrf.mxu0  ;;  %v2158_v42 = vpop.f32.mrf.mxu1 }
 0x212   :  { %1360 = vst [vmem:[%s3851_s3 + $0x258] sm:$0xff] %v1191_v39  ;;  %v1276_v43 = vmax.f32 %v1073_v40, 0.0  ;;  %v653_v44 = vadd.f32 %v3392_v1, %v652_v41 }
 0x213   :  { %v1906_v45 = vpop.f32.mrf.mxu0  ;;  %v1077_v46 = vpop.f32.mrf.mxu1 }
 0x214   :  { %1445 = vst [vmem:[%s3851_s3 + $0x500] sm:$0xff] %v1276_v43  ;;  %v1192_v47 = vmax.f32 %v653_v44, 0.0  ;;  %v1078_v48 = vadd.f32 %v3392_v1, %v1077_v46 }
 0x215   :  { %v657_v49 = vpop.f32.mrf.mxu0  ;;  %v2161_v50 = vpop.f32.mrf.mxu1 }
 0x216   :  { %1361 = vst [vmem:[%s3851_s3 + $0x260] sm:$0xff] %v1192_v47  ;;  %v1277_v52 = vmax.f32 %v1078_v48, 0.0  ;;  %v658_v53 = vadd.f32 %v3392_v1, %v657_v49 }
 0x217   :  { %v1909_v54 = vpop.f32.mrf.mxu0  ;;  %v1082_v55 = vpop.f32.mrf.mxu1 }
 0x218   :  { %1446 = vst [vmem:[%s3851_s3 + $0x508] sm:$0xff] %v1277_v52  ;;  %v1193_v56 = vmax.f32 %v658_v53, 0.0  ;;  %v1083_v57 = vadd.f32 %v3392_v1, %v1082_v55 }
 0x219   :  { %v662_v58 = vpop.f32.mrf.mxu0  ;;  %v2164_v59 = vpop.f32.mrf.mxu1 }
 0x21a   :  { %1362 = vst [vmem:[%s3851_s3 + $0x268] sm:$0xff] %v1193_v56  ;;  %v1278_v60 = vmax.f32 %v1083_v57, 0.0  ;;  %v663_v61 = vadd.f32 %v3392_v1, %v662_v58 }
 0x21b   :  { %v1912_v62 = vpop.f32.mrf.mxu0  ;;  %v1087_v63 = vpop.f32.mrf.mxu1 }
 0x21c   :  { %1447 = vst [vmem:[%s3851_s3 + $0x510] sm:$0xff] %v1278_v60  ;;  %v1194_v51 = vmax.f32 %v663_v61, 0.0  ;;  %v1088_v2 = vadd.f32 %v3392_v1, %v1087_v63 }
 0x21d   :  { %v667_v3 = vpop.f32.mrf.mxu0  ;;  %v2167_v4 = vpop.f32.mrf.mxu1 }
 0x21e   :  { %1363 = vst [vmem:[%s3851_s3 + $0x270] sm:$0xff] %v1194_v51  ;;  %v1279_v5 = vmax.f32 %v1088_v2, 0.0  ;;  %v668_v6 = vadd.f32 %v3392_v1, %v667_v3 }
 0x21f   :  { %v1915_v7 = vpop.f32.mrf.mxu0  ;;  %v1092_v8 = vpop.f32.mrf.mxu1 }
 0x220   :  { %1448 = vst [vmem:[%s3851_s3 + $0x518] sm:$0xff] %v1279_v5  ;;  %v1195_v9 = vmax.f32 %v668_v6, 0.0  ;;  %v1093_v10 = vadd.f32 %v3392_v1, %v1092_v8 }
 0x221   :  { %v672_v11 = vpop.f32.mrf.mxu0  ;;  %v2170_v12 = vpop.f32.mrf.mxu1 }
 0x222   :  { %1364 = vst [vmem:[%s3851_s3 + $0x278] sm:$0xff] %v1195_v9  ;;  %v1280_v13 = vmax.f32 %v1093_v10, 0.0  ;;  %v673_v14 = vadd.f32 %v3392_v1, %v672_v11 }
 0x223   :  { %v1918_v15 = vpop.f32.mrf.mxu0  ;;  %v1097_v16 = vpop.f32.mrf.mxu1 }
 0x224   :  { %1449 = vst [vmem:[%s3851_s3 + $0x520] sm:$0xff] %v1280_v13  ;;  %v1196_v17 = vmax.f32 %v673_v14, 0.0  ;;  %v1098_v18 = vadd.f32 %v3392_v1, %v1097_v16 }
 0x225   :  { %v677_v19 = vpop.f32.mrf.mxu0  ;;  %v2173_v20 = vpop.f32.mrf.mxu1 }
 0x226   :  { %1365 = vst [vmem:[%s3851_s3 + $0x280] sm:$0xff] %v1196_v17  ;;  %v1281_v21 = vmax.f32 %v1098_v18, 0.0  ;;  %v678_v23 = vadd.f32 %v2218_v22, %v677_v19 }
 0x227   :  { %v1921_v24 = vpop.f32.mrf.mxu0  ;;  %v1102_v25 = vpop.f32.mrf.mxu1 }
 0x228   :  { %1450 = vst [vmem:[%s3851_s3 + $0x528] sm:$0xff] %v1281_v21  ;;  %v1197_v26 = vmax.f32 %v678_v23, 0.0  ;;  %v1103_v1 = vadd.f32 %v2218_v22, %v1102_v25 }
 0x229   :  { %v682_v27 = vpop.f32.mrf.mxu0  ;;  %v2176_v28 = vpop.f32.mrf.mxu1 }
 0x22a   :  { %1366 = vst [vmem:[%s3851_s3 + $0x288] sm:$0xff] %v1197_v26  ;;  %v1282_v29 = vmax.f32 %v1103_v1, 0.0  ;;  %v683_v30 = vadd.f32 %v2218_v22, %v682_v27 }
 0x22b   :  { %v1924_v31 = vpop.f32.mrf.mxu0  ;;  %v1107_v32 = vpop.f32.mrf.mxu1 }
 0x22c   :  { %1451 = vst [vmem:[%s3851_s3 + $0x530] sm:$0xff] %v1282_v29  ;;  %v1198_v33 = vmax.f32 %v683_v30, 0.0  ;;  %v1108_v34 = vadd.f32 %v2218_v22, %v1107_v32 }
 0x22d   :  { %v687_v35 = vpop.f32.mrf.mxu0  ;;  %v2179_v36 = vpop.f32.mrf.mxu1 }
 0x22e   :  { %1367 = vst [vmem:[%s3851_s3 + $0x290] sm:$0xff] %v1198_v33  ;;  %v1283_v37 = vmax.f32 %v1108_v34, 0.0  ;;  %v688_v38 = vadd.f32 %v2218_v22, %v687_v35 }
 0x22f   :  { %v1927_v0 = vpop.f32.mrf.mxu0  ;;  %v1112_v39 = vpop.f32.mrf.mxu1 }
 0x230   :  { %1452 = vst [vmem:[%s3851_s3 + $0x538] sm:$0xff] %v1283_v37  ;;  %v1199_v40 = vmax.f32 %v688_v38, 0.0  ;;  %v1113_v41 = vadd.f32 %v2218_v22, %v1112_v39 }
 0x231   :  { %v692_v42 = vpop.f32.mrf.mxu0  ;;  %v2182_v43 = vpop.f32.mrf.mxu1 }
 0x232   :  { %1368 = vst [vmem:[%s3851_s3 + $0x298] sm:$0xff] %v1199_v40  ;;  %v1284_v44 = vmax.f32 %v1113_v41, 0.0  ;;  %v693_v45 = vadd.f32 %v2218_v22, %v692_v42 }
 0x233   :  { %v1930_v46 = vpop.f32.mrf.mxu0 }
 0x234   :  { %1453 = vst [vmem:[%s3851_s3 + $0x540] sm:$0xff] %v1284_v44  ;;  %v1200_v47 = vmax.f32 %v693_v45, 0.0 }
 0x236   :  { %1369 = vst [vmem:[%s3851_s3 + $0x2a0] sm:$0xff] %v1200_v47 }

// kernel: forward.4
= control target key start
LH: loop header
LB: loop body
LE: loop exit
PB: predicated region body
PF: predicated region fallthrough
CT: control target
= control target key end

     0   :  { %v467_v0 = vmov 0.0   ;;  %s963_s1 = inlined_call_operand.vmem [shape: f32[256,128], index: 1, kind: input, shape index: {}]   ;;  %s964_s0 = inlined_call_operand.vmem [shape: f32[248,256], index: 0, kind: input, shape index: {}]   ;;  %s965_s2 = inlined_call_operand.vmem [shape: f32[1,128], index: 2, kind: input, shape index: {}]   ;;  %s966_s3 = inlined_call_operand.vmem [shape: f32[248,128], index: 3, kind: output, shape index: {}]  }
   0x1   :  { %115 = vmatprep.subr.mxu0 %v467_v0  ;;  %v91_v1 = vld [vmem:[%s963_s1 + $0x78] sm:$0xff]  ;;  %402 = vmatprep.subr.mxu1 %v467_v0  ;;  %v90_v2 = vld [vmem:[%s963_s1 + $0x70] sm:$0xff]  ;;  %v89_v3 = vld [vmem:[%s963_s1 + $0x68] sm:$0xff] }
   0x2   :  { %116 = vmatpush1.msra.mxu0 %v91_v1  ;;  %434 = vmatpush1.msra.mxu1 %v91_v1  ;;  %v88_v4 = vld [vmem:[%s963_s1 + $0x60] sm:$0xff]  ;;  %v87_v5 = vld [vmem:[%s963_s1 + $0x58] sm:$0xff]  ;;  %v86_v6 = vld [vmem:[%s963_s1 + $0x50] sm:$0xff] }
   0x3   :  { %117 = vmatprep.subr.mxu0 %v467_v0  ;;  %403 = vmatprep.subr.mxu1 %v467_v0  ;;  %v85_v7 = vld [vmem:[%s963_s1 + $0x48] sm:$0xff]  ;;  %v84_v8 = vld [vmem:[%s963_s1 + $0x40] sm:$0xff]  ;;  %v83_v9 = vld [vmem:[%s963_s1 + $0x38] sm:$0xff] }
   0x4   :  { %118 = vmatpush1.msra.mxu0 %v90_v2  ;;  %435 = vmatpush1.msra.mxu1 %v90_v2  ;;  %v82_v10 = vld [vmem:[%s963_s1 + $0x30] sm:$0xff]  ;;  %v81_v11 = vld [vmem:[%s963_s1 + $0x28] sm:$0xff]  ;;  %v80_v12 = vld [vmem:[%s963_s1 + $0x20] sm:$0xff] }
   0x5   :  { %119 = vmatprep.subr.mxu0 %v467_v0  ;;  %404 = vmatprep.subr.mxu1 %v467_v0  ;;  %v79_v13 = vld [vmem:[%s963_s1 + $0x18] sm:$0xff]  ;;  %v78_v14 = vld [vmem:[%s963_s1 + $0x10] sm:$0xff]  ;;  %v77_v15 = vld [vmem:[%s963_s1 + $0x8] sm:$0xff] }
   0x6   :  { %120 = vmatpush1.msra.mxu0 %v89_v3  ;;  %436 = vmatpush1.msra.mxu1 %v89_v3  ;;  %v76_v16 = vld [vmem:[%s963_s1] sm:$0xff]  ;;  %v107_v17 = vld [vmem:[%s963_s1 + $0xf8] sm:$0xff]  ;;  %v106_v18 = vld [vmem:[%s963_s1 + $0xf0] sm:$0xff] }
   0x7   :  { %121 = vmatprep.subr.mxu0 %v467_v0  ;;  %405 = vmatprep.subr.mxu1 %v467_v0  ;;  %v105_v19 = vld [vmem:[%s963_s1 + $0xe8] sm:$0xff]  ;;  %v104_v20 = vld [vmem:[%s963_s1 + $0xe0] sm:$0xff]  ;;  %v103_v21 = vld [vmem:[%s963_s1 + $0xd8] sm:$0xff] }
   0x8   :  { %122 = vmatpush1.msra.mxu0 %v88_v4  ;;  %437 = vmatpush1.msra.mxu1 %v88_v4  ;;  %v102_v22 = vld [vmem:[%s963_s1 + $0xd0] sm:$0xff]  ;;  %v101_v23 = vld [vmem:[%s963_s1 + $0xc8] sm:$0xff]  ;;  %v100_v24 = vld [vmem:[%s963_s1 + $0xc0] sm:$0xff] }
   0x9   :  { %123 = vmatprep.subr.mxu0 %v467_v0  ;;  %406 = vmatprep.subr.mxu1 %v467_v0  ;;  %v99_v25 = vld [vmem:[%s963_s1 + $0xb8] sm:$0xff]  ;;  %v98_v26 = vld [vmem:[%s963_s1 + $0xb0] sm:$0xff]  ;;  %v97_v27 = vld [vmem:[%s963_s1 + $0xa8] sm:$0xff] }
   0xa   :  { %124 = vmatpush1.msra.mxu0 %v87_v5  ;;  %438 = vmatpush1.msra.mxu1 %v87_v5  ;;  %v96_v28 = vld [vmem:[%s963_s1 + $0xa0] sm:$0xff]  ;;  %v95_v29 = vld [vmem:[%s963_s1 + $0x98] sm:$0xff]  ;;  %v94_v30 = vld [vmem:[%s963_s1 + $0x90] sm:$0xff] }
   0xb   :  { %125 = vmatprep.subr.mxu0 %v467_v0  ;;  %407 = vmatprep.subr.mxu1 %v467_v0  ;;  %v93_v31 = vld [vmem:[%s963_s1 + $0x88] sm:$0xff]  ;;  %v92_v33 = vld [vmem:[%s963_s1 + $0x80] sm:$0xff]  ;;  %v17_v36 = vld [vmem:[%s964_s0 + $0x18] sm:$0xff] }
   0xc   :  { %126 = vmatpush1.msra.mxu0 %v86_v6  ;;  %439 = vmatpush1.msra.mxu1 %v86_v6  ;;  %v15_v32 = vld [vmem:[%s964_s0 + $0x8] sm:$0xff]  ;;  %v14_v34 = vld [vmem:[%s964_s0] sm:$0xff]  ;;  %v49_v38 = vld [vmem:[%s964_s0 + $0x118] sm:$0xff] }
   0xd   :  { %127 = vmatprep.subr.mxu0 %v467_v0  ;;  %408 = vmatprep.subr.mxu1 %v467_v0  ;;  %v47_v35 = vld [vmem:[%s964_s0 + $0x108] sm:$0xff]  ;;  %v46_v37 = vld [vmem:[%s964_s0 + $0x100] sm:$0xff]  ;;  %v16_v39 = vld [vmem:[%s964_s0 + $0x10] sm:$0xff] }
   0xe   :  { %128 = vmatpush1.msra.mxu0 %v85_v7  ;;  %440 = vmatpush1.msra.mxu1 %v85_v7  ;;  %v19_v40 = vld [vmem:[%s964_s0 + $0x28] sm:$0xff]  ;;  %v48_v41 = vld [vmem:[%s964_s0 + $0x110] sm:$0xff]  ;;  %v18_v43 = vld [vmem:[%s964_s0 + $0x20] sm:$0xff] }
   0xf   :  { %129 = vmatprep.subr.mxu0 %v467_v0  ;;  %409 = vmatprep.subr.mxu1 %v467_v0  ;;  %v51_v42 = vld [vmem:[%s964_s0 + $0x128] sm:$0xff]  ;;  %v21_v44 = vld [vmem:[%s964_s0 + $0x38] sm:$0xff]  ;;  %v50_v45 = vld [vmem:[%s964_s0 + $0x120] sm:$0xff] }
  0x10   :  { %130 = vmatpush1.msra.mxu0 %v84_v8  ;;  %441 = vmatpush1.msra.mxu1 %v84_v8  ;;  %v53_v46 = vld [vmem:[%s964_s0 + $0x138] sm:$0xff]  ;;  %v20_v47 = vld [vmem:[%s964_s0 + $0x30] sm:$0xff]  ;;  %v23_v48 = vld [vmem:[%s964_s0 + $0x48] sm:$0xff] }
  0x11   :  { %131 = vmatprep.subr.mxu0 %v467_v0  ;;  %410 = vmatprep.subr.mxu1 %v467_v0  ;;  %v52_v49 = vld [vmem:[%s964_s0 + $0x130] sm:$0xff]  ;;  %v55_v50 = vld [vmem:[%s964_s0 + $0x148] sm:$0xff]  ;;  %v22_v51 = vld [vmem:[%s964_s0 + $0x40] sm:$0xff] }
  0x12   :  { %132 = vmatpush1.msra.mxu0 %v83_v9  ;;  %442 = vmatpush1.msra.mxu1 %v83_v9  ;;  %v25_v52 = vld [vmem:[%s964_s0 + $0x58] sm:$0xff]  ;;  %v54_v53 = vld [vmem:[%s964_s0 + $0x140] sm:$0xff]  ;;  %v24_v55 = vld [vmem:[%s964_s0 + $0x50] sm:$0xff] }
  0x13   :  { %133 = vmatprep.subr.mxu0 %v467_v0  ;;  %411 = vmatprep.subr.mxu1 %v467_v0  ;;  %v57_v54 = vld [vmem:[%s964_s0 + $0x158] sm:$0xff]  ;;  %v27_v56 = vld [vmem:[%s964_s0 + $0x68] sm:$0xff]  ;;  %v56_v57 = vld [vmem:[%s964_s0 + $0x150] sm:$0xff] }
  0x14   :  { %134 = vmatpush1.msra.mxu0 %v82_v10  ;;  %443 = vmatpush1.msra.mxu1 %v82_v10  ;;  %v59_v58 = vld [vmem:[%s964_s0 + $0x168] sm:$0xff]  ;;  %v26_v59 = vld [vmem:[%s964_s0 + $0x60] sm:$0xff]  ;;  %v29_v60 = vld [vmem:[%s964_s0 + $0x78] sm:$0xff] }
  0x15   :  { %135 = vmatprep.subr.mxu0 %v467_v0  ;;  %412 = vmatprep.subr.mxu1 %v467_v0  ;;  %v58_v61 = vld [vmem:[%s964_s0 + $0x160] sm:$0xff]  ;;  %v61_v62 = vld [vmem:[%s964_s0 + $0x178] sm:$0xff]  ;;  %v28_v63 = vld [vmem:[%s964_s0 + $0x70] sm:$0xff] }
  0x16   :  { %136 = vmatpush1.msra.mxu0 %v81_v11  ;;  %444 = vmatpush1.msra.mxu1 %v81_v11  ;;  %v60_v1 = vld [vmem:[%s964_s0 + $0x170] sm:$0xff]  ;;  %v63_v2 = vld [vmem:[%s964_s0 + $0x188] sm:$0xff]  ;;  %v30_v3 = vld [vmem:[%s964_s0 + $0x80] sm:$0xff] }
  0x17   :  { %137 = vmatprep.subr.mxu0 %v467_v0  ;;  %413 = vmatprep.subr.mxu1 %v467_v0  ;;  %v33_v4 = vld [vmem:[%s964_s0 + $0x98] sm:$0xff]  ;;  %v62_v5 = vld [vmem:[%s964_s0 + $0x180] sm:$0xff]  ;;  %v32_v7 = vld [vmem:[%s964_s0 + $0x90] sm:$0xff] }
  0x18   :  { %138 = vmatpush1.msra.mxu0 %v80_v12  ;;  %445 = vmatpush1.msra.mxu1 %v80_v12  ;;  %v65_v6 = vld [vmem:[%s964_s0 + $0x198] sm:$0xff]  ;;  %v35_v8 = vld [vmem:[%s964_s0 + $0xa8] sm:$0xff]  ;;  %v64_v9 = vld [vmem:[%s964_s0 + $0x190] sm:$0xff] }
  0x19   :  { %139 = vmatprep.subr.mxu0 %v467_v0  ;;  %414 = vmatprep.subr.mxu1 %v467_v0  ;;  %v67_v10 = vld [vmem:[%s964_s0 + $0x1a8] sm:$0xff]  ;;  %v34_v11 = vld [vmem:[%s964_s0 + $0xa0] sm:$0xff]  ;;  %v37_v12 = vld [vmem:[%s964_s0 + $0xb8] sm:$0xff] }
  0x1a   :  { %140 = vmatpush1.msra.mxu0 %v79_v13  ;;  %446 = vmatpush1.msra.mxu1 %v79_v13  ;;  %v66_v13 = vld [vmem:[%s964_s0 + $0x1a0] sm:$0xff] }
  0x1b   :  { %141 = vmatprep.subr.mxu0 %v467_v0  ;;  %415 = vmatprep.subr.mxu1 %v467_v0 }
  0x1c   :  { %142 = vmatpush1.msra.mxu0 %v78_v14  ;;  %447 = vmatpush1.msra.mxu1 %v78_v14  ;;  %v69_v14 = vld [vmem:[%s964_s0 + $0x1b8] sm:$0xff] }
  0x1d   :  { %143 = vmatprep.subr.mxu0 %v467_v0  ;;  %416 = vmatprep.subr.mxu1 %v467_v0 }
  0x1e   :  { %144 = vmatpush1.msra.mxu0 %v77_v15  ;;  %448 = vmatpush1.msra.mxu1 %v77_v15  ;;  %v36_v15 = vld [vmem:[%s964_s0 + $0xb0] sm:$0xff] }
  0x1f   :  { %145 = vmatprep.subr.mxu0 %v467_v0  ;;  %417 = vmatprep.subr.mxu1 %v467_v0 }
  0x20   :  { %146 = vmatpush1.msra.mxu0 %v76_v16  ;;  %449 = vmatpush1.msra.mxu1 %v76_v16  ;;  %v39_v16 = vld [vmem:[%s964_s0 + $0xc8] sm:$0xff] }
  0x21   :  { %147 = vmatprep.subr.mxu0 %v467_v0  ;;  %418 = vmatprep.subr.mxu1 %v467_v0 }
  0x22   :  { %148 = vmatpush2.msra.mxu0 %v107_v17  ;;  %450 = vmatpush2.msra.mxu1 %v107_v17  ;;  %v68_v17 = vld [vmem:[%s964_s0 + $0x1b0] sm:$0xff] }
  0x23   :  { %149 = vmatprep.subr.mxu0 %v467_v0  ;;  %419 = vmatprep.subr.mxu1 %v467_v0 }
  0x24   :  { %150 = vmatpush2.msra.mxu0 %v106_v18  ;;  %451 = vmatpush2.msra.mxu1 %v106_v18  ;;  %v71_v18 = vld [vmem:[%s964_s0 + $0x1c8] sm:$0xff] }
  0x25   :  { %151 = vmatprep.subr.mxu0 %v467_v0  ;;  %420 = vmatprep.subr.mxu1 %v467_v0 }
  0x26   :  { %152 = vmatpush2.msra.mxu0 %v105_v19  ;;  %452 = vmatpush2.msra.mxu1 %v105_v19  ;;  %v38_v19 = vld [vmem:[%s964_s0 + $0xc0] sm:$0xff] }
  0x27   :  { %153 = vmatprep.subr.mxu0 %v467_v0  ;;  %421 = vmatprep.subr.mxu1 %v467_v0 }
  0x28   :  { %154 = vmatpush2.msra.mxu0 %v104_v20  ;;  %453 = vmatpush2.msra.mxu1 %v104_v20  ;;  %v41_v20 = vld [vmem:[%s964_s0 + $0xd8] sm:$0xff] }
  0x29   :  { %155 = vmatprep.subr.mxu0 %v467_v0  ;;  %422 = vmatprep.subr.mxu1 %v467_v0 }
  0x2a   :  { %156 = vmatpush2.msra.mxu0 %v103_v21  ;;  %454 = vmatpush2.msra.mxu1 %v103_v21  ;;  %v70_v21 = vld [vmem:[%s964_s0 + $0x1c0] sm:$0xff] }
  0x2b   :  { %157 = vmatprep.subr.mxu0 %v467_v0  ;;  %423 = vmatprep.subr.mxu1 %v467_v0 }
  0x2c   :  { %158 = vmatpush2.msra.mxu0 %v102_v22  ;;  %455 = vmatpush2.msra.mxu1 %v102_v22  ;;  %v73_v22 = vld [vmem:[%s964_s0 + $0x1d8] sm:$0xff] }
  0x2d   :  { %159 = vmatprep.subr.mxu0 %v467_v0  ;;  %424 = vmatprep.subr.mxu1 %v467_v0 }
  0x2e   :  { %160 = vmatpush2.msra.mxu0 %v101_v23  ;;  %456 = vmatpush2.msra.mxu1 %v101_v23  ;;  %v40_v23 = vld [vmem:[%s964_s0 + $0xd0] sm:$0xff] }
  0x2f   :  { %161 = vmatprep.subr.mxu0 %v467_v0  ;;  %425 = vmatprep.subr.mxu1 %v467_v0 }
  0x30   :  { %162 = vmatpush2.msra.mxu0 %v100_v24  ;;  %457 = vmatpush2.msra.mxu1 %v100_v24  ;;  %v43_v24 = vld [vmem:[%s964_s0 + $0xe8] sm:$0xff] }
  0x31   :  { %163 = vmatprep.subr.mxu0 %v467_v0  ;;  %426 = vmatprep.subr.mxu1 %v467_v0 }
  0x32   :  { %164 = vmatpush2.msra.mxu0 %v99_v25  ;;  %458 = vmatpush2.msra.mxu1 %v99_v25  ;;  %v72_v25 = vld [vmem:[%s964_s0 + $0x1d0] sm:$0xff] }
  0x33   :  { %165 = vmatprep.subr.mxu0 %v467_v0  ;;  %427 = vmatprep.subr.mxu1 %v467_v0 }
  0x34   :  { %166 = vmatpush2.msra.mxu0 %v98_v26  ;;  %459 = vmatpush2.msra.mxu1 %v98_v26  ;;  %v75_v26 = vld [vmem:[%s964_s0 + $0x1e8] sm:$0xff] }
  0x35   :  { %167 = vmatprep.subr.mxu0 %v467_v0  ;;  %428 = vmatprep.subr.mxu1 %v467_v0 }
  0x36   :  { %168 = vmatpush2.msra.mxu0 %v97_v27  ;;  %460 = vmatpush2.msra.mxu1 %v97_v27  ;;  %v42_v27 = vld [vmem:[%s964_s0 + $0xe0] sm:$0xff] }
  0x37   :  { %169 = vmatprep.subr.mxu0 %v467_v0  ;;  %429 = vmatprep.subr.mxu1 %v467_v0 }
  0x38   :  { %170 = vmatpush2.msra.mxu0 %v96_v28  ;;  %461 = vmatpush2.msra.mxu1 %v96_v28  ;;  %v45_v28 = vld [vmem:[%s964_s0 + $0xf8] sm:$0xff] }
  0x39   :  { %171 = vmatprep.subr.mxu0 %v467_v0  ;;  %430 = vmatprep.subr.mxu1 %v467_v0 }
  0x3a   :  { %172 = vmatpush2.msra.mxu0 %v95_v29  ;;  %462 = vmatpush2.msra.mxu1 %v95_v29  ;;  %v74_v29 = vld [vmem:[%s964_s0 + $0x1e0] sm:$0xff] }
  0x3b   :  { %173 = vmatprep.subr.mxu0 %v467_v0  ;;  %431 = vmatprep.subr.mxu1 %v467_v0 }
  0x3c   :  { %174 = vmatpush2.msra.mxu0 %v94_v30  ;;  %463 = vmatpush2.msra.mxu1 %v94_v30  ;;  %v44_v30 = vld [vmem:[%s964_s0 + $0xf0] sm:$0xff] }
  0x3d   :  { %175 = vmatprep.subr.mxu0 %v467_v0  ;;  %432 = vmatprep.subr.mxu1 %v467_v0 }
  0x3e   :  { %176 = vmatpush2.msra.mxu0 %v93_v31  ;;  %464 = vmatpush2.msra.mxu1 %v93_v31  ;;  %v837_v31 = vld [vmem:[%s965_s2] ss:$0 sm:$0xff] }
  0x3f   :  { %177 = vmatprep.subr.mxu0 %v467_v0  ;;  %179 = vmatprep.mubr.f32.mxu0 %v15_v32 }
  0x40   :  { %178 = vmatpush2.msra.mxu0 %v92_v33  ;;  %433 = vmatprep.subr.mxu1 %v467_v0  ;;  %v31_v0 = vld [vmem:[%s964_s0 + $0x88] sm:$0xff] }
  0x41   :  { %180 = vmatmul.mubr.f32.vlgmr.msra.gmra.mxu0 %v14_v34  ;;  %465 = vmatpush2.msra.mxu1 %v92_v33 }
  0x42   :  { %259 = vmatprep.mubr.f32.mxu1 %v47_v35  ;;  %184 = vmatprep.mubr.f32.mxu0 %v17_v36 }
  0x43   :  { %260 = vmatmul.mubr.f32.vlgmr.msra.gmra.mxu1 %v46_v37 }
  0x44   :  { %264 = vmatprep.mubr.f32.mxu1 %v49_v38 }
  0x45   :  { %185 = vmatmul.mubr.f32.gmra.mxu0 %v16_v39 }
  0x46   :  { %189 = vmatprep.mubr.f32.mxu0 %v19_v40 }
  0x47   :  { %265 = vmatmul.mubr.f32.gmra.mxu1 %v48_v41 }
  0x48   :  { %269 = vmatprep.mubr.f32.mxu1 %v51_v42 }
  0x49   :  { %190 = vmatmul.mubr.f32.gmra.mxu0 %v18_v43 }
  0x4a   :  { %194 = vmatprep.mubr.f32.mxu0 %v21_v44 }
  0x4b   :  { %270 = vmatmul.mubr.f32.gmra.mxu1 %v50_v45 }
  0x4c   :  { %274 = vmatprep.mubr.f32.mxu1 %v53_v46 }
  0x4d   :  { %195 = vmatmul.mubr.f32.gmra.mxu0 %v20_v47 }
  0x4e   :  { %199 = vmatprep.mubr.f32.mxu0 %v23_v48 }
  0x4f   :  { %275 = vmatmul.mubr.f32.gmra.mxu1 %v52_v49 }
  0x50   :  { %279 = vmatprep.mubr.f32.mxu1 %v55_v50 }
  0x51   :  { %200 = vmatmul.mubr.f32.gmra.mxu0 %v22_v51 }
  0x52   :  { %204 = vmatprep.mubr.f32.mxu0 %v25_v52 }
  0x53   :  { %280 = vmatmul.mubr.f32.gmra.mxu1 %v54_v53 }
  0x54   :  { %284 = vmatprep.mubr.f32.mxu1 %v57_v54 }
  0x55   :  { %205 = vmatmul.mubr.f32.gmra.mxu0 %v24_v55 }
  0x56   :  { %209 = vmatprep.mubr.f32.mxu0 %v27_v56 }
  0x57   :  { %285 = vmatmul.mubr.f32.gmra.mxu1 %v56_v57 }
  0x58   :  { %289 = vmatprep.mubr.f32.mxu1 %v59_v58 }
  0x59   :  { %210 = vmatmul.mubr.f32.gmra.mxu0 %v26_v59 }
  0x5a   :  { %214 = vmatprep.mubr.f32.mxu0 %v29_v60 }
  0x5b   :  { %290 = vmatmul.mubr.f32.gmra.mxu1 %v58_v61 }
  0x5c   :  { %294 = vmatprep.mubr.f32.mxu1 %v61_v62 }
  0x5d   :  { %215 = vmatmul.mubr.f32.gmra.mxu0 %v28_v63 }
  0x5e   :  { %219 = vmatprep.mubr.f32.mxu0 %v31_v0 }
  0x5f   :  { %295 = vmatmul.mubr.f32.gmra.mxu1 %v60_v1 }
  0x60   :  { %299 = vmatprep.mubr.f32.mxu1 %v63_v2 }
  0x61   :  { %220 = vmatmul.mubr.f32.gmra.mxu0 %v30_v3 }
  0x62   :  { %224 = vmatprep.mubr.f32.mxu0 %v33_v4 }
  0x63   :  { %300 = vmatmul.mubr.f32.gmra.mxu1 %v62_v5 }
  0x64   :  { %304 = vmatprep.mubr.f32.mxu1 %v65_v6 }
  0x65   :  { %225 = vmatmul.mubr.f32.gmra.mxu0 %v32_v7 }
  0x66   :  { %229 = vmatprep.mubr.f32.mxu0 %v35_v8 }
  0x67   :  { %305 = vmatmul.mubr.f32.gmra.mxu1 %v64_v9 }
  0x68   :  { %309 = vmatprep.mubr.f32.mxu1 %v67_v10 }
  0x69   :  { %230 = vmatmul.mubr.f32.gmra.mxu0 %v34_v11 }
  0x6a   :  { %234 = vmatprep.mubr.f32.mxu0 %v37_v12 }
  0x6b   :  { %310 = vmatmul.mubr.f32.gmra.mxu1 %v66_v13 }
  0x6c   :  { %314 = vmatprep.mubr.f32.mxu1 %v69_v14 }
  0x6d   :  { %235 = vmatmul.mubr.f32.gmra.mxu0 %v36_v15 }
  0x6e   :  { %239 = vmatprep.mubr.f32.mxu0 %v39_v16 }
  0x6f   :  { %315 = vmatmul.mubr.f32.gmra.mxu1 %v68_v17 }
  0x70   :  { %319 = vmatprep.mubr.f32.mxu1 %v71_v18 }
  0x71   :  { %240 = vmatmul.mubr.f32.gmra.mxu0 %v38_v19 }
  0x72   :  { %244 = vmatprep.mubr.f32.mxu0 %v41_v20 }
  0x73   :  { %320 = vmatmul.mubr.f32.gmra.mxu1 %v70_v21 }
  0x74   :  { %324 = vmatprep.mubr.f32.mxu1 %v73_v22 }
  0x75   :  { %245 = vmatmul.mubr.f32.gmra.mxu0 %v40_v23 }
  0x76   :  { %249 = vmatprep.mubr.f32.mxu0 %v43_v24 }
  0x77   :  { %325 = vmatmul.mubr.f32.gmra.mxu1 %v72_v25 }
  0x78   :  { %329 = vmatprep.mubr.f32.mxu1 %v75_v26 }
  0x79   :  { %250 = vmatmul.mubr.f32.gmra.mxu0 %v42_v27 }
  0x7a   :  { %254 = vmatprep.mubr.f32.mxu0 %v45_v28 }
  0x7b   :  { %330 = vmatmul.mubr.f32.gmra.mxu1 %v74_v29 }
  0x7d   :  { %255 = vmatmul.mubr.f32.gmra.mxu0 %v44_v30 }
 0x101   :  { %v181_v32 = vpop.f32.mrf.mxu0 }
 0x102   :  { %v182_v33 = vadd.f32 %v837_v31, %v181_v32 }
 0x103   :  { %v183_v34 = vpop.f32.mrf.mxu0  ;;  %v261_v35 = vpop.f32.mrf.mxu1 }
 0x104   :  { %v335_v36 = vmax.f32 %v182_v33, 0.0  ;;  %v262_v37 = vadd.f32 %v837_v31, %v261_v35 }
 0x105   :  { %v186_v38 = vpop.f32.mrf.mxu0  ;;  %v263_v39 = vpop.f32.mrf.mxu1 }
 0x106   :  { %366 = vst [vmem:[%s966_s3] sm:$0xff] %v335_v36  ;;  %v351_v40 = vmax.f32 %v262_v37, 0.0  ;;  %v187_v41 = vadd.f32 %v837_v31, %v186_v38 }
 0x107   :  { %v188_v42 = vpop.f32.mrf.mxu0  ;;  %v266_v43 = vpop.f32.mrf.mxu1 }
 0x108   :  { %382 = vst [vmem:[%s966_s3 + $0x80] sm:$0xff] %v351_v40  ;;  %v336_v44 = vmax.f32 %v187_v41, 0.0  ;;  %v267_v45 = vadd.f32 %v837_v31, %v266_v43 }
 0x109   :  { %v191_v46 = vpop.f32.mrf.mxu0  ;;  %v268_v47 = vpop.f32.mrf.mxu1 }
 0x10a   :  { %367 = vst [vmem:[%s966_s3 + $0x8] sm:$0xff] %v336_v44  ;;  %v352_v48 = vmax.f32 %v267_v45, 0.0  ;;  %v192_v49 = vadd.f32 %v837_v31, %v191_v46 }
 0x10b   :  { %v193_v50 = vpop.f32.mrf.mxu0  ;;  %v271_v51 = vpop.f32.mrf.mxu1 }
 0x10c   :  { %383 = vst [vmem:[%s966_s3 + $0x88] sm:$0xff] %v352_v48  ;;  %v337_v52 = vmax.f32 %v192_v49, 0.0  ;;  %v272_v53 = vadd.f32 %v837_v31, %v271_v51 }
 0x10d   :  { %v196_v54 = vpop.f32.mrf.mxu0  ;;  %v273_v55 = vpop.f32.mrf.mxu1 }
 0x10e   :  { %368 = vst [vmem:[%s966_s3 + $0x10] sm:$0xff] %v337_v52  ;;  %v353_v56 = vmax.f32 %v272_v53, 0.0  ;;  %v197_v57 = vadd.f32 %v837_v31, %v196_v54 }
 0x10f   :  { %v198_v58 = vpop.f32.mrf.mxu0  ;;  %v276_v59 = vpop.f32.mrf.mxu1 }
 0x110   :  { %384 = vst [vmem:[%s966_s3 + $0x90] sm:$0xff] %v353_v56  ;;  %v338_v60 = vmax.f32 %v197_v57, 0.0  ;;  %v277_v61 = vadd.f32 %v837_v31, %v276_v59 }
 0x111   :  { %v201_v62 = vpop.f32.mrf.mxu0  ;;  %v278_v63 = vpop.f32.mrf.mxu1 }
 0x112   :  { %369 = vst [vmem:[%s966_s3 + $0x18] sm:$0xff] %v338_v60  ;;  %v354_v0 = vmax.f32 %v277_v61, 0.0  ;;  %v202_v1 = vadd.f32 %v837_v31, %v201_v62 }
 0x113   :  { %v203_v2 = vpop.f32.mrf.mxu0  ;;  %v281_v3 = vpop.f32.mrf.mxu1 }
 0x114   :  { %385 = vst [vmem:[%s966_s3 + $0x98] sm:$0xff] %v354_v0  ;;  %v339_v4 = vmax.f32 %v202_v1, 0.0  ;;  %v282_v5 = vadd.f32 %v837_v31, %v281_v3 }
 0x115   :  { %v206_v6 = vpop.f32.mrf.mxu0  ;;  %v283_v7 = vpop.f32.mrf.mxu1 }
 0x116   :  { %370 = vst [vmem:[%s966_s3 + $0x20] sm:$0xff] %v339_v4  ;;  %v355_v8 = vmax.f32 %v282_v5, 0.0  ;;  %v207_v9 = vadd.f32 %v837_v31, %v206_v6 }
 0x117   :  { %v208_v10 = vpop.f32.mrf.mxu0  ;;  %v286_v11 = vpop.f32.mrf.mxu1 }
 0x118   :  { %386 = vst [vmem:[%s966_s3 + $0xa0] sm:$0xff] %v355_v8  ;;  %v340_v12 = vmax.f32 %v207_v9, 0.0  ;;  %v287_v13 = vadd.f32 %v837_v31, %v286_v11 }
 0x119   :  { %v211_v14 = vpop.f32.mrf.mxu0  ;;  %v288_v15 = vpop.f32.mrf.mxu1 }
 0x11a   :  { %371 = vst [vmem:[%s966_s3 + $0x28] sm:$0xff] %v340_v12  ;;  %v356_v16 = vmax.f32 %v287_v13, 0.0  ;;  %v212_v17 = vadd.f32 %v837_v31, %v211_v14 }
 0x11b   :  { %v213_v18 = vpop.f32.mrf.mxu0  ;;  %v291_v19 = vpop.f32.mrf.mxu1 }
 0x11c   :  { %387 = vst [vmem:[%s966_s3 + $0xa8] sm:$0xff] %v356_v16  ;;  %v341_v20 = vmax.f32 %v212_v17, 0.0  ;;  %v292_v21 = vadd.f32 %v837_v31, %v291_v19 }
 0x11d   :  { %v216_v22 = vpop.f32.mrf.mxu0  ;;  %v293_v23 = vpop.f32.mrf.mxu1 }
 0x11e   :  { %372 = vst [vmem:[%s966_s3 + $0x30] sm:$0xff] %v341_v20  ;;  %v357_v24 = vmax.f32 %v292_v21, 0.0  ;;  %v217_v25 = vadd.f32 %v837_v31, %v216_v22 }
 0x11f   :  { %v218_v26 = vpop.f32.mrf.mxu0  ;;  %v296_v27 = vpop.f32.mrf.mxu1 }
 0x120   :  { %388 = vst [vmem:[%s966_s3 + $0xb0] sm:$0xff] %v357_v24  ;;  %v342_v28 = vmax.f32 %v217_v25, 0.0  ;;  %v297_v29 = vadd.f32 %v837_v31, %v296_v27 }
 0x121   :  { %v221_v30 = vpop.f32.mrf.mxu0  ;;  %v298_v32 = vpop.f32.mrf.mxu1 }
 0x122   :  { %373 = vst [vmem:[%s966_s3 + $0x38] sm:$0xff] %v342_v28  ;;  %v358_v33 = vmax.f32 %v297_v29, 0.0  ;;  %v222_v34 = vadd.f32 %v837_v31, %v221_v30 }
 0x123   :  { %v223_v35 = vpop.f32.mrf.mxu0  ;;  %v301_v36 = vpop.f32.mrf.mxu1 }
 0x124   :  { %389 = vst [vmem:[%s966_s3 + $0xb8] sm:$0xff] %v358_v33  ;;  %v343_v37 = vmax.f32 %v222_v34, 0.0  ;;  %v302_v38 = vadd.f32 %v837_v31, %v301_v36 }
 0x125   :  { %v226_v39 = vpop.f32.mrf.mxu0  ;;  %v303_v40 = vpop.f32.mrf.mxu1 }
 0x126   :  { %374 = vst [vmem:[%s966_s3 + $0x40] sm:$0xff] %v343_v37  ;;  %v359_v41 = vmax.f32 %v302_v38, 0.0  ;;  %v227_v42 = vadd.f32 %v837_v31, %v226_v39 }
 0x127   :  { %v228_v43 = vpop.f32.mrf.mxu0  ;;  %v306_v44 = vpop.f32.mrf.mxu1 }
 0x128   :  { %390 = vst [vmem:[%s966_s3 + $0xc0] sm:$0xff] %v359_v41  ;;  %v344_v45 = vmax.f32 %v227_v42, 0.0  ;;  %v307_v46 = vadd.f32 %v837_v31, %v306_v44 }
 0x129   :  { %v231_v47 = vpop.f32.mrf.mxu0  ;;  %v308_v48 = vpop.f32.mrf.mxu1 }
 0x12a   :  { %375 = vst [vmem:[%s966_s3 + $0x48] sm:$0xff] %v344_v45  ;;  %v360_v49 = vmax.f32 %v307_v46, 0.0  ;;  %v232_v50 = vadd.f32 %v837_v31, %v231_v47 }
 0x12b   :  { %v233_v51 = vpop.f32.mrf.mxu0  ;;  %v311_v52 = vpop.f32.mrf.mxu1 }
 0x12c   :  { %391 = vst [vmem:[%s966_s3 + $0xc8] sm:$0xff] %v360_v49  ;;  %v345_v53 = vmax.f32 %v232_v50, 0.0  ;;  %v312_v54 = vadd.f32 %v837_v31, %v311_v52 }
 0x12d   :  { %v236_v55 = vpop.f32.mrf.mxu0  ;;  %v313_v56 = vpop.f32.mrf.mxu1 }
 0x12e   :  { %376 = vst [vmem:[%s966_s3 + $0x50] sm:$0xff] %v345_v53  ;;  %v361_v57 = vmax.f32 %v312_v54, 0.0  ;;  %v237_v58 = vadd.f32 %v837_v31, %v236_v55 }
 0x12f   :  { %v238_v59 = vpop.f32.mrf.mxu0  ;;  %v316_v60 = vpop.f32.mrf.mxu1 }
 0x130   :  { %392 = vst [vmem:[%s966_s3 + $0xd0] sm:$0xff] %v361_v57  ;;  %v346_v61 = vmax.f32 %v237_v58, 0.0  ;;  %v317_v62 = vadd.f32 %v837_v31, %v316_v60 }
 0x131   :  { %v241_v63 = vpop.f32.mrf.mxu0  ;;  %v318_v0 = vpop.f32.mrf.mxu1 }
 0x132   :  { %377 = vst [vmem:[%s966_s3 + $0x58] sm:$0xff] %v346_v61  ;;  %v362_v1 = vmax.f32 %v317_v62, 0.0  ;;  %v242_v2 = vadd.f32 %v837_v31, %v241_v63 }
 0x133   :  { %v243_v3 = vpop.f32.mrf.mxu0  ;;  %v321_v4 = vpop.f32.mrf.mxu1 }
 0x134   :  { %393 = vst [vmem:[%s966_s3 + $0xd8] sm:$0xff] %v362_v1  ;;  %v347_v5 = vmax.f32 %v242_v2, 0.0  ;;  %v322_v6 = vadd.f32 %v837_v31, %v321_v4 }
 0x135   :  { %v246_v7 = vpop.f32.mrf.mxu0  ;;  %v323_v8 = vpop.f32.mrf.mxu1 }
 0x136   :  { %378 = vst [vmem:[%s966_s3 + $0x60] sm:$0xff] %v347_v5  ;;  %v363_v9 = vmax.f32 %v322_v6, 0.0  ;;  %v247_v10 = vadd.f32 %v837_v31, %v246_v7 }
 0x137   :  { %v248_v11 = vpop.f32.mrf.mxu0  ;;  %v326_v12 = vpop.f32.mrf.mxu1 }
 0x138   :  { %394 = vst [vmem:[%s966_s3 + $0xe0] sm:$0xff] %v363_v9  ;;  %v348_v13 = vmax.f32 %v247_v10, 0.0  ;;  %v327_v14 = vadd.f32 %v837_v31, %v326_v12 }
 0x139   :  { %v251_v15 = vpop.f32.mrf.mxu0  ;;  %v328_v16 = vpop.f32.mrf.mxu1 }
 0x13a   :  { %379 = vst [vmem:[%s966_s3 + $0x68] sm:$0xff] %v348_v13  ;;  %v364_v17 = vmax.f32 %v327_v14, 0.0  ;;  %v252_v18 = vadd.f32 %v837_v31, %v251_v15 }
 0x13b   :  { %v253_v19 = vpop.f32.mrf.mxu0  ;;  %v331_v20 = vpop.f32.mrf.mxu1 }
 0x13c   :  { %395 = vst [vmem:[%s966_s3 + $0xe8] sm:$0xff] %v364_v17  ;;  %v349_v21 = vmax.f32 %v252_v18, 0.0  ;;  %v332_v22 = vadd.f32 %v837_v31, %v331_v20 }
 0x13d   :  { %v256_v23 = vpop.f32.mrf.mxu0  ;;  %v333_v24 = vpop.f32.mrf.mxu1 }
 0x13e   :  { %380 = vst [vmem:[%s966_s3 + $0x70] sm:$0xff] %v349_v21  ;;  %v365_v25 = vmax.f32 %v332_v22, 0.0  ;;  %v257_v26 = vadd.f32 %v837_v31, %v256_v23 }
 0x13f   :  { %v258_v27 = vpop.f32.mrf.mxu0 }
 0x140   :  { %396 = vst [vmem:[%s966_s3 + $0xf0] sm:$0xff] %v365_v25  ;;  %v350_v28 = vmax.f32 %v257_v26, 0.0 }
 0x142   :  { %381 = vst [vmem:[%s966_s3 + $0x78] sm:$0xff] %v350_v28 }

// kernel: forward.5
= control target key start
LH: loop header
LB: loop body
LE: loop exit
PB: predicated region body
PF: predicated region fallthrough
CT: control target
= control target key end

     0   :  { %vm586_vm0 = vmmov 0   ;;  %s987_s1 = inlined_call_operand.vmem [shape: f32[896,128], index: 1, kind: input, shape index: {}]   ;;  %s988_s0 = inlined_call_operand.vmem [shape: f32[8,896], index: 0, kind: input, shape index: {}]   ;;  %s989_s2 = inlined_call_operand.vmem [shape: f32[1,128], index: 2, kind: input, shape index: {}]   ;;  %s990_s3 = inlined_call_operand.vmem [shape: f32[8,128], index: 3, kind: output, shape index: {}]  }
   0x1   :  { %v52_v0 = vld [vmem:[%s987_s1 + $0xf8] sm:$0xff]  ;;  %v51_v2 = vld [vmem:[%s987_s1 + $0xf0] sm:$0xff]  ;;  %v50_v6 = vld [vmem:[%s987_s1 + $0xe8] sm:$0xff] }
   0x2   :  { %v36_v1 = vld [vmem:[%s987_s1 + $0x78] sm:$0xff]  ;;  %426 = vmatprep.subr.mxu0 %v52_v0  ;;  %v35_v4 = vld [vmem:[%s987_s1 + $0x70] sm:$0xff]  ;;  %v34_v8 = vld [vmem:[%s987_s1 + $0x68] sm:$0xff] }
   0x3   :  { %v84_v3 = vld [vmem:[%s987_s1 + $0x1f8] sm:$0xff]  ;;  %427 = vmatpush3.msra.mxu0 %v36_v1  ;;  %v83_v7 = vld [vmem:[%s987_s1 + $0x1f0] sm:$0xff]  ;;  %v82_v10 = vld [vmem:[%s987_s1 + $0x1e8] sm:$0xff] }
   0x4   :  { %v68_v5 = vld [vmem:[%s987_s1 + $0x178] sm:$0xff]  ;;  %461 = vmatprep.subr.mxu1 %v84_v3  ;;  %428 = vmatprep.subr.mxu0 %v51_v2  ;;  %v67_v9 = vld [vmem:[%s987_s1 + $0x170] sm:$0xff]  ;;  %v49_v11 = vld [vmem:[%s987_s1 + $0xe0] sm:$0xff] }
   0x5   :  { %462 = vmatpush3.msra.mxu1 %v68_v5  ;;  %429 = vmatpush3.msra.mxu0 %v35_v4  ;;  %v66_v12 = vld [vmem:[%s987_s1 + $0x168] sm:$0xff]  ;;  %v33_v13 = vld [vmem:[%s987_s1 + $0x60] sm:$0xff]  ;;  %v48_v15 = vld [vmem:[%s987_s1 + $0xd8] sm:$0xff] }
   0x6   :  { %463 = vmatprep.subr.mxu1 %v83_v7  ;;  %430 = vmatprep.subr.mxu0 %v50_v6  ;;  %v81_v14 = vld [vmem:[%s987_s1 + $0x1e0] sm:$0xff]  ;;  %v32_v17 = vld [vmem:[%s987_s1 + $0x58] sm:$0xff]  ;;  %v47_v19 = vld [vmem:[%s987_s1 + $0xd0] sm:$0xff] }
   0x7   :  { %464 = vmatpush3.msra.mxu1 %v67_v9  ;;  %431 = vmatpush3.msra.mxu0 %v34_v8  ;;  %v65_v16 = vld [vmem:[%s987_s1 + $0x160] sm:$0xff]  ;;  %v80_v18 = vld [vmem:[%s987_s1 + $0x1d8] sm:$0xff]  ;;  %v31_v21 = vld [vmem:[%s987_s1 + $0x50] sm:$0xff] }
   0x8   :  { %465 = vmatprep.subr.mxu1 %v82_v10  ;;  %432 = vmatprep.subr.mxu0 %v49_v11  ;;  %v64_v20 = vld [vmem:[%s987_s1 + $0x158] sm:$0xff]  ;;  %v79_v22 = vld [vmem:[%s987_s1 + $0x1d0] sm:$0xff]  ;;  %v46_v23 = vld [vmem:[%s987_s1 + $0xc8] sm:$0xff]  ;;  %v585_v11 = vmov 0.0  }
   0x9   :  { %466 = vmatpush3.msra.mxu1 %v66_v12  ;;  %433 = vmatpush3.msra.mxu0 %v33_v13  ;;  %v63_v24 = vld [vmem:[%s987_s1 + $0x150] sm:$0xff]  ;;  %v30_v25 = vld [vmem:[%s987_s1 + $0x48] sm:$0xff]  ;;  %v45_v27 = vld [vmem:[%s987_s1 + $0xc0] sm:$0xff] }
   0xa   :  { %467 = vmatprep.subr.mxu1 %v81_v14  ;;  %434 = vmatprep.subr.mxu0 %v48_v15  ;;  %v78_v26 = vld [vmem:[%s987_s1 + $0x1c8] sm:$0xff]  ;;  %v29_v29 = vld [vmem:[%s987_s1 + $0x40] sm:$0xff]  ;;  %v44_v31 = vld [vmem:[%s987_s1 + $0xb8] sm:$0xff] }
   0xb   :  { %468 = vmatpush3.msra.mxu1 %v65_v16  ;;  %435 = vmatpush3.msra.mxu0 %v32_v17  ;;  %v62_v28 = vld [vmem:[%s987_s1 + $0x148] sm:$0xff]  ;;  %v77_v30 = vld [vmem:[%s987_s1 + $0x1c0] sm:$0xff]  ;;  %v28_v33 = vld [vmem:[%s987_s1 + $0x38] sm:$0xff] }
   0xc   :  { %469 = vmatprep.subr.mxu1 %v80_v18  ;;  %436 = vmatprep.subr.mxu0 %v47_v19  ;;  %v61_v32 = vld [vmem:[%s987_s1 + $0x140] sm:$0xff]  ;;  %v76_v34 = vld [vmem:[%s987_s1 + $0x1b8] sm:$0xff]  ;;  %v43_v35 = vld [vmem:[%s987_s1 + $0xb0] sm:$0xff] }
   0xd   :  { %470 = vmatpush3.msra.mxu1 %v64_v20  ;;  %437 = vmatpush3.msra.mxu0 %v31_v21  ;;  %v60_v36 = vld [vmem:[%s987_s1 + $0x138] sm:$0xff]  ;;  %v27_v37 = vld [vmem:[%s987_s1 + $0x30] sm:$0xff]  ;;  %v42_v39 = vld [vmem:[%s987_s1 + $0xa8] sm:$0xff] }
   0xe   :  { %471 = vmatprep.subr.mxu1 %v79_v22  ;;  %438 = vmatprep.subr.mxu0 %v46_v23  ;;  %v75_v38 = vld [vmem:[%s987_s1 + $0x1b0] sm:$0xff]  ;;  %v26_v41 = vld [vmem:[%s987_s1 + $0x28] sm:$0xff]  ;;  %v41_v43 = vld [vmem:[%s987_s1 + $0xa0] sm:$0xff] }
   0xf   :  { %472 = vmatpush3.msra.mxu1 %v63_v24  ;;  %439 = vmatpush3.msra.mxu0 %v30_v25  ;;  %v59_v40 = vld [vmem:[%s987_s1 + $0x130] sm:$0xff]  ;;  %v74_v42 = vld [vmem:[%s987_s1 + $0x1a8] sm:$0xff]  ;;  %v25_v45 = vld [vmem:[%s987_s1 + $0x20] sm:$0xff] }
  0x10   :  { %473 = vmatprep.subr.mxu1 %v78_v26  ;;  %440 = vmatprep.subr.mxu0 %v45_v27  ;;  %v58_v44 = vld [vmem:[%s987_s1 + $0x128] sm:$0xff]  ;;  %v73_v46 = vld [vmem:[%s987_s1 + $0x1a0] sm:$0xff]  ;;  %v40_v47 = vld [vmem:[%s987_s1 + $0x98] sm:$0xff] }
  0x11   :  { %474 = vmatpush3.msra.mxu1 %v62_v28  ;;  %441 = vmatpush3.msra.mxu0 %v29_v29  ;;  %v57_v48 = vld [vmem:[%s987_s1 + $0x120] sm:$0xff]  ;;  %v24_v49 = vld [vmem:[%s987_s1 + $0x18] sm:$0xff]  ;;  %v39_v51 = vld [vmem:[%s987_s1 + $0x90] sm:$0xff] }
  0x12   :  { %475 = vmatprep.subr.mxu1 %v77_v30  ;;  %442 = vmatprep.subr.mxu0 %v44_v31  ;;  %v72_v50 = vld [vmem:[%s987_s1 + $0x198] sm:$0xff]  ;;  %v23_v53 = vld [vmem:[%s987_s1 + $0x10] sm:$0xff]  ;;  %v38_v55 = vld [vmem:[%s987_s1 + $0x88] sm:$0xff] }
  0x13   :  { %476 = vmatpush3.msra.mxu1 %v61_v32  ;;  %443 = vmatpush3.msra.mxu0 %v28_v33  ;;  %v56_v52 = vld [vmem:[%s987_s1 + $0x118] sm:$0xff]  ;;  %v71_v54 = vld [vmem:[%s987_s1 + $0x190] sm:$0xff]  ;;  %v22_v57 = vld [vmem:[%s987_s1 + $0x8] sm:$0xff] }
  0x14   :  { %477 = vmatprep.subr.mxu1 %v76_v34  ;;  %444 = vmatprep.subr.mxu0 %v43_v35  ;;  %v55_v56 = vld [vmem:[%s987_s1 + $0x110] sm:$0xff]  ;;  %v70_v58 = vld [vmem:[%s987_s1 + $0x188] sm:$0xff]  ;;  %v37_v59 = vld [vmem:[%s987_s1 + $0x80] sm:$0xff] }
  0x15   :  { %478 = vmatpush3.msra.mxu1 %v60_v36  ;;  %445 = vmatpush3.msra.mxu0 %v27_v37  ;;  %v15_v60 = vld [vmem:[%s988_s0 + $0x8] sm:$0xff]  ;;  %v21_v61 = vld [vmem:[%s987_s1] sm:$0xff]  ;;  %v116_v1 = vld [vmem:[%s987_s1 + $0x2f8] sm:$0xff] }
  0x16   :  { %479 = vmatprep.subr.mxu1 %v75_v38  ;;  %446 = vmatprep.subr.mxu0 %v42_v39  ;;  %v54_v62 = vld [vmem:[%s987_s1 + $0x108] sm:$0xff]  ;;  %v14_v63 = vld [vmem:[%s988_s0] sm:$0xff]  ;;  %v17_v3 = vld [vmem:[%s988_s0 + $0x18] sm:$0xff] }
  0x17   :  { %480 = vmatpush3.msra.mxu1 %v59_v40  ;;  %447 = vmatpush3.msra.mxu0 %v26_v41  ;;  %v69_v0 = vld [vmem:[%s987_s1 + $0x180] sm:$0xff]  ;;  %v100_v4 = vld [vmem:[%s987_s1 + $0x278] sm:$0xff]  ;;  %v16_v5 = vld [vmem:[%s988_s0 + $0x10] sm:$0xff] }
  0x18   :  { %481 = vmatprep.subr.mxu1 %v74_v42  ;;  %448 = vmatprep.subr.mxu0 %v41_v43  ;;  %v53_v2 = vld [vmem:[%s987_s1 + $0x100] sm:$0xff]  ;;  %v115_v6 = vld [vmem:[%s987_s1 + $0x2f0] sm:$0xff]  ;;  %v114_v8 = vld [vmem:[%s987_s1 + $0x2e8] sm:$0xff] }
  0x19   :  { %482 = vmatpush3.msra.mxu1 %v58_v44  ;;  %449 = vmatpush3.msra.mxu0 %v25_v45  ;;  %v99_v7 = vld [vmem:[%s987_s1 + $0x270] sm:$0xff]  ;;  %v132_v9 = vld [vmem:[%s987_s1 + $0x378] sm:$0xff]  ;;  %v98_v10 = vld [vmem:[%s987_s1 + $0x268] sm:$0xff] }
  0x1a   :  { %483 = vmatprep.subr.mxu1 %v73_v46  ;;  %450 = vmatprep.subr.mxu0 %v40_v47  ;;  %v113_v12 = vld [vmem:[%s987_s1 + $0x2e0] sm:$0xff]  ;;  %v131_v13 = vld [vmem:[%s987_s1 + $0x370] sm:$0xff]  ;;  %v112_v15 = vld [vmem:[%s987_s1 + $0x2d8] sm:$0xff] }
  0x1b   :  { %484 = vmatpush3.msra.mxu1 %v57_v48  ;;  %451 = vmatpush3.msra.mxu0 %v24_v49  ;;  %v97_v14 = vld [vmem:[%s987_s1 + $0x260] sm:$0xff]  ;;  %v130_v16 = vld [vmem:[%s987_s1 + $0x368] sm:$0xff]  ;;  %v96_v17 = vld [vmem:[%s987_s1 + $0x258] sm:$0xff] }
  0x1c   :  { %485 = vmatprep.subr.mxu1 %v72_v50  ;;  %452 = vmatprep.subr.mxu0 %v39_v51  ;;  %v111_v18 = vld [vmem:[%s987_s1 + $0x2d0] sm:$0xff]  ;;  %v129_v19 = vld [vmem:[%s987_s1 + $0x360] sm:$0xff]  ;;  %v110_v21 = vld [vmem:[%s987_s1 + $0x2c8] sm:$0xff] }
  0x1d   :  { %486 = vmatpush3.msra.mxu1 %v56_v52  ;;  %453 = vmatpush3.msra.mxu0 %v23_v53  ;;  %v95_v20 = vld [vmem:[%s987_s1 + $0x250] sm:$0xff]  ;;  %v128_v22 = vld [vmem:[%s987_s1 + $0x358] sm:$0xff]  ;;  %v94_v23 = vld [vmem:[%s987_s1 + $0x248] sm:$0xff] }
  0x1e   :  { %487 = vmatprep.subr.mxu1 %v71_v54  ;;  %454 = vmatprep.subr.mxu0 %v38_v55  ;;  %v109_v24 = vld [vmem:[%s987_s1 + $0x2c0] sm:$0xff]  ;;  %v127_v25 = vld [vmem:[%s987_s1 + $0x350] sm:$0xff]  ;;  %v108_v27 = vld [vmem:[%s987_s1 + $0x2b8] sm:$0xff] }
  0x1f   :  { %488 = vmatpush3.msra.mxu1 %v55_v56  ;;  %455 = vmatpush3.msra.mxu0 %v22_v57  ;;  %v93_v26 = vld [vmem:[%s987_s1 + $0x240] sm:$0xff]  ;;  %v126_v28 = vld [vmem:[%s987_s1 + $0x348] sm:$0xff]  ;;  %v92_v29 = vld [vmem:[%s987_s1 + $0x238] sm:$0xff] }
  0x20   :  { %489 = vmatprep.subr.mxu1 %v70_v58  ;;  %456 = vmatprep.subr.mxu0 %v37_v59  ;;  %v107_v30 = vld [vmem:[%s987_s1 + $0x2b0] sm:$0xff]  ;;  %v125_v31 = vld [vmem:[%s987_s1 + $0x340] sm:$0xff]  ;;  %v106_v33 = vld [vmem:[%s987_s1 + $0x2a8] sm:$0xff] }
  0x21   :  { %204 = vmatprep.mubr.f32.mxu0 %v15_v60  ;;  %457 = vmatpush3.msra.mxu0 %v21_v61  ;;  %v91_v32 = vld [vmem:[%s987_s1 + $0x230] sm:$0xff]  ;;  %v124_v34 = vld [vmem:[%s987_s1 + $0x338] sm:$0xff]  ;;  %v90_v35 = vld [vmem:[%s987_s1 + $0x228] sm:$0xff] }
  0x22   :  { %490 = vmatpush3.msra.mxu1 %v54_v62  ;;  %205 = vmatmul.mubr.f32.vlgmr.msra.gmra.mxu0 %v14_v63  ;;  %v105_v36 = vld [vmem:[%s987_s1 + $0x2a0] sm:$0xff]  ;;  %v123_v37 = vld [vmem:[%s987_s1 + $0x330] sm:$0xff]  ;;  %v104_v39 = vld [vmem:[%s987_s1 + $0x298] sm:$0xff] }
  0x23   :  { %491 = vmatprep.subr.mxu1 %v69_v0  ;;  %496 = vmatprep.subr.mxu0 %v116_v1  ;;  %v89_v38 = vld [vmem:[%s987_s1 + $0x220] sm:$0xff]  ;;  %v122_v40 = vld [vmem:[%s987_s1 + $0x328] sm:$0xff]  ;;  %v88_v41 = vld [vmem:[%s987_s1 + $0x218] sm:$0xff] }
  0x24   :  { %492 = vmatpush3.msra.mxu1 %v53_v2  ;;  %274 = vmatprep.mubr.f32.mxu1 %v17_v3  ;;  %v103_v42 = vld [vmem:[%s987_s1 + $0x290] sm:$0xff]  ;;  %v121_v43 = vld [vmem:[%s987_s1 + $0x320] sm:$0xff]  ;;  %v102_v45 = vld [vmem:[%s987_s1 + $0x288] sm:$0xff] }
  0x25   :  { %497 = vmatpush3.msra.mxu0 %v100_v4  ;;  %275 = vmatmul.mubr.f32.vlgmr.msra.gmra.mxu1 %v16_v5  ;;  %v87_v44 = vld [vmem:[%s987_s1 + $0x210] sm:$0xff]  ;;  %v120_v46 = vld [vmem:[%s987_s1 + $0x318] sm:$0xff]  ;;  %v86_v47 = vld [vmem:[%s987_s1 + $0x208] sm:$0xff] }
  0x26   :  { %498 = vmatprep.subr.mxu0 %v115_v6  ;;  %548 = vmatprep.subr.mxu1 %v585_v11  ;;  %v101_v48 = vld [vmem:[%s987_s1 + $0x280] sm:$0xff]  ;;  %v19_v49 = vld [vmem:[%s988_s0 + $0x28] sm:$0xff]  ;;  %v119_v51 = vld [vmem:[%s987_s1 + $0x310] sm:$0xff] }
  0x27   :  { %499 = vmatpush3.msra.mxu0 %v99_v7  ;;  %549 = vmatpush3.msra.mxu1 %v132_v9  ;;  %v85_v50 = vld [vmem:[%s987_s1 + $0x200] sm:$0xff]  ;;  %v118_v53 = vld [vmem:[%s987_s1 + $0x308] sm:$0xff]  ;;  %v20_v55 = vld [vmem:[%s988_s0 + $0x30] sm:$0xff] }
  0x28   :  { %500 = vmatprep.subr.mxu0 %v114_v8  ;;  %550 = vmatprep.subr.mxu1 %v585_v11  ;;  %v18_v52 = vld [vmem:[%s988_s0 + $0x20] sm:$0xff] }
  0x29   :  { %501 = vmatpush3.msra.mxu0 %v98_v10  ;;  %551 = vmatpush3.msra.mxu1 %v131_v13  ;;  %v117_v54 = vld [vmem:[%s987_s1 + $0x300] sm:$0xff] }
  0x2a   :  { %502 = vmatprep.subr.mxu0 %v113_v12  ;;  %552 = vmatprep.subr.mxu1 %v585_v11  ;;  %v425_v60 = vld [vmem:[%s989_s2] ss:$0 sm:$0xff] }
  0x2b   :  { %503 = vmatpush3.msra.mxu0 %v97_v14  ;;  %553 = vmatpush3.msra.mxu1 %v130_v16 }
  0x2c   :  { %504 = vmatprep.subr.mxu0 %v112_v15  ;;  %554 = vmatprep.subr.mxu1 %v585_v11 }
  0x2d   :  { %505 = vmatpush3.msra.mxu0 %v96_v17  ;;  %555 = vmatpush3.msra.mxu1 %v129_v19 }
  0x2e   :  { %506 = vmatprep.subr.mxu0 %v111_v18  ;;  %556 = vmatprep.subr.mxu1 %v585_v11 }
  0x2f   :  { %507 = vmatpush3.msra.mxu0 %v95_v20  ;;  %557 = vmatpush3.msra.mxu1 %v128_v22 }
  0x30   :  { %508 = vmatprep.subr.mxu0 %v110_v21  ;;  %558 = vmatprep.subr.mxu1 %v585_v11 }
  0x31   :  { %509 = vmatpush3.msra.mxu0 %v94_v23  ;;  %559 = vmatpush3.msra.mxu1 %v127_v25 }
  0x32   :  { %510 = vmatprep.subr.mxu0 %v109_v24  ;;  %560 = vmatprep.subr.mxu1 %v585_v11 }
  0x33   :  { %511 = vmatpush3.msra.mxu0 %v93_v26  ;;  %561 = vmatpush3.msra.mxu1 %v126_v28 }
  0x34   :  { %512 = vmatprep.subr.mxu0 %v108_v27  ;;  %562 = vmatprep.subr.mxu1 %v585_v11 }
  0x35   :  { %513 = vmatpush3.msra.mxu0 %v92_v29  ;;  %563 = vmatpush3.msra.mxu1 %v125_v31 }
  0x36   :  { %514 = vmatprep.subr.mxu0 %v107_v30  ;;  %564 = vmatprep.subr.mxu1 %v585_v11 }
  0x37   :  { %515 = vmatpush3.msra.mxu0 %v91_v32  ;;  %565 = vmatpush3.msra.mxu1 %v124_v34 }
  0x38   :  { %516 = vmatprep.subr.mxu0 %v106_v33  ;;  %566 = vmatprep.subr.mxu1 %v585_v11 }
  0x39   :  { %517 = vmatpush3.msra.mxu0 %v90_v35  ;;  %567 = vmatpush3.msra.mxu1 %v123_v37 }
  0x3a   :  { %518 = vmatprep.subr.mxu0 %v105_v36  ;;  %568 = vmatprep.subr.mxu1 %v585_v11 }
  0x3b   :  { %519 = vmatpush3.msra.mxu0 %v89_v38  ;;  %569 = vmatpush3.msra.mxu1 %v122_v40 }
  0x3c   :  { %520 = vmatprep.subr.mxu0 %v104_v39  ;;  %570 = vmatprep.subr.mxu1 %v585_v11 }
  0x3d   :  { %521 = vmatpush3.msra.mxu0 %v88_v41  ;;  %571 = vmatpush3.msra.mxu1 %v121_v43 }
  0x3e   :  { %522 = vmatprep.subr.mxu0 %v103_v42  ;;  %572 = vmatprep.subr.mxu1 %v585_v11 }
  0x3f   :  { %523 = vmatpush3.msra.mxu0 %v87_v44  ;;  %573 = vmatpush3.msra.mxu1 %v120_v46 }
  0x40   :  { %524 = vmatprep.subr.mxu0 %v102_v45  ;;  %574 = vmatprep.subr.mxu1 %v585_v11 }
  0x41   :  { %525 = vmatpush3.msra.mxu0 %v86_v47  ;;  %344 = vmatprep.mubr.f32.mxu0 %v19_v49 }
  0x42   :  { %526 = vmatprep.subr.mxu0 %v101_v48  ;;  %575 = vmatpush3.msra.mxu1 %v119_v51 }
  0x43   :  { %527 = vmatpush3.msra.mxu0 %v85_v50  ;;  %576 = vmatprep.subr.mxu1 %v585_v11 }
  0x44   :  { %345 = vmatmul.mubr.f32.vlgmr.msra.gmra.mxu0 %v18_v52  ;;  %577 = vmatpush3.msra.mxu1 %v118_v53 }
  0x45   :  { %580 = vmatprep.mubr.msk.f32.mxu1 %vm586_vm0, %v585_v11  ;;  %578 = vmatprep.subr.mxu1 %v585_v11 }
  0x46   :  { %579 = vmatpush3.msra.mxu1 %v117_v54 }
  0x47   :  { %581 = vmatmul.mubr.f32.vlgmr.msra.gmra.mxu1 %v20_v55 }
  0xe2   :  { %v458_v56 = vpop.f32.mrf.mxu0 }
  0xe4   :  { %v459_v57 = vpop.f32.mrf.mxu0 }
  0xe5   :  { %v493_v58 = vpop.f32.mrf.mxu1  ;;  %v460_v59 = vadd.f32 %v459_v57, %v458_v56 }
  0xe7   :  { %v494_v61 = vpop.f32.mrf.mxu1  ;;  %v207_v62 = vadd.f32 %v460_v59, %v425_v60 }
  0xe8   :  { %v495_v63 = vadd.f32 %v494_v61, %v493_v58 }
  0xea   :  { %v277_v2 = vadd.f32 %v495_v63, %v207_v62 }
 0x104   :  { %v528_v0 = vpop.f32.mrf.mxu0 }
 0x106   :  { %v529_v1 = vpop.f32.mrf.mxu0 }
 0x107   :  { %v530_v3 = vadd.f32 %v529_v1, %v528_v0  ;;  %v416_v4 = vpop.f32.mrf.mxu1 }
 0x109   :  { %v347_v5 = vadd.f32 %v530_v3, %v277_v2  ;;  %v582_v6 = vpop.f32.mrf.mxu1 }
 0x10b   :  { %v417_v7 = vadd.f32 %v416_v4, %v347_v5 }
 0x10d   :  { %420 = vst [vmem:[%s990_s3] sm:$0xff] %v417_v7 }

</bundles_post_ra>
